<compile_context>
chip_gen: v6e
topology: v6e:2x2x1
jax: 0.10.0
libtpu: 0.0.40
codegen_flags: <defaults>
</compile_context>

<pallas_src>
import functools

import jax
import jax.numpy as jnp
from jax.experimental import pallas as pl
from jax.experimental.pallas import tpu as pltpu

OUT_PAD = 128          # final 1-wide layer zero-padded to a full lane group (MXU)
_LANE = 128
_BF16_SUBLANE = 16     # bf16 sublane packing -> batch tile must be multiple of 16


def _round_up(x, m):
    return ((x + m - 1) // m) * m


def discriminator_kernel(x_ref,
                         w1_ref, b1_ref,
                         w2_ref, b2_ref,
                         w3_ref, b3_ref,
                         w4_ref, b4_ref,
                         o_ref,
                         acc_ref):
    """Grid = (batch step i, K step k).  Layer-1 partial products accumulate in
    f32 scratch; the remaining layers + sigmoid run once at k == last."""
    k = pl.program_id(1)

    @pl.when(k == 0)
    def _init():
        acc_ref[...] = jnp.zeros_like(acc_ref)

    # Layer 1 (K-tiled): bf16 MXU, f32 accumulation.
    acc_ref[...] += jnp.dot(x_ref[...], w1_ref[...],
                            preferred_element_type=jnp.float32)

    @pl.when(k == pl.num_programs(1) - 1)
    def _epilogue():
        h = acc_ref[...] + b1_ref[...]
        h = jnp.maximum(h, 0.2 * h)                       # LeakyReLU(0.2)
        h = jnp.dot(h.astype(jnp.bfloat16), w2_ref[...],
                    preferred_element_type=jnp.float32) + b2_ref[...]
        h = jnp.maximum(h, 0.2 * h)
        h = jnp.dot(h.astype(jnp.bfloat16), w3_ref[...],
                    preferred_element_type=jnp.float32) + b3_ref[...]
        h = jnp.maximum(h, 0.2 * h)
        h = jnp.dot(h.astype(jnp.bfloat16), w4_ref[...],
                    preferred_element_type=jnp.float32) + b4_ref[...]
        # Only lane 0 is the real logit (w4/b4 are zero-padded to 128 lanes).
        logit = h[:, 0:1]                                  # (bm, 1) f32
        # sigmoid: exp on the EUP + approximate reciprocal (also EUP slot).
        o_ref[...] = pl.reciprocal(1.0 + jnp.exp(-logit), approx=True)


def prepare_params(params, block_k=2048, weight_dtype=jnp.bfloat16):
    """One-time parameter prep (NOT in the hot path):
       - weights cast to bf16, biases to (1, N) f32 (added to f32 accumulator),
       - w1 zero-padded along K to n_k * tk (tk multiple of 128, <= block_k),
       - final 1-wide layer zero-padded to OUT_PAD lanes for the MXU."""
    (w1, b1), (w2, b2), (w3, b3), (w4, b4) = params
    d = w1.shape[0]
    d128 = _round_up(d, _LANE)
    n_k = max(1, -(-d128 // block_k))
    tk = _round_up(-(-d128 // n_k), _LANE)
    d_pad = n_k * tk

    w1_p = jnp.zeros((d_pad, w1.shape[1]), weight_dtype)
    w1_p = w1_p.at[:d, :].set(w1.astype(weight_dtype))
    w4_p = jnp.zeros((w4.shape[0], OUT_PAD), weight_dtype)
    w4_p = w4_p.at[:, :1].set(w4.astype(weight_dtype))
    b4_p = jnp.zeros((1, OUT_PAD), jnp.float32)
    b4_p = b4_p.at[:, :1].set(b4.reshape(1, -1).astype(jnp.float32))

    weights = (w1_p, b1.reshape(1, -1).astype(jnp.float32),
               w2.astype(weight_dtype), b2.reshape(1, -1).astype(jnp.float32),
               w3.astype(weight_dtype), b3.reshape(1, -1).astype(jnp.float32),
               w4_p, b4_p)
    return {"weights": weights, "tk": tk, "input_dim": d}


@functools.partial(jax.jit, static_argnames=("tk", "block_m"))
def _discriminator_forward(x, weights, *, tk, block_m=512):
    """x: [B, ...] float32.  Returns [B, 1] float32 sigmoid probabilities."""
    w1, b1, w2, b2, w3, b3, w4, b4 = weights
    B = x.shape[0]
    d_pad, n1 = w1.shape
    n_k = d_pad // tk

    # x.view(B, -1); bf16 in the wrapper so the kernel streams half the bytes.
    x2 = x.reshape(B, -1).astype(jnp.bfloat16)
    d = x2.shape[1]
    if d != d_pad:                                 # zero-pad K (matches w1 pad)
        x2 = jnp.pad(x2, ((0, 0), (0, d_pad - d)))

    # Batch tile: multiple of 16 (bf16 sublanes), at most block_m; for larger
    # batches force an even number (>=2) of batch steps so the "parallel" axis
    # balances across v7x's two TensorCores.
    bm = min(block_m, _round_up(B, _BF16_SUBLANE))
    steps = -(-B // bm)
    if B > 128 and steps % 2 == 1:
        steps += 1
        bm = min(bm, _round_up(-(-B // steps), _BF16_SUBLANE))
        steps = -(-B // bm)
    b_pad = steps * bm
    if b_pad != B:
        x2 = jnp.pad(x2, ((0, b_pad - B), (0, 0)))

    const = lambda i, k: (0, 0)                    # same block every grid step
    resident = dict(pipeline_mode=pl.Buffered(1))  # single VMEM buffer

    out = pl.pallas_call(
        discriminator_kernel,
        out_shape=jax.ShapeDtypeStruct((b_pad, 1), jnp.float32),
        grid=(steps, n_k),
        in_specs=[
            pl.BlockSpec((bm, tk), lambda i, k: (i, k)),     # x: streamed bf16
            pl.BlockSpec((tk, n1), lambda i, k: (k, 0)),     # w1: K-tiled
            pl.BlockSpec(b1.shape, const, **resident),
            pl.BlockSpec(w2.shape, const, **resident),
            pl.BlockSpec(b2.shape, const, **resident),
            pl.BlockSpec(w3.shape, const, **resident),
            pl.BlockSpec(b3.shape, const, **resident),
            pl.BlockSpec(w4.shape, const, **resident),
            pl.BlockSpec(b4.shape, const, **resident),
        ],
        out_specs=pl.BlockSpec((bm, 1), lambda i, k: (i, 0)),
        scratch_shapes=[pltpu.VMEM((bm, n1), jnp.float32)],   # layer-1 f32 acc
        compiler_params=pltpu.CompilerParams(
            dimension_semantics=("parallel", "arbitrary"),
            vmem_limit_bytes=48 << 20,
        ),
    )(x2, w1, b1, w2, b2, w3, b3, w4, b4)

    return out[:B]


def discriminator_forward(x, prepared, block_m=512):
    return _discriminator_forward(x, prepared["weights"],
                                  tk=prepared["tk"], block_m=block_m)


def init_params(key, input_dim):
    """Deterministic init matching nn.Linear shapes; U(-1/sqrt(in), 1/sqrt(in))."""
    dims = [(input_dim, 1024), (1024, 512), (512, 256), (256, 1)]
    params = []
    for i, (fan_in, fan_out) in enumerate(dims):
        kw, kb, key = jax.random.split(jax.random.fold_in(key, i), 3)
        bound = 1.0 / (fan_in ** 0.5)
        w = jax.random.uniform(kw, (fan_in, fan_out), jnp.float32, -bound, bound)
        b = jax.random.uniform(kb, (fan_out,), jnp.float32, -bound, bound)
        params.append((w, b))
    return params


def reference_forward_f32(x, params):
    """Plain-JAX f32 reference (module semantics)."""
    h = x.reshape(x.shape[0], -1)
    for i, (w, b) in enumerate(params):
        h = h @ w + b
        h = jnp.where(h > 0, h, 0.2 * h) if i < 3 else jax.nn.sigmoid(h)
    return h


def reference_forward_bf16(x, prepared):
    """Plain-JAX reference mimicking the kernel numerics (bf16 operands,
    f32 accumulation)."""
    w1, b1, w2, b2, w3, b3, w4, b4 = prepared["weights"]
    h = x.reshape(x.shape[0], -1).astype(jnp.float32)
    if h.shape[1] != w1.shape[0]:
        h = jnp.pad(h, ((0, 0), (0, w1.shape[0] - h.shape[1])))
    for i, (w, b) in enumerate(((w1, b1), (w2, b2), (w3, b3), (w4, b4))):
        h = jnp.dot(h.astype(jnp.bfloat16), w,
                    preferred_element_type=jnp.float32) + b
        h = jnp.where(h > 0, h, 0.2 * h) if i < 3 else jax.nn.sigmoid(h)
    return h[:, :1]


if __name__ == "__main__":
    key = jax.random.PRNGKey(0)
    kx, kp = jax.random.split(key)

    # Small shapes consistent with the module: batch=2, channels=3, 16x16
    # spatial -> input_dim = 768.
    B, C, H, W = 2, 3, 16, 16
    input_dim = C * H * W
    x = jax.random.normal(kx, (B, C, H, W), jnp.float32)

    params = init_params(kp, input_dim)
    prepared = prepare_params(params)        # one-time prep; single K step here

    # --- tiny batch (single grid step) ---
    out = jax.block_until_ready(discriminator_forward(x, prepared))
    assert out.shape == (B, 1), out.shape
    ref_b = reference_forward_bf16(x, prepared)
    ref_f = reference_forward_f32(x, params)
    assert jnp.allclose(out, ref_b, atol=5e-3, rtol=5e-3), (out, ref_b)
    assert jnp.allclose(out, ref_f, atol=3e-2, rtol=3e-2), (out, ref_f)

    # --- larger batch: even number (2) of pipelined batch steps ---
    B2 = 300
    x_big = jax.random.normal(jax.random.fold_in(kx, 1), (B2, C, H, W), jnp.float32)
    out2 = jax.block_until_ready(discriminator_forward(x_big, prepared))
    assert out2.shape == (B2, 1), out2.shape
    assert jnp.allclose(out2, reference_forward_bf16(x_big, prepared),
                        atol=5e-3, rtol=5e-3)

    # --- K-tiled layer 1 (the path needed for the PyTorch-default input_dim
    #     where w1 cannot be whole-array VMEM resident): 3 K steps, 4 batch steps.
    prepared_k = prepare_params(params, block_k=256)
    out3 = jax.block_until_ready(discriminator_forward(x_big, prepared_k, block_m=128))
    assert out3.shape == (B2, 1), out3.shape
    assert jnp.allclose(out3, reference_forward_bf16(x_big, prepared_k),
                        atol=5e-3, rtol=5e-3)

    print("KERNEL_OK")
</pallas_src>

<mosaic_0001>
module attributes {stable_mosaic.version = 11 : i64} {
  func.func @discriminator_kernel(%arg0: i32, %arg1: i32, %arg2: memref<16x768xbf16, #tpu.memory_space<vmem>>, %arg3: memref<768x1024xbf16, #tpu.memory_space<vmem>>, %arg4: memref<1x1024xf32, #tpu.memory_space<vmem>>, %arg5: memref<1024x512xbf16, #tpu.memory_space<vmem>>, %arg6: memref<1x512xf32, #tpu.memory_space<vmem>>, %arg7: memref<512x256xbf16, #tpu.memory_space<vmem>>, %arg8: memref<1x256xf32, #tpu.memory_space<vmem>>, %arg9: memref<256x128xbf16, #tpu.memory_space<vmem>>, %arg10: memref<1x128xf32, #tpu.memory_space<vmem>>, %arg11: memref<16x1xf32, #tpu.memory_space<vmem>>, %arg12: memref<16x1024xf32, #tpu.memory_space<vmem>>) attributes {dimension_semantics = [#tpu.dimension_semantics<parallel>, #tpu.dimension_semantics<arbitrary>], iteration_bounds = array<i64: 1, 1>, scalar_prefetch = 0 : i64, scratch_operands = 1 : i64, tpu.core_type = #tpu.core_type<tc>, window_params = [{transform_indices = @transform_0, window_bounds = array<i64: 16, 768>}, {transform_indices = @transform_1, window_bounds = array<i64: 768, 1024>}, {pipeline_mode = #tpu.pipeline_mode<synchronous>, transform_indices = @transform_2, window_bounds = array<i64: 1, 1024>}, {pipeline_mode = #tpu.pipeline_mode<synchronous>, transform_indices = @transform_3, window_bounds = array<i64: 1024, 512>}, {pipeline_mode = #tpu.pipeline_mode<synchronous>, transform_indices = @transform_4, window_bounds = array<i64: 1, 512>}, {pipeline_mode = #tpu.pipeline_mode<synchronous>, transform_indices = @transform_5, window_bounds = array<i64: 512, 256>}, {pipeline_mode = #tpu.pipeline_mode<synchronous>, transform_indices = @transform_6, window_bounds = array<i64: 1, 256>}, {pipeline_mode = #tpu.pipeline_mode<synchronous>, transform_indices = @transform_7, window_bounds = array<i64: 256, 128>}, {pipeline_mode = #tpu.pipeline_mode<synchronous>, transform_indices = @transform_8, window_bounds = array<i64: 1, 128>}, {transform_indices = @transform_9, window_bounds = array<i64: 16, 1>}]} {
    %c0_i32 = arith.constant 0 : i32
    %0 = arith.cmpi eq, %arg1, %c0_i32 : i32
    %1 = arith.extui %0 : i1 to i32
    %c0_i32_0 = arith.constant 0 : i32
    %2 = arith.cmpi ne, %1, %c0_i32_0 : i32
    scf.if %2 {
      %cst_10 = arith.constant 0.000000e+00 : f32
      %12 = vector.broadcast %cst_10 : f32 to vector<16x1024xf32>
      %c0_11 = arith.constant 0 : index
      %c0_12 = arith.constant 0 : index
      %13 = vector.load %arg12[%c0_11, %c0_12] : memref<16x1024xf32, #tpu.memory_space<vmem>>, vector<16x1024xf32>
      tpu.vector_store %arg12[%c0_11, %c0_12], %12 {strides = array<i32>} : memref<16x1024xf32, #tpu.memory_space<vmem>>, vector<16x1024xf32>,
    } else {
    }
    %c0 = arith.constant 0 : index
    %c0_1 = arith.constant 0 : index
    %3 = vector.load %arg12[%c0, %c0_1] : memref<16x1024xf32, #tpu.memory_space<vmem>>, vector<16x1024xf32>
    %c0_2 = arith.constant 0 : index
    %c0_3 = arith.constant 0 : index
    %4 = vector.load %arg2[%c0_2, %c0_3] : memref<16x768xbf16, #tpu.memory_space<vmem>>, vector<16x768xbf16>
    %c0_4 = arith.constant 0 : index
    %c0_5 = arith.constant 0 : index
    %5 = vector.load %arg3[%c0_4, %c0_5] : memref<768x1024xbf16, #tpu.memory_space<vmem>>, vector<768x1024xbf16>
    %cst = arith.constant dense<0.000000e+00> : vector<16x1024xf32>
    %6 = tpu.matmul %4, %5, %cst {dimension_numbers = #tpu.dot_dimension_numbers<[1], [0], [0], [1], [0, 0, 1, 1], [], []>} : vector<16x768xbf16>, vector<768x1024xbf16>, vector<16x1024xf32> -> vector<16x1024xf32>
    %7 = arith.addf %3, %6 : vector<16x1024xf32>
    %c0_6 = arith.constant 0 : index
    %c0_7 = arith.constant 0 : index
    %8 = vector.load %arg12[%c0_6, %c0_7] : memref<16x1024xf32, #tpu.memory_space<vmem>>, vector<16x1024xf32>
    tpu.vector_store %arg12[%c0_6, %c0_7], %7 {strides = array<i32>} : memref<16x1024xf32, #tpu.memory_space<vmem>>, vector<16x1024xf32>,
    %c0_i32_8 = arith.constant 0 : i32
    %9 = arith.cmpi eq, %arg1, %c0_i32_8 : i32
    %10 = arith.extui %9 : i1 to i32
    %c0_i32_9 = arith.constant 0 : i32
    %11 = arith.cmpi ne, %10, %c0_i32_9 : i32
    scf.if %11 {
      %c0_10 = arith.constant 0 : index
      %c0_11 = arith.constant 0 : index
      %12 = vector.load %arg12[%c0_10, %c0_11] : memref<16x1024xf32, #tpu.memory_space<vmem>>, vector<16x1024xf32>
      %c0_12 = arith.constant 0 : index
      %c0_13 = arith.constant 0 : index
      %13 = vector.load %arg4[%c0_12, %c0_13] : memref<1x1024xf32, #tpu.memory_space<vmem>>, vector<1x1024xf32>
      %14 = vector.broadcast %13 : vector<1x1024xf32> to vector<16x1024xf32>
      %15 = arith.addf %12, %14 : vector<16x1024xf32>
      %cst_14 = arith.constant 2.000000e-01 : f32
      %16 = vector.broadcast %cst_14 : f32 to vector<16x1024xf32>
      %17 = arith.mulf %16, %15 : vector<16x1024xf32>
      %18 = arith.maximumf %15, %17 : vector<16x1024xf32>
      %19 = arith.truncf %18 : vector<16x1024xf32> to vector<16x1024xbf16>
      %c0_15 = arith.constant 0 : index
      %c0_16 = arith.constant 0 : index
      %20 = vector.load %arg5[%c0_15, %c0_16] : memref<1024x512xbf16, #tpu.memory_space<vmem>>, vector<1024x512xbf16>
      %cst_17 = arith.constant dense<0.000000e+00> : vector<16x512xf32>
      %21 = tpu.matmul %19, %20, %cst_17 {dimension_numbers = #tpu.dot_dimension_numbers<[1], [0], [0], [1], [0, 0, 1, 1], [], []>} : vector<16x1024xbf16>, vector<1024x512xbf16>, vector<16x512xf32> -> vector<16x512xf32>
      %c0_18 = arith.constant 0 : index
      %c0_19 = arith.constant 0 : index
      %22 = vector.load %arg6[%c0_18, %c0_19] : memref<1x512xf32, #tpu.memory_space<vmem>>, vector<1x512xf32>
      %23 = vector.broadcast %22 : vector<1x512xf32> to vector<16x512xf32>
      %24 = arith.addf %21, %23 : vector<16x512xf32>
      %cst_20 = arith.constant 2.000000e-01 : f32
      %25 = vector.broadcast %cst_20 : f32 to vector<16x512xf32>
      %26 = arith.mulf %25, %24 : vector<16x512xf32>
      %27 = arith.maximumf %24, %26 : vector<16x512xf32>
      %28 = arith.truncf %27 : vector<16x512xf32> to vector<16x512xbf16>
      %c0_21 = arith.constant 0 : index
      %c0_22 = arith.constant 0 : index
      %29 = vector.load %arg7[%c0_21, %c0_22] : memref<512x256xbf16, #tpu.memory_space<vmem>>, vector<512x256xbf16>
      %cst_23 = arith.constant dense<0.000000e+00> : vector<16x256xf32>
      %30 = tpu.matmul %28, %29, %cst_23 {dimension_numbers = #tpu.dot_dimension_numbers<[1], [0], [0], [1], [0, 0, 1, 1], [], []>} : vector<16x512xbf16>, vector<512x256xbf16>, vector<16x256xf32> -> vector<16x256xf32>
      %c0_24 = arith.constant 0 : index
      %c0_25 = arith.constant 0 : index
      %31 = vector.load %arg8[%c0_24, %c0_25] : memref<1x256xf32, #tpu.memory_space<vmem>>, vector<1x256xf32>
      %32 = vector.broadcast %31 : vector<1x256xf32> to vector<16x256xf32>
      %33 = arith.addf %30, %32 : vector<16x256xf32>
      %cst_26 = arith.constant 2.000000e-01 : f32
      %34 = vector.broadcast %cst_26 : f32 to vector<16x256xf32>
      %35 = arith.mulf %34, %33 : vector<16x256xf32>
      %36 = arith.maximumf %33, %35 : vector<16x256xf32>
      %37 = arith.truncf %36 : vector<16x256xf32> to vector<16x256xbf16>
      %c0_27 = arith.constant 0 : index
      %c0_28 = arith.constant 0 : index
      %38 = vector.load %arg9[%c0_27, %c0_28] : memref<256x128xbf16, #tpu.memory_space<vmem>>, vector<256x128xbf16>
      %cst_29 = arith.constant dense<0.000000e+00> : vector<16x128xf32>
      %39 = tpu.matmul %37, %38, %cst_29 {dimension_numbers = #tpu.dot_dimension_numbers<[1], [0], [0], [1], [0, 0, 1, 1], [], []>} : vector<16x256xbf16>, vector<256x128xbf16>, vector<16x128xf32> -> vector<16x128xf32>
      %c0_30 = arith.constant 0 : index
      %c0_31 = arith.constant 0 : index
      %40 = vector.load %arg10[%c0_30, %c0_31] : memref<1x128xf32, #tpu.memory_space<vmem>>, vector<1x128xf32>
      %41 = vector.broadcast %40 : vector<1x128xf32> to vector<16x128xf32>
      %42 = arith.addf %39, %41 : vector<16x128xf32>
      %43 = vector.extract_strided_slice %42 {offsets = [0, 0], sizes = [16, 1], strides = [1, 1]} : vector<16x128xf32> to vector<16x1xf32>
      %cst_32 = arith.constant 0.000000e+00 : f32
      %44 = vector.broadcast %cst_32 : f32 to vector<16x1xf32>
      %45 = arith.subf %44, %43 : vector<16x1xf32>
      %46 = math.exp %45 : vector<16x1xf32>
      %cst_33 = arith.constant 1.000000e+00 : f32
      %47 = vector.broadcast %cst_33 : f32 to vector<16x1xf32>
      %48 = arith.addf %47, %46 : vector<16x1xf32>
      %49 = tpu.reciprocal %48 {approx = true} : vector<16x1xf32> -> vector<16x1xf32>
      %c0_34 = arith.constant 0 : index
      %c0_35 = arith.constant 0 : index
      %50 = vector.load %arg11[%c0_34, %c0_35] : memref<16x1xf32, #tpu.memory_space<vmem>>, vector<16x1xf32>
      tpu.vector_store %arg11[%c0_34, %c0_35], %49 {strides = array<i32>} : memref<16x1xf32, #tpu.memory_space<vmem>>, vector<16x1xf32>,
    } else {
    }
    return
  }
  func.func @transform_0(%arg0: i32, %arg1: i32) -> (i32, i32) {
    %c0_i32 = arith.constant 0 : i32
    return %arg0, %arg1 : i32, i32
  }
  func.func @transform_1(%arg0: i32, %arg1: i32) -> (i32, i32) {
    %c0_i32 = arith.constant 0 : i32
    %c0_i32_0 = arith.constant 0 : i32
    return %arg1, %c0_i32 : i32, i32
  }
  func.func @transform_2(%arg0: i32, %arg1: i32) -> (i32, i32) {
    %c0_i32 = arith.constant 0 : i32
    %c0_i32_0 = arith.constant 0 : i32
    %c0_i32_1 = arith.constant 0 : i32
    return %c0_i32, %c0_i32_0 : i32, i32
  }
  func.func @transform_3(%arg0: i32, %arg1: i32) -> (i32, i32) {
    %c0_i32 = arith.constant 0 : i32
    %c0_i32_0 = arith.constant 0 : i32
    %c0_i32_1 = arith.constant 0 : i32
    return %c0_i32, %c0_i32_0 : i32, i32
  }
  func.func @transform_4(%arg0: i32, %arg1: i32) -> (i32, i32) {
    %c0_i32 = arith.constant 0 : i32
    %c0_i32_0 = arith.constant 0 : i32
    %c0_i32_1 = arith.constant 0 : i32
    return %c0_i32, %c0_i32_0 : i32, i32
  }
  func.func @transform_5(%arg0: i32, %arg1: i32) -> (i32, i32) {
    %c0_i32 = arith.constant 0 : i32
    %c0_i32_0 = arith.constant 0 : i32
    %c0_i32_1 = arith.constant 0 : i32
    return %c0_i32, %c0_i32_0 : i32, i32
  }
  func.func @transform_6(%arg0: i32, %arg1: i32) -> (i32, i32) {
    %c0_i32 = arith.constant 0 : i32
    %c0_i32_0 = arith.constant 0 : i32
    %c0_i32_1 = arith.constant 0 : i32
    return %c0_i32, %c0_i32_0 : i32, i32
  }
  func.func @transform_7(%arg0: i32, %arg1: i32) -> (i32, i32) {
    %c0_i32 = arith.constant 0 : i32
    %c0_i32_0 = arith.constant 0 : i32
    %c0_i32_1 = arith.constant 0 : i32
    return %c0_i32, %c0_i32_0 : i32, i32
  }
  func.func @transform_8(%arg0: i32, %arg1: i32) -> (i32, i32) {
    %c0_i32 = arith.constant 0 : i32
    %c0_i32_0 = arith.constant 0 : i32
    %c0_i32_1 = arith.constant 0 : i32
    return %c0_i32, %c0_i32_0 : i32, i32
  }
  func.func @transform_9(%arg0: i32, %arg1: i32) -> (i32, i32) {
    %c0_i32 = arith.constant 0 : i32
    %c0_i32_0 = arith.constant 0 : i32
    return %arg0, %c0_i32 : i32, i32
  }
}

</mosaic_0001>

<bundles_post_ra>
// kernel: _discriminator_forward.1
= control target key start
LH: loop header
LB: loop body
LE: loop exit
PB: predicated region body
PF: predicated region fallthrough
CT: control target
= control target key end

     0   :  { %14 = vsyncpa [#allocation4], 0  ;;  %s7536_s0 = inlined_call_operand.vmem [shape: bf16[16,768], index: 0, kind: input, shape index: {}]   ;;  %s7537_s1 = inlined_call_operand.hbm [shape: bf16[768,1024], index: 1, kind: input, shape index: {}]   ;;  %s7538_s2 = inlined_call_operand.hbm [shape: f32[1,1024], index: 2, kind: input, shape index: {}]   ;;  %s7539_s3 = inlined_call_operand.hbm [shape: bf16[1024,512], index: 3, kind: input, shape index: {}]   ;;  %s7540_s4 = inlined_call_operand.hbm [shape: f32[1,512], index: 4, kind: input, shape index: {}]   ;;  %s7541_s5 = inlined_call_operand.hbm [shape: bf16[512,256], index: 5, kind: input, shape index: {}]   ;;  %s7542_s6 = inlined_call_operand.hbm [shape: f32[1,256], index: 6, kind: input, shape index: {}]   ;;  %s7543_s7 = inlined_call_operand.hbm [shape: bf16[256,128], index: 7, kind: input, shape index: {}]   ;;  %s7544_s8 = inlined_call_operand.hbm [shape: f32[1,128], index: 8, kind: input, shape index: {}]   ;;  %s7545_s9 = inlined_call_operand.vmem [shape: f32[16,1], index: 9, kind: output, shape index: {}]  }
   0x1   :  { %15 = vsyncpa [#allocation6], 0 }
   0x2   :  { %16 = vsyncpa [#allocation9], 0 }
   0x3   :  { %17 = vsyncpa [#allocation12], 0 }
   0x4   :  { %18 = vsyncpa [#allocation15], 0  ;;  %s7243_s30 = smov [#allocation5]   ;;  %s7244_s11 = smov [#allocation8]  }
   0x5   :  { %s39_s10 = sshll.u32 %s7243_s30, 4  ;;  %s61_s12 = sshll.u32 %s7244_s11, 4  ;;  %s40_s10 = int_to_ptr.vmem [resolvable:$true] %s39_s10  ;;  %s62_s12 = int_to_ptr.vmem [resolvable:$true] %s61_s12 }
   0x6   :  { %s7081_s13 = scalar_lea.vmem %s40_s10, 128  ;;  %p7086_p1 = scmp.lt.s32.totalorder %s40_s10, %s40_s10 }
   0x7   :  { %p7082_p0 = scmp.ne.s32.totalorder %s40_s10, %s7081_s13  ;;  %p7087_p2 = scmp.lt.s32.totalorder %s7081_s13, %s7081_s13 }
   0x9   :  { %p7088_p3 = por %p7087_p2, %p7086_p1 }
   0xb   :  { %p7089_p4 = pnand %p7088_p3, %p7082_p0 }
   0xd   :  { %7092 = shalt.err (!%p7089_p4)
}
   0xe   :  { %42 = dma.hbm_to_vmem [thread:$0]  %s7538_s2, 128, %s40_s10, [#allocation6]  }
   0xf   :  { %s7101_s16 = scalar_lea.vmem %s62_s12, 64  ;;  %p7106_p6 = scmp.lt.s32.totalorder %s62_s12, %s62_s12 }
  0x10   :  { %p7102_p5 = scmp.ne.s32.totalorder %s62_s12, %s7101_s16  ;;  %p7107_p7 = scmp.lt.s32.totalorder %s7101_s16, %s7101_s16 }
  0x12   :  { %p7108_p8 = por %p7107_p7, %p7106_p6 }
  0x14   :  { %p7109_p9 = pnand %p7108_p8, %p7102_p5 }
  0x16   :  { %7112 = shalt.err (!%p7109_p9)
}
  0x17   :  { %64 = dma.hbm_to_vmem [thread:$0]  %s7540_s4, 64, %s62_s12, [#allocation9]  }
  0x18   :  { %s7245_s19 = smov [#allocation11]   ;;  %s7246_s21 = smov [#allocation3]  }
  0x19   :  { %s83_s20 = sshll.u32 %s7245_s19, 4  ;;  %s26_s22 = sshll.u32 %s7246_s21, 4  ;;  %s84_s20 = int_to_ptr.vmem [resolvable:$true] %s83_s20  ;;  %s27_s22 = int_to_ptr.vmem [resolvable:$true] %s26_s22 }
  0x1a   :  { %s7121_s23 = scalar_lea.vmem %s84_s20, 32  ;;  %p7126_p11 = scmp.lt.s32.totalorder %s84_s20, %s84_s20 }
  0x1b   :  { %p7122_p10 = scmp.ne.s32.totalorder %s84_s20, %s7121_s23  ;;  %p7127_p12 = scmp.lt.s32.totalorder %s7121_s23, %s7121_s23 }
  0x1d   :  { %p7128_p13 = por %p7127_p12, %p7126_p11 }
  0x1f   :  { %p7129_p0 = pnand %p7128_p13, %p7122_p10 }
  0x21   :  { %7132 = shalt.err (!%p7129_p0)
}
  0x22   :  { %86 = dma.hbm_to_vmem [thread:$0]  %s7542_s6, 32, %s84_s20, [#allocation12]  }
  0x23   :  { %s7141_s25 = scalar_lea.vmem %s27_s22, 49152  ;;  %p7146_p2 = scmp.lt.s32.totalorder %s27_s22, %s27_s22 }
  0x24   :  { %p7142_p1 = scmp.ne.s32.totalorder %s27_s22, %s7141_s25  ;;  %p7147_p3 = scmp.lt.s32.totalorder %s7141_s25, %s7141_s25 }
  0x26   :  { %p7148_p4 = por %p7147_p3, %p7146_p2 }
  0x28   :  { %p7149_p5 = pnand %p7148_p4, %p7142_p1 }
  0x2a   :  { %7152 = shalt.err (!%p7149_p5)
}
  0x2b   :  { %s7247_s4 = smov 512   ;;  %s7248_s26 = smov 32  }
  0x2c   :  { %32 = dma.hbm_to_vmem [thread:$0]  %s7537_s1, 49152, %s27_s22, [#allocation4], %s7247_s4, %s7247_s4, %s7248_s26  }
  0x2d   :  { %s7249_s29 = smov [#allocation7]  }
  0x2e   :  { %s48_s30 = sshll.u32 %s7249_s29, 4  ;;  %s49_s30 = int_to_ptr.vmem [resolvable:$true] %s48_s30 }
  0x2f   :  { %s7161_s10 = scalar_lea.vmem %s49_s30, 32768  ;;  %p7166_p7 = scmp.lt.s32.totalorder %s49_s30, %s49_s30 }
  0x30   :  { %p7162_p6 = scmp.ne.s32.totalorder %s49_s30, %s7161_s10  ;;  %p7167_p8 = scmp.lt.s32.totalorder %s7161_s10, %s7161_s10 }
  0x32   :  { %p7168_p9 = por %p7167_p8, %p7166_p7 }
  0x34   :  { %p7169_p10 = pnand %p7168_p9, %p7162_p6 }
  0x36   :  { %7172 = shalt.err (!%p7169_p10)
}
  0x37   :  { %s7250_s6 = smov 256   ;;  %s7251_s11 = smov 16  }
  0x38   :  { %54 = dma.hbm_to_vmem [thread:$0]  %s7539_s3, 32768, %s49_s30, [#allocation6], %s7250_s6, %s7250_s6, %s7251_s11  }
  0x39   :  { %s7252_s14 = smov [#allocation10]  }
  0x3a   :  { %s70_s15 = sshll.u32 %s7252_s14, 4  ;;  %s71_s15 = int_to_ptr.vmem [resolvable:$true] %s70_s15 }
  0x3b   :  { %s7181_s1 = scalar_lea.vmem %s71_s15, 8192  ;;  %p7186_p12 = scmp.lt.s32.totalorder %s71_s15, %s71_s15 }
  0x3c   :  { %p7182_p11 = scmp.ne.s32.totalorder %s71_s15, %s7181_s1  ;;  %p7187_p13 = scmp.lt.s32.totalorder %s7181_s1, %s7181_s1 }
  0x3e   :  { %p7188_p0 = por %p7187_p13, %p7186_p12 }
  0x40   :  { %p7189_p1 = pnand %p7188_p0, %p7182_p11 }
  0x42   :  { %7192 = shalt.err (!%p7189_p1)
}
  0x43   :  { %s7253_s16 = smov 128   ;;  %s7254_s17 = smov 8  }
  0x44   :  { %76 = dma.hbm_to_vmem [thread:$0]  %s7541_s5, 8192, %s71_s15, [#allocation9], %s7253_s16, %s7253_s16, %s7254_s17  }
  0x45   :  { %s7255_s20 = smov [#allocation13]  }
  0x46   :  { %s92_s21 = sshll.u32 %s7255_s20, 4  ;;  %s93_s21 = int_to_ptr.vmem [resolvable:$true] %s92_s21 }
  0x47   :  { %s7201_s3 = scalar_lea.vmem %s93_s21, 2048  ;;  %p7206_p3 = scmp.lt.s32.totalorder %s93_s21, %s93_s21 }
  0x48   :  { %p7202_p2 = scmp.ne.s32.totalorder %s93_s21, %s7201_s3  ;;  %p7207_p4 = scmp.lt.s32.totalorder %s7201_s3, %s7201_s3 }
  0x4a   :  { %p7208_p5 = por %p7207_p4, %p7206_p3 }
  0x4c   :  { %p7209_p6 = pnand %p7208_p5, %p7202_p2 }
  0x4e   :  { %7212 = shalt.err (!%p7209_p6)
}
  0x4f   :  { %s7256_s22 = smov 64   ;;  %s7257_s23 = smov 4  }
  0x50   :  { %98 = dma.hbm_to_vmem [thread:$0]  %s7543_s7, 2048, %s93_s21, [#allocation12], %s7256_s22, %s7256_s22, %s7257_s23  }
  0x51   :  { %s7258_s25 = smov [#allocation14]  }
  0x52   :  { %s105_s4 = sshll.u32 %s7258_s25, 4  ;;  %s106_s4 = int_to_ptr.vmem [resolvable:$true] %s105_s4 }
  0x53   :  { %s7221_s5 = scalar_lea.vmem %s106_s4, 16  ;;  %s7225_s26 = scalar_lea.vmem %s106_s4, 32 }
  0x54   :  { %p7222_p7 = scmp.ne.s32.totalorder %s106_s4, %s7221_s5  ;;  %p7226_p8 = scmp.lt.s32.totalorder %s106_s4, %s106_s4 }
  0x55   :  { %p7227_p9 = scmp.lt.s32.totalorder %s7225_s26, %s7221_s5 }
  0x57   :  { %p7228_p10 = por %p7227_p9, %p7226_p8 }
  0x59   :  { %p7229_p11 = pnand %p7228_p10, %p7222_p7 }
  0x5b   :  { %7232 = shalt.err (!%p7229_p11)
}
  0x5c   :  { %108 = dma.hbm_to_vmem [thread:$0]  %s7544_s8, 16, %s106_s4, [#allocation15]  }
  0x5d   :  { %7233 = dma.done.wait [#allocation4], 49152  }
  0x5e   :  { %7234 = vsyncadd [#allocation4], 4294918144 }
  0x5f   :  { %7235 = dma.done.wait [#allocation6], 32896  }
  0x60   :  { %7236 = vsyncadd [#allocation6], 4294934400 }
  0x61   :  { %7237 = dma.done.wait [#allocation9], 8256  }
  0x62   :  { %7238 = vsyncadd [#allocation9], 4294959040 }
  0x63   :  { %7239 = dma.done.wait [#allocation12], 2080  }
  0x64   :  { %7240 = vsyncadd [#allocation12], 4294965216 }
  0x65   :  { %7241 = dma.done.wait [#allocation15], 16  }
  0x66   :  { %7242 = vsyncadd [#allocation15], 4294967280  ;;  %v232_v0 = vld [vmem:[#allocation3 + $0x1c0] sm:$0xff]  ;;  %vm5775_vm0 = vcmask 7168  }
  0x67   :  { %v236_v1 = vld [vmem:[#allocation3 + $0x1e0] sm:$0xff] }
  0x68   :  { %v360_v2 = vld [vmem:[#allocation3 + $0x5c0] sm:$0xff]  ;;  %v5850_v3 = vcombine.high %v232_v0, %v236_v1  ;;  %v5849_v5 = vcombine.low %v232_v0, %v236_v1 }
  0x69   :  { %v364_v4 = vld [vmem:[#allocation3 + $0x5e0] sm:$0xff] }
  0x6a   :  { %v224_v6 = vld [vmem:[#allocation3 + $0x180] sm:$0xff]  ;;  %v5978_v8 = vcombine.high %v360_v2, %v364_v4  ;;  %v5977_v9 = vcombine.low %v360_v2, %v364_v4  ;;  %2510 = vmatprep.subr.bf16.mxu0 %v5850_v3 }
  0x6b   :  { %v228_v7 = vld [vmem:[#allocation3 + $0x1a0] sm:$0xff]  ;;  %2511 = vmatpush1.bf16.msra.mxu0 %v5849_v5 }
  0x6c   :  { %v5842_v10 = vcombine.high %v224_v6, %v228_v7  ;;  %v352_v11 = vld [vmem:[#allocation3 + $0x580] sm:$0xff]  ;;  %2553 = vmatprep.subr.bf16.mxu1 %v5978_v8  ;;  %v5841_v18 = vcombine.low %v224_v6, %v228_v7 }
  0x6d   :  { %v356_v12 = vld [vmem:[#allocation3 + $0x5a0] sm:$0xff]  ;;  %2554 = vmatpush1.bf16.msra.mxu1 %v5977_v9 }
  0x6e   :  { %v216_v13 = vld [vmem:[#allocation3 + $0x140] sm:$0xff]  ;;  %v5970_v14 = vcombine.high %v352_v11, %v356_v12  ;;  %2512 = vmatprep.subr.bf16.mxu0 %v5842_v10  ;;  %v5969_v19 = vcombine.low %v352_v11, %v356_v12 }
  0x6f   :  { %v220_v15 = vld [vmem:[#allocation3 + $0x160] sm:$0xff]  ;;  %2513 = vmatpush1.bf16.msra.mxu0 %v5841_v18 }
  0x70   :  { %v344_v16 = vld [vmem:[#allocation3 + $0x540] sm:$0xff]  ;;  %v5834_v20 = vcombine.high %v216_v13, %v220_v15  ;;  %2555 = vmatprep.subr.bf16.mxu1 %v5970_v14  ;;  %v5833_v26 = vcombine.low %v216_v13, %v220_v15 }
  0x71   :  { %v348_v17 = vld [vmem:[#allocation3 + $0x560] sm:$0xff]  ;;  %2556 = vmatpush1.bf16.msra.mxu1 %v5969_v19 }
  0x72   :  { %v5962_v21 = vcombine.high %v344_v16, %v348_v17  ;;  %v208_v22 = vld [vmem:[#allocation3 + $0x100] sm:$0xff]  ;;  %2514 = vmatprep.subr.bf16.mxu0 %v5834_v20  ;;  %v5961_v27 = vcombine.low %v344_v16, %v348_v17 }
  0x73   :  { %v212_v23 = vld [vmem:[#allocation3 + $0x120] sm:$0xff]  ;;  %2515 = vmatpush1.bf16.msra.mxu0 %v5833_v26 }
  0x74   :  { %v336_v24 = vld [vmem:[#allocation3 + $0x500] sm:$0xff]  ;;  %v5826_v28 = vcombine.high %v208_v22, %v212_v23  ;;  %2557 = vmatprep.subr.bf16.mxu1 %v5962_v21  ;;  %v5825_v34 = vcombine.low %v208_v22, %v212_v23 }
  0x75   :  { %v340_v25 = vld [vmem:[#allocation3 + $0x520] sm:$0xff]  ;;  %2558 = vmatpush1.bf16.msra.mxu1 %v5961_v27 }
  0x76   :  { %v5954_v29 = vcombine.high %v336_v24, %v340_v25  ;;  %v200_v30 = vld [vmem:[#allocation3 + $0xc0] sm:$0xff]  ;;  %2516 = vmatprep.subr.bf16.mxu0 %v5826_v28  ;;  %v5953_v35 = vcombine.low %v336_v24, %v340_v25 }
  0x77   :  { %v204_v31 = vld [vmem:[#allocation3 + $0xe0] sm:$0xff]  ;;  %2517 = vmatpush1.bf16.msra.mxu0 %v5825_v34 }
  0x78   :  { %v328_v32 = vld [vmem:[#allocation3 + $0x4c0] sm:$0xff]  ;;  %v5818_v36 = vcombine.high %v200_v30, %v204_v31  ;;  %2559 = vmatprep.subr.bf16.mxu1 %v5954_v29  ;;  %v5817_v42 = vcombine.low %v200_v30, %v204_v31 }
  0x79   :  { %v332_v33 = vld [vmem:[#allocation3 + $0x4e0] sm:$0xff]  ;;  %2560 = vmatpush1.bf16.msra.mxu1 %v5953_v35 }
  0x7a   :  { %v5946_v37 = vcombine.high %v328_v32, %v332_v33  ;;  %v192_v38 = vld [vmem:[#allocation3 + $0x80] sm:$0xff]  ;;  %2518 = vmatprep.subr.bf16.mxu0 %v5818_v36  ;;  %v5945_v43 = vcombine.low %v328_v32, %v332_v33 }
  0x7b   :  { %v196_v39 = vld [vmem:[#allocation3 + $0xa0] sm:$0xff]  ;;  %2519 = vmatpush1.bf16.msra.mxu0 %v5817_v42 }
  0x7c   :  { %v320_v40 = vld [vmem:[#allocation3 + $0x480] sm:$0xff]  ;;  %v5810_v44 = vcombine.high %v192_v38, %v196_v39  ;;  %2561 = vmatprep.subr.bf16.mxu1 %v5946_v37  ;;  %v5809_v50 = vcombine.low %v192_v38, %v196_v39 }
  0x7d   :  { %v324_v41 = vld [vmem:[#allocation3 + $0x4a0] sm:$0xff]  ;;  %2562 = vmatpush1.bf16.msra.mxu1 %v5945_v43 }
  0x7e   :  { %v5938_v45 = vcombine.high %v320_v40, %v324_v41  ;;  %v184_v46 = vld [vmem:[#allocation3 + $0x40] sm:$0xff]  ;;  %2520 = vmatprep.subr.bf16.mxu0 %v5810_v44  ;;  %v5937_v52 = vcombine.low %v320_v40, %v324_v41 }
  0x7f   :  { %v188_v47 = vld [vmem:[#allocation3 + $0x60] sm:$0xff]  ;;  %2521 = vmatpush1.bf16.msra.mxu0 %v5809_v50 }
  0x80   :  { %v312_v48 = vld [vmem:[#allocation3 + $0x440] sm:$0xff]  ;;  %v5802_v53 = vcombine.high %v184_v46, %v188_v47  ;;  %2563 = vmatprep.subr.bf16.mxu1 %v5938_v45  ;;  %v5801_v60 = vcombine.low %v184_v46, %v188_v47 }
  0x81   :  { %v316_v49 = vld [vmem:[#allocation3 + $0x460] sm:$0xff]  ;;  %2564 = vmatpush1.bf16.msra.mxu1 %v5937_v52 }
  0x82   :  { %v176_v51 = vld [vmem:[#allocation3] sm:$0xff]  ;;  %v5930_v55 = vcombine.high %v312_v48, %v316_v49  ;;  %2522 = vmatprep.subr.bf16.mxu0 %v5802_v53  ;;  %v5929_v61 = vcombine.low %v312_v48, %v316_v49 }
  0x83   :  { %v180_v54 = vld [vmem:[#allocation3 + $0x20] sm:$0xff]  ;;  %2523 = vmatpush1.bf16.msra.mxu0 %v5801_v60 }
  0x84   :  { %v7336_v56 = vld [vmem:[%s7536_s0 + $0x4] ss:$24 sps:$4 sm:$0xff]   ;;  %v5794_v62 = vcombine.high %v176_v51, %v180_v54  ;;  %2565 = vmatprep.subr.bf16.mxu1 %v5930_v55  ;;  %v5793_v4 = vcombine.low %v176_v51, %v180_v54 }
  0x85   :  { %v304_v57 = vld [vmem:[#allocation3 + $0x400] sm:$0xff]  ;;  %2542 = vmatprep.mubr.bf16.mxu0 %v7336_v56  ;;  %2566 = vmatpush1.bf16.msra.mxu1 %v5929_v61 }
  0x86   :  { %v308_v58 = vld [vmem:[#allocation3 + $0x420] sm:$0xff]  ;;  %2524 = vmatprep.subr.bf16.mxu0 %v5794_v62 }
  0x87   :  { %v7341_v59 = vld [vmem:[%s7536_s0 + $0xc] ss:$24 sps:$4 sm:$0xff]   ;;  %v5922_v63 = vcombine.high %v304_v57, %v308_v58  ;;  %v5921_v5 = vcombine.low %v304_v57, %v308_v58  ;;  %2525 = vmatpush1.bf16.msra.mxu0 %v5793_v4 }
  0x88   :  { %v296_v0 = vld [vmem:[#allocation3 + $0x3c0] sm:$0xff]  ;;  %2585 = vmatprep.mubr.bf16.mxu1 %v7341_v59  ;;  %v233_v4 = vld [vmem:[#allocation3 + $0x1c8] sm:$0xff] }
  0x89   :  { %v300_v1 = vld [vmem:[#allocation3 + $0x3e0] sm:$0xff]  ;;  %2567 = vmatprep.subr.bf16.mxu1 %v5922_v63 }
  0x8a   :  { %v424_v2 = vld [vmem:[#allocation3 + $0x7c0] sm:$0xff]  ;;  %v5914_v6 = vcombine.high %v296_v0, %v300_v1  ;;  %v5913_v12 = vcombine.low %v296_v0, %v300_v1  ;;  %2568 = vmatpush1.bf16.msra.mxu1 %v5921_v5  ;;  %v237_v5 = vld [vmem:[#allocation3 + $0x1e8] sm:$0xff] }
  0x8b   :  { %v428_v3 = vld [vmem:[#allocation3 + $0x7e0] sm:$0xff] }
  0x8c   :  { %v6042_v7 = vcombine.high %v424_v2, %v428_v3  ;;  %v288_v8 = vld [vmem:[#allocation3 + $0x380] sm:$0xff]  ;;  %2526 = vmatprep.subr.bf16.mxu0 %v5914_v6  ;;  %v6041_v13 = vcombine.low %v424_v2, %v428_v3 }
  0x8d   :  { %v292_v9 = vld [vmem:[#allocation3 + $0x3a0] sm:$0xff]  ;;  %2527 = vmatpush2.bf16.msra.mxu0 %v5913_v12 }
  0x8e   :  { %v416_v10 = vld [vmem:[#allocation3 + $0x780] sm:$0xff]  ;;  %v5906_v14 = vcombine.high %v288_v8, %v292_v9  ;;  %2569 = vmatprep.subr.bf16.mxu1 %v6042_v7  ;;  %v5905_v20 = vcombine.low %v288_v8, %v292_v9  ;;  %v5852_v9 = vcombine.high %v233_v4, %v237_v5 }
  0x8f   :  { %v420_v11 = vld [vmem:[#allocation3 + $0x7a0] sm:$0xff]  ;;  %2570 = vmatpush2.bf16.msra.mxu1 %v6041_v13  ;;  %v225_v13 = vld [vmem:[#allocation3 + $0x188] sm:$0xff] }
  0x90   :  { %v6034_v15 = vcombine.high %v416_v10, %v420_v11  ;;  %v280_v16 = vld [vmem:[#allocation3 + $0x340] sm:$0xff]  ;;  %2528 = vmatprep.subr.bf16.mxu0 %v5906_v14  ;;  %v6033_v21 = vcombine.low %v416_v10, %v420_v11  ;;  %v229_v14 = vld [vmem:[#allocation3 + $0x1a8] sm:$0xff] }
  0x91   :  { %v284_v17 = vld [vmem:[#allocation3 + $0x360] sm:$0xff]  ;;  %2529 = vmatpush2.bf16.msra.mxu0 %v5905_v20 }
  0x92   :  { %v408_v18 = vld [vmem:[#allocation3 + $0x740] sm:$0xff]  ;;  %v5898_v22 = vcombine.high %v280_v16, %v284_v17  ;;  %2571 = vmatprep.subr.bf16.mxu1 %v6034_v15  ;;  %v5897_v28 = vcombine.low %v280_v16, %v284_v17  ;;  %v5851_v17 = vcombine.low %v233_v4, %v237_v5 }
  0x93   :  { %v412_v19 = vld [vmem:[#allocation3 + $0x760] sm:$0xff]  ;;  %2572 = vmatpush2.bf16.msra.mxu1 %v6033_v21 }
  0x94   :  { %v6026_v23 = vcombine.high %v408_v18, %v412_v19  ;;  %v272_v24 = vld [vmem:[#allocation3 + $0x300] sm:$0xff]  ;;  %2530 = vmatprep.subr.bf16.mxu0 %v5898_v22  ;;  %v6025_v29 = vcombine.low %v408_v18, %v412_v19  ;;  %v5844_v19 = vcombine.high %v225_v13, %v229_v14  ;;  %v7356_v22 = vld [vmem:[%s7536_s0 + $0x14] ss:$24 sps:$4 sm:$0xff]  }
  0x95   :  { %v276_v25 = vld [vmem:[#allocation3 + $0x320] sm:$0xff]  ;;  %2531 = vmatpush2.bf16.msra.mxu0 %v5897_v28 }
  0x96   :  { %v400_v26 = vld [vmem:[#allocation3 + $0x700] sm:$0xff]  ;;  %v5890_v30 = vcombine.high %v272_v24, %v276_v25  ;;  %2573 = vmatprep.subr.bf16.mxu1 %v6026_v23  ;;  %v5889_v36 = vcombine.low %v272_v24, %v276_v25  ;;  %v217_v23 = vld [vmem:[#allocation3 + $0x148] sm:$0xff] }
  0x97   :  { %v404_v27 = vld [vmem:[#allocation3 + $0x720] sm:$0xff]  ;;  %2574 = vmatpush2.bf16.msra.mxu1 %v6025_v29  ;;  %v221_v24 = vld [vmem:[#allocation3 + $0x168] sm:$0xff] }
  0x98   :  { %v6018_v31 = vcombine.high %v400_v26, %v404_v27  ;;  %v264_v32 = vld [vmem:[#allocation3 + $0x2c0] sm:$0xff]  ;;  %2532 = vmatprep.subr.bf16.mxu0 %v5890_v30  ;;  %v6017_v37 = vcombine.low %v400_v26, %v404_v27  ;;  %v5843_v26 = vcombine.low %v225_v13, %v229_v14  ;;  %v5836_v30 = vcombine.high %v217_v23, %v221_v24 }
  0x99   :  { %v268_v33 = vld [vmem:[#allocation3 + $0x2e0] sm:$0xff]  ;;  %2533 = vmatpush2.bf16.msra.mxu0 %v5889_v36 }
  0x9a   :  { %v392_v34 = vld [vmem:[#allocation3 + $0x6c0] sm:$0xff]  ;;  %v5882_v38 = vcombine.high %v264_v32, %v268_v33  ;;  %2575 = vmatprep.subr.bf16.mxu1 %v6018_v31  ;;  %v5881_v44 = vcombine.low %v264_v32, %v268_v33  ;;  %v209_v31 = vld [vmem:[#allocation3 + $0x108] sm:$0xff] }
  0x9b   :  { %v396_v35 = vld [vmem:[#allocation3 + $0x6e0] sm:$0xff]  ;;  %2576 = vmatpush2.bf16.msra.mxu1 %v6017_v37  ;;  %v213_v32 = vld [vmem:[#allocation3 + $0x128] sm:$0xff] }
  0x9c   :  { %v6010_v39 = vcombine.high %v392_v34, %v396_v35  ;;  %v256_v40 = vld [vmem:[#allocation3 + $0x280] sm:$0xff]  ;;  %2534 = vmatprep.subr.bf16.mxu0 %v5882_v38  ;;  %v6009_v45 = vcombine.low %v392_v34, %v396_v35  ;;  %v5835_v34 = vcombine.low %v217_v23, %v221_v24  ;;  %v201_v38 = vld [vmem:[#allocation3 + $0xc8] sm:$0xff] }
  0x9d   :  { %v260_v41 = vld [vmem:[#allocation3 + $0x2a0] sm:$0xff]  ;;  %2535 = vmatpush2.bf16.msra.mxu0 %v5881_v44 }
  0x9e   :  { %v384_v42 = vld [vmem:[#allocation3 + $0x680] sm:$0xff]  ;;  %v5874_v46 = vcombine.high %v256_v40, %v260_v41  ;;  %2577 = vmatprep.subr.bf16.mxu1 %v6010_v39  ;;  %v5873_v52 = vcombine.low %v256_v40, %v260_v41  ;;  %v5828_v39 = vcombine.high %v209_v31, %v213_v32  ;;  %v205_v40 = vld [vmem:[#allocation3 + $0xe8] sm:$0xff] }
  0x9f   :  { %v388_v43 = vld [vmem:[#allocation3 + $0x6a0] sm:$0xff]  ;;  %2578 = vmatpush2.bf16.msra.mxu1 %v6009_v45  ;;  %v193_v45 = vld [vmem:[#allocation3 + $0x88] sm:$0xff] }
  0xa0   :  { %v6002_v47 = vcombine.high %v384_v42, %v388_v43  ;;  %v248_v48 = vld [vmem:[#allocation3 + $0x240] sm:$0xff]  ;;  %2536 = vmatprep.subr.bf16.mxu0 %v5874_v46  ;;  %v6001_v53 = vcombine.low %v384_v42, %v388_v43  ;;  %v5827_v42 = vcombine.low %v209_v31, %v213_v32  ;;  %v5820_v46 = vcombine.high %v201_v38, %v205_v40 }
  0xa1   :  { %v252_v49 = vld [vmem:[#allocation3 + $0x260] sm:$0xff]  ;;  %2537 = vmatpush2.bf16.msra.mxu0 %v5873_v52 }
  0xa2   :  { %v376_v50 = vld [vmem:[#allocation3 + $0x640] sm:$0xff]  ;;  %v5866_v54 = vcombine.high %v248_v48, %v252_v49  ;;  %2579 = vmatprep.subr.bf16.mxu1 %v6002_v47  ;;  %v5865_v62 = vcombine.low %v248_v48, %v252_v49  ;;  %v197_v47 = vld [vmem:[#allocation3 + $0xa8] sm:$0xff]  ;;  %v5819_v49 = vcombine.low %v201_v38, %v205_v40 }
  0xa3   :  { %v380_v51 = vld [vmem:[#allocation3 + $0x660] sm:$0xff]  ;;  %2580 = vmatpush2.bf16.msra.mxu1 %v6001_v53  ;;  %v185_v53 = vld [vmem:[#allocation3 + $0x48] sm:$0xff] }
  0xa4   :  { %v5994_v55 = vcombine.high %v376_v50, %v380_v51  ;;  %v240_v57 = vld [vmem:[#allocation3 + $0x200] sm:$0xff]  ;;  %2538 = vmatprep.subr.bf16.mxu0 %v5866_v54  ;;  %v5993_v63 = vcombine.low %v376_v50, %v380_v51  ;;  %v5812_v54 = vcombine.high %v193_v45, %v197_v47 }
  0xa5   :  { %v244_v58 = vld [vmem:[#allocation3 + $0x220] sm:$0xff]  ;;  %2539 = vmatpush2.bf16.msra.mxu0 %v5865_v62 }
  0xa6   :  { %v368_v60 = vld [vmem:[#allocation3 + $0x600] sm:$0xff]  ;;  %v5858_v0 = vcombine.high %v240_v57, %v244_v58  ;;  %2581 = vmatprep.subr.bf16.mxu1 %v5994_v55  ;;  %v5857_v6 = vcombine.low %v240_v57, %v244_v58  ;;  %v189_v55 = vld [vmem:[#allocation3 + $0x68] sm:$0xff]  ;;  %v5811_v58 = vcombine.low %v193_v45, %v197_v47 }
  0xa7   :  { %v372_v61 = vld [vmem:[#allocation3 + $0x620] sm:$0xff]  ;;  %2582 = vmatpush2.bf16.msra.mxu1 %v5993_v63  ;;  %v177_v63 = vld [vmem:[#allocation3 + $0x8] sm:$0xff] }
  0xa8   :  { %v5986_v1 = vcombine.high %v368_v60, %v372_v61  ;;  %v488_v2 = vld [vmem:[#allocation3 + $0x9c0] sm:$0xff]  ;;  %2540 = vmatprep.subr.bf16.mxu0 %v5858_v0  ;;  %v5985_v7 = vcombine.low %v368_v60, %v372_v61  ;;  %v5804_v0 = vcombine.high %v185_v53, %v189_v55 }
  0xa9   :  { %v492_v3 = vld [vmem:[#allocation3 + $0x9e0] sm:$0xff]  ;;  %2541 = vmatpush2.bf16.msra.mxu0 %v5857_v6 }
  0xaa   :  { %v6106_v8 = vcombine.high %v488_v2, %v492_v3  ;;  %2583 = vmatprep.subr.bf16.mxu1 %v5986_v1  ;;  %v480_v10 = vld [vmem:[#allocation3 + $0x980] sm:$0xff]  ;;  %v6105_v16 = vcombine.low %v488_v2, %v492_v3  ;;  %v181_v1 = vld [vmem:[#allocation3 + $0x28] sm:$0xff]  ;;  %v5803_v3 = vcombine.low %v185_v53, %v189_v55 }
  0xab   :  { %v484_v11 = vld [vmem:[#allocation3 + $0x9a0] sm:$0xff]  ;;  %2584 = vmatpush2.bf16.msra.mxu1 %v5985_v7  ;;  %v297_v7 = vld [vmem:[#allocation3 + $0x3c8] sm:$0xff] }
  0xac   :  { %v7348_v12 = vld [vmem:[%s7536_s0] ss:$24 sps:$4 sm:$0xff]   ;;  %2596 = vmatprep.subr.bf16.mxu0 %v6106_v8  ;;  %v6098_v18 = vcombine.high %v480_v10, %v484_v11  ;;  %2639 = vmatprep.subr.bf16.mxu1 %v5852_v9  ;;  %v6097_v25 = vcombine.low %v480_v10, %v484_v11  ;;  %v5796_v8 = vcombine.high %v177_v63, %v181_v1  ;;  %v301_v9 = vld [vmem:[#allocation3 + $0x3e8] sm:$0xff] }
  0xad   :  { %v6557_v15 = vld [vmem:[%s7536_s0 + $0x8] ss:$24 sps:$4 sm:$0xff]   ;;  %2543 = vmatmul.mubr.bf16.vlgmr.msra.gmra.mxu0 %v7348_v12  ;;  %v5795_v11 = vcombine.low %v177_v63, %v181_v1 }
  0xae   :  { %v472_v20 = vld [vmem:[#allocation3 + $0x940] sm:$0xff]  ;;  %2586 = vmatmul.mubr.bf16.vlgmr.msra.gmra.mxu1 %v6557_v15  ;;  %2597 = vmatpush1.bf16.msra.mxu0 %v6105_v16  ;;  %v289_v16 = vld [vmem:[#allocation3 + $0x388] sm:$0xff] }
  0xaf   :  { %v476_v21 = vld [vmem:[#allocation3 + $0x960] sm:$0xff]  ;;  %2640 = vmatpush1.bf16.msra.mxu1 %v5851_v17  ;;  %2598 = vmatprep.subr.bf16.mxu0 %v6098_v18  ;;  %v5916_v17 = vcombine.high %v297_v7, %v301_v9  ;;  %v293_v18 = vld [vmem:[#allocation3 + $0x3a8] sm:$0xff] }
  0xb0   :  { %v6090_v27 = vcombine.high %v472_v20, %v476_v21  ;;  %v464_v28 = vld [vmem:[#allocation3 + $0x900] sm:$0xff]  ;;  %2641 = vmatprep.subr.bf16.mxu1 %v5844_v19  ;;  %2628 = vmatprep.mubr.bf16.mxu0 %v7356_v22  ;;  %v6089_v33 = vcombine.low %v472_v20, %v476_v21  ;;  %v5915_v20 = vcombine.low %v297_v7, %v301_v9  ;;  %v365_v9 = vld [vmem:[#allocation3 + $0x5e8] sm:$0xff] }
  0xb1   :  { %v468_v29 = vld [vmem:[#allocation3 + $0x920] sm:$0xff]  ;;  %2671 = vmatprep.mubr.bf16.mxu1 %v7336_v56 }
  0xb2   :  { %2599 = vmatpush1.bf16.msra.mxu0 %v6097_v25  ;;  %v6082_v35 = vcombine.high %v464_v28, %v468_v29  ;;  %v456_v36 = vld [vmem:[#allocation3 + $0x8c0] sm:$0xff]  ;;  %v6081_v41 = vcombine.low %v464_v28, %v468_v29  ;;  %v281_v25 = vld [vmem:[#allocation3 + $0x348] sm:$0xff]  ;;  %v5907_v29 = vcombine.low %v289_v16, %v293_v18 }
  0xb3   :  { %2642 = vmatpush1.bf16.msra.mxu1 %v5843_v26  ;;  %2600 = vmatprep.subr.bf16.mxu0 %v6090_v27  ;;  %v460_v37 = vld [vmem:[#allocation3 + $0x8e0] sm:$0xff]  ;;  %v5908_v26 = vcombine.high %v289_v16, %v293_v18  ;;  %v285_v27 = vld [vmem:[#allocation3 + $0x368] sm:$0xff] }
  0xb4   :  { %2643 = vmatprep.subr.bf16.mxu1 %v5836_v30  ;;  %v6074_v43 = vcombine.high %v456_v36, %v460_v37  ;;  %v448_v44 = vld [vmem:[#allocation3 + $0x880] sm:$0xff]  ;;  %v6073_v48 = vcombine.low %v456_v36, %v460_v37  ;;  %v5899_v37 = vcombine.low %v281_v25, %v285_v27  ;;  %v7364_v16 = vld [vmem:[%s7536_s0 + $0x10] ss:$24 sps:$4 sm:$0xff]  }
  0xb5   :  { %v452_v56 = vld [vmem:[#allocation3 + $0x8a0] sm:$0xff]  ;;  %v353_v18 = vld [vmem:[#allocation3 + $0x588] sm:$0xff] }
  0xb6   :  { %2601 = vmatpush1.bf16.msra.mxu0 %v6089_v33  ;;  %v6066_v50 = vcombine.high %v448_v44, %v452_v56  ;;  %v440_v51 = vld [vmem:[#allocation3 + $0x840] sm:$0xff]  ;;  %v6065_v57 = vcombine.low %v448_v44, %v452_v56  ;;  %v273_v33 = vld [vmem:[#allocation3 + $0x308] sm:$0xff] }
  0xb7   :  { %2644 = vmatpush1.bf16.msra.mxu1 %v5835_v34  ;;  %2602 = vmatprep.subr.bf16.mxu0 %v6082_v35  ;;  %v444_v52 = vld [vmem:[#allocation3 + $0x860] sm:$0xff]  ;;  %v5900_v34 = vcombine.high %v281_v25, %v285_v27  ;;  %v277_v35 = vld [vmem:[#allocation3 + $0x328] sm:$0xff] }
  0xb8   :  { %2645 = vmatprep.subr.bf16.mxu1 %v5828_v39  ;;  %v6058_v60 = vcombine.high %v440_v51, %v444_v52  ;;  %v432_v61 = vld [vmem:[#allocation3 + $0x800] sm:$0xff]  ;;  %v6057_v2 = vcombine.low %v440_v51, %v444_v52  ;;  %v5891_v56 = vcombine.low %v273_v33, %v277_v35  ;;  %v345_v27 = vld [vmem:[#allocation3 + $0x548] sm:$0xff] }
  0xb9   :  { %v436_v62 = vld [vmem:[#allocation3 + $0x820] sm:$0xff] }
  0xba   :  { %2603 = vmatpush1.bf16.msra.mxu0 %v6081_v41  ;;  %v6050_v4 = vcombine.high %v432_v61, %v436_v62  ;;  %v552_v5 = vld [vmem:[#allocation3 + $0xbc0] sm:$0xff]  ;;  %v6049_v10 = vcombine.low %v432_v61, %v436_v62  ;;  %v265_v41 = vld [vmem:[#allocation3 + $0x2c8] sm:$0xff] }
  0xbb   :  { %2646 = vmatpush1.bf16.msra.mxu1 %v5827_v42  ;;  %2604 = vmatprep.subr.bf16.mxu0 %v6074_v43  ;;  %v556_v6 = vld [vmem:[#allocation3 + $0xbe0] sm:$0xff]  ;;  %v5892_v42 = vcombine.high %v273_v33, %v277_v35  ;;  %v269_v43 = vld [vmem:[#allocation3 + $0x2e8] sm:$0xff] }
  0xbc   :  { %2647 = vmatprep.subr.bf16.mxu1 %v5820_v46  ;;  %v6170_v13 = vcombine.high %v552_v5, %v556_v6  ;;  %v544_v14 = vld [vmem:[#allocation3 + $0xb80] sm:$0xff]  ;;  %v6169_v19 = vcombine.low %v552_v5, %v556_v6  ;;  %v5883_v52 = vcombine.low %v265_v41, %v269_v43  ;;  %v337_v35 = vld [vmem:[#allocation3 + $0x508] sm:$0xff] }
  0xbd   :  { %v548_v15 = vld [vmem:[#allocation3 + $0xba0] sm:$0xff] }
  0xbe   :  { %2605 = vmatpush1.bf16.msra.mxu0 %v6073_v48  ;;  %v6162_v21 = vcombine.high %v544_v14, %v548_v15  ;;  %v536_v23 = vld [vmem:[#allocation3 + $0xb40] sm:$0xff]  ;;  %v6161_v28 = vcombine.low %v544_v14, %v548_v15  ;;  %v257_v48 = vld [vmem:[#allocation3 + $0x288] sm:$0xff] }
  0xbf   :  { %2648 = vmatpush1.bf16.msra.mxu1 %v5819_v49  ;;  %2606 = vmatprep.subr.bf16.mxu0 %v6066_v50  ;;  %v540_v24 = vld [vmem:[#allocation3 + $0xb60] sm:$0xff]  ;;  %v5884_v49 = vcombine.high %v265_v41, %v269_v43  ;;  %v261_v50 = vld [vmem:[#allocation3 + $0x2a8] sm:$0xff] }
  0xc0   :  { %2649 = vmatprep.subr.bf16.mxu1 %v5812_v54  ;;  %v6154_v30 = vcombine.high %v536_v23, %v540_v24  ;;  %v528_v31 = vld [vmem:[#allocation3 + $0xb00] sm:$0xff]  ;;  %v6153_v36 = vcombine.low %v536_v23, %v540_v24  ;;  %v5875_v62 = vcombine.low %v257_v48, %v261_v50  ;;  %v485_v23 = vld [vmem:[#allocation3 + $0x9a8] sm:$0xff] }
  0xc1   :  { %v532_v32 = vld [vmem:[#allocation3 + $0xb20] sm:$0xff]  ;;  %v333_v43 = vld [vmem:[#allocation3 + $0x4e8] sm:$0xff] }
  0xc2   :  { %2607 = vmatpush1.bf16.msra.mxu0 %v6065_v57  ;;  %v6146_v38 = vcombine.high %v528_v31, %v532_v32  ;;  %v520_v39 = vld [vmem:[#allocation3 + $0xac0] sm:$0xff]  ;;  %v6145_v44 = vcombine.low %v528_v31, %v532_v32  ;;  %v249_v57 = vld [vmem:[#allocation3 + $0x248] sm:$0xff] }
  0xc3   :  { %2650 = vmatpush1.bf16.msra.mxu1 %v5811_v58  ;;  %2608 = vmatprep.subr.bf16.mxu0 %v6058_v60  ;;  %v524_v40 = vld [vmem:[#allocation3 + $0xae0] sm:$0xff]  ;;  %v5876_v58 = vcombine.high %v257_v48, %v261_v50  ;;  %v253_v60 = vld [vmem:[#allocation3 + $0x268] sm:$0xff] }
  0xc4   :  { %2651 = vmatprep.subr.bf16.mxu1 %v5804_v0  ;;  %v6138_v45 = vcombine.high %v520_v39, %v524_v40  ;;  %v512_v46 = vld [vmem:[#allocation3 + $0xa80] sm:$0xff]  ;;  %v6137_v51 = vcombine.low %v520_v39, %v524_v40  ;;  %v5867_v6 = vcombine.low %v249_v57, %v253_v60  ;;  %v477_v31 = vld [vmem:[#allocation3 + $0x968] sm:$0xff] }
  0xc5   :  { %v516_v47 = vld [vmem:[#allocation3 + $0xaa0] sm:$0xff]  ;;  %v469_v39 = vld [vmem:[#allocation3 + $0x928] sm:$0xff] }
  0xc6   :  { %2609 = vmatpush1.bf16.msra.mxu0 %v6057_v2  ;;  %v6130_v53 = vcombine.high %v512_v46, %v516_v47  ;;  %v504_v54 = vld [vmem:[#allocation3 + $0xa40] sm:$0xff]  ;;  %v6129_v61 = vcombine.low %v512_v46, %v516_v47  ;;  %v241_v2 = vld [vmem:[#allocation3 + $0x208] sm:$0xff] }
  0xc7   :  { %2652 = vmatpush1.bf16.msra.mxu1 %v5803_v3  ;;  %2610 = vmatprep.subr.bf16.mxu0 %v6050_v4  ;;  %v508_v55 = vld [vmem:[#allocation3 + $0xa60] sm:$0xff]  ;;  %v5868_v3 = vcombine.high %v249_v57, %v253_v60  ;;  %v245_v4 = vld [vmem:[#allocation3 + $0x228] sm:$0xff] }
  0xc8   :  { %2653 = vmatprep.subr.bf16.mxu1 %v5796_v8  ;;  %v6122_v63 = vcombine.high %v504_v54, %v508_v55  ;;  %v496_v0 = vld [vmem:[#allocation3 + $0xa00] sm:$0xff]  ;;  %v6121_v5 = vcombine.low %v504_v54, %v508_v55  ;;  %v361_v8 = vld [vmem:[#allocation3 + $0x5c8] sm:$0xff]  ;;  %v5859_v15 = vcombine.low %v241_v2, %v245_v4 }
  0xc9   :  { %v500_v1 = vld [vmem:[#allocation3 + $0xa20] sm:$0xff]  ;;  %v5979_v24 = vcombine.low %v361_v8, %v365_v9  ;;  %v321_v48 = vld [vmem:[#allocation3 + $0x488] sm:$0xff] }
  0xca   :  { %2611 = vmatpush1.bf16.msra.mxu0 %v6049_v10  ;;  %v6114_v7 = vcombine.high %v496_v0, %v500_v1  ;;  %v489_v10 = vld [vmem:[#allocation3 + $0x9c8] sm:$0xff]  ;;  %v6113_v14 = vcombine.low %v496_v0, %v500_v1 }
  0xcb   :  { %2654 = vmatpush1.bf16.msra.mxu1 %v5795_v11  ;;  %2612 = vmatprep.subr.bf16.mxu0 %v6170_v13  ;;  %v5860_v11 = vcombine.high %v241_v2, %v245_v4  ;;  %v493_v13 = vld [vmem:[#allocation3 + $0x9e8] sm:$0xff] }
  0xcc   :  { %2655 = vmatprep.subr.bf16.mxu1 %v5916_v17  ;;  %v5980_v17 = vcombine.high %v361_v8, %v365_v9  ;;  %v6107_v25 = vcombine.low %v489_v10, %v493_v13  ;;  %v313_v55 = vld [vmem:[#allocation3 + $0x448] sm:$0xff] }
  0xcd   :  { %v317_v57 = vld [vmem:[#allocation3 + $0x468] sm:$0xff] }
  0xce   :  { %2613 = vmatpush2.bf16.msra.mxu0 %v6169_v19  ;;  %v357_v19 = vld [vmem:[#allocation3 + $0x5a8] sm:$0xff]  ;;  %v5932_v0 = vcombine.high %v313_v55, %v317_v57 }
  0xcf   :  { %2656 = vmatpush2.bf16.msra.mxu1 %v5915_v20  ;;  %2614 = vmatprep.subr.bf16.mxu0 %v6162_v21  ;;  %v481_v20 = vld [vmem:[#allocation3 + $0x988] sm:$0xff]  ;;  %v6108_v21 = vcombine.high %v489_v10, %v493_v13  ;;  %v5971_v32 = vcombine.low %v353_v18, %v357_v19 }
  0xd0   :  { %2657 = vmatprep.subr.bf16.mxu1 %v5908_v26  ;;  %v5972_v26 = vcombine.high %v353_v18, %v357_v19  ;;  %v6099_v33 = vcombine.low %v481_v20, %v485_v23  ;;  %v305_v1 = vld [vmem:[#allocation3 + $0x408] sm:$0xff] }
  0xd1   :  { %v309_v2 = vld [vmem:[#allocation3 + $0x428] sm:$0xff] }
  0xd2   :  { %2615 = vmatpush2.bf16.msra.mxu0 %v6161_v28  ;;  %v349_v28 = vld [vmem:[#allocation3 + $0x568] sm:$0xff]  ;;  %v5924_v8 = vcombine.high %v305_v1, %v309_v2 }
  0xd3   :  { %2658 = vmatpush2.bf16.msra.mxu1 %v5907_v29  ;;  %2616 = vmatprep.subr.bf16.mxu0 %v6154_v30  ;;  %v473_v29 = vld [vmem:[#allocation3 + $0x948] sm:$0xff]  ;;  %v6100_v30 = vcombine.high %v481_v20, %v485_v23  ;;  %v5963_v40 = vcombine.low %v345_v27, %v349_v28 }
  0xd4   :  { %2659 = vmatprep.subr.bf16.mxu1 %v5900_v34  ;;  %v5964_v34 = vcombine.high %v345_v27, %v349_v28  ;;  %v425_v9 = vld [vmem:[#allocation3 + $0x7c8] sm:$0xff] }
  0xd5   :  { %v429_v10 = vld [vmem:[#allocation3 + $0x7e8] sm:$0xff] }
  0xd6   :  { %2617 = vmatpush2.bf16.msra.mxu0 %v6153_v36  ;;  %v341_v36 = vld [vmem:[#allocation3 + $0x528] sm:$0xff]  ;;  %v6044_v18 = vcombine.high %v425_v9, %v429_v10 }
  0xd7   :  { %2660 = vmatpush2.bf16.msra.mxu1 %v5899_v37  ;;  %2618 = vmatprep.subr.bf16.mxu0 %v6146_v38  ;;  %v465_v37 = vld [vmem:[#allocation3 + $0x908] sm:$0xff]  ;;  %v6092_v38 = vcombine.high %v473_v29, %v477_v31  ;;  %v5956_v41 = vcombine.high %v337_v35, %v341_v36  ;;  %v5955_v46 = vcombine.low %v337_v35, %v341_v36 }
  0xd8   :  { %2661 = vmatprep.subr.bf16.mxu1 %v5892_v42  ;;  %v329_v42 = vld [vmem:[#allocation3 + $0x4c8] sm:$0xff]  ;;  %v6083_v47 = vcombine.low %v465_v37, %v469_v39 }
  0xd9   :  { %v417_v19 = vld [vmem:[#allocation3 + $0x788] sm:$0xff] }
  0xda   :  { %2619 = vmatpush2.bf16.msra.mxu0 %v6145_v44  ;;  %v457_v44 = vld [vmem:[#allocation3 + $0x8c8] sm:$0xff] }
  0xdb   :  { %2662 = vmatpush2.bf16.msra.mxu1 %v5891_v56  ;;  %2620 = vmatprep.subr.bf16.mxu0 %v6138_v45  ;;  %v6084_v56 = vcombine.high %v465_v37, %v469_v39  ;;  %v461_v45 = vld [vmem:[#allocation3 + $0x8e8] sm:$0xff] }
  0xdc   :  { %2663 = vmatprep.subr.bf16.mxu1 %v5884_v49  ;;  %v449_v49 = vld [vmem:[#allocation3 + $0x888] sm:$0xff]  ;;  %v6076_v50 = vcombine.high %v457_v44, %v461_v45 }
  0xdd   :  { %v421_v20 = vld [vmem:[#allocation3 + $0x7a8] sm:$0xff] }
  0xde   :  { %2621 = vmatpush2.bf16.msra.mxu0 %v6137_v51  ;;  %v453_v51 = vld [vmem:[#allocation3 + $0x8a8] sm:$0xff]  ;;  %v6036_v27 = vcombine.high %v417_v19, %v421_v20 }
  0xdf   :  { %2664 = vmatpush2.bf16.msra.mxu1 %v5883_v52  ;;  %2622 = vmatprep.subr.bf16.mxu0 %v6130_v53  ;;  %v5947_v52 = vcombine.low %v329_v42, %v333_v43  ;;  %v6075_v53 = vcombine.low %v457_v44, %v461_v45  ;;  %v6068_v60 = vcombine.high %v449_v49, %v453_v51  ;;  %v409_v28 = vld [vmem:[#allocation3 + $0x748] sm:$0xff] }
  0xe0   :  { %2665 = vmatprep.subr.bf16.mxu1 %v5876_v58  ;;  %v441_v58 = vld [vmem:[#allocation3 + $0x848] sm:$0xff] }
  0xe1   :  { %v401_v36 = vld [vmem:[#allocation3 + $0x708] sm:$0xff] }
  0xe2   :  { %2623 = vmatpush2.bf16.msra.mxu0 %v6129_v61  ;;  %v445_v61 = vld [vmem:[#allocation3 + $0x868] sm:$0xff] }
  0xe3   :  { %2666 = vmatpush2.bf16.msra.mxu1 %v5875_v62  ;;  %2624 = vmatprep.subr.bf16.mxu0 %v6122_v63  ;;  %v6067_v63 = vcombine.low %v449_v49, %v453_v51  ;;  %v6060_v4 = vcombine.high %v441_v58, %v445_v61  ;;  %v405_v37 = vld [vmem:[#allocation3 + $0x728] sm:$0xff] }
  0xe4   :  { %2667 = vmatprep.subr.bf16.mxu1 %v5868_v3  ;;  %v433_v3 = vld [vmem:[#allocation3 + $0x808] sm:$0xff] }
  0xe5   :  { %v397_v44 = vld [vmem:[#allocation3 + $0x6e8] sm:$0xff] }
  0xe6   :  { %2625 = vmatpush2.bf16.msra.mxu0 %v6121_v5  ;;  %v437_v5 = vld [vmem:[#allocation3 + $0x828] sm:$0xff] }
  0xe7   :  { %2668 = vmatpush2.bf16.msra.mxu1 %v5867_v6  ;;  %2626 = vmatprep.subr.bf16.mxu0 %v6114_v7  ;;  %v5931_v6 = vcombine.low %v313_v55, %v317_v57  ;;  %v6059_v7 = vcombine.low %v441_v58, %v445_v61  ;;  %v6052_v13 = vcombine.high %v433_v3, %v437_v5  ;;  %v389_v49 = vld [vmem:[#allocation3 + $0x6a8] sm:$0xff] }
  0xe8   :  { %2669 = vmatprep.subr.bf16.mxu1 %v5860_v11  ;;  %v553_v11 = vld [vmem:[#allocation3 + $0xbc8] sm:$0xff] }
  0xe9   :  { %v377_v57 = vld [vmem:[#allocation3 + $0x648] sm:$0xff] }
  0xea   :  { %2627 = vmatpush2.bf16.msra.mxu0 %v6113_v14  ;;  %v557_v14 = vld [vmem:[#allocation3 + $0xbe8] sm:$0xff] }
  0xeb   :  { %2670 = vmatpush2.bf16.msra.mxu1 %v5859_v15  ;;  %2682 = vmatprep.subr.bf16.mxu0 %v5980_v17  ;;  %v5923_v15 = vcombine.low %v305_v1, %v309_v2  ;;  %v6051_v17 = vcombine.low %v433_v3, %v437_v5  ;;  %v6172_v23 = vcombine.high %v553_v11, %v557_v14  ;;  %v381_v58 = vld [vmem:[#allocation3 + $0x668] sm:$0xff] }
  0xec   :  { %2725 = vmatprep.subr.bf16.mxu1 %v6108_v21  ;;  %v545_v21 = vld [vmem:[#allocation3 + $0xb88] sm:$0xff]  ;;  %v5996_v1 = vcombine.high %v377_v57, %v381_v58 }
  0xed   :  { %2629 = vmatmul.mubr.bf16.vlgmr.msra.gmra.mxu0 %v7364_v16  ;;  %v369_v2 = vld [vmem:[#allocation3 + $0x608] sm:$0xff] }
  0xee   :  { %2672 = vmatmul.mubr.bf16.vlgmr.msra.gmra.mxu1 %v7348_v12  ;;  %2683 = vmatpush1.bf16.msra.mxu0 %v5979_v24  ;;  %v6091_v12 = vcombine.low %v473_v29, %v477_v31  ;;  %v549_v24 = vld [vmem:[#allocation3 + $0xba8] sm:$0xff] }
  0xef   :  { %2726 = vmatpush1.bf16.msra.mxu1 %v6107_v25  ;;  %2684 = vmatprep.subr.bf16.mxu0 %v5972_v26  ;;  %v6043_v25 = vcombine.low %v425_v9, %v429_v10  ;;  %v6171_v26 = vcombine.low %v553_v11, %v557_v14  ;;  %v413_v29 = vld [vmem:[#allocation3 + $0x768] sm:$0xff]  ;;  %v6164_v31 = vcombine.high %v545_v21, %v549_v24  ;;  %v234_v10 = vld [vmem:[#allocation3 + $0x1d0] sm:$0xff] }
  0xf0   :  { %2727 = vmatprep.subr.bf16.mxu1 %v6100_v30  ;;  %2714 = vmatprep.mubr.bf16.mxu0 %v7341_v59  ;;  %v5948_v59 = vcombine.high %v329_v42, %v333_v43  ;;  %v537_v30 = vld [vmem:[#allocation3 + $0xb48] sm:$0xff]  ;;  %v6028_v35 = vcombine.high %v409_v28, %v413_v29  ;;  %v6020_v42 = vcombine.high %v401_v36, %v405_v37  ;;  %v238_v11 = vld [vmem:[#allocation3 + $0x1f0] sm:$0xff] }
  0xf1   :  { %2757 = vmatprep.mubr.bf16.mxu1 %v7356_v22  ;;  %v325_v22 = vld [vmem:[#allocation3 + $0x4a8] sm:$0xff] }
  0xf2   :  { %2685 = vmatpush1.bf16.msra.mxu0 %v5971_v32  ;;  %v5940_v54 = vcombine.high %v321_v48, %v325_v22  ;;  %v5939_v62 = vcombine.low %v321_v48, %v325_v22  ;;  %v541_v32 = vld [vmem:[#allocation3 + $0xb68] sm:$0xff] }
  0xf3   :  { %2728 = vmatpush1.bf16.msra.mxu1 %v6099_v33  ;;  %2686 = vmatprep.subr.bf16.mxu0 %v5964_v34  ;;  %v6035_v33 = vcombine.low %v417_v19, %v421_v20  ;;  %v6163_v34 = vcombine.low %v545_v21, %v549_v24  ;;  %v6156_v39 = vcombine.high %v537_v30, %v541_v32  ;;  %v393_v43 = vld [vmem:[#allocation3 + $0x6c8] sm:$0xff]  ;;  %v226_v20 = vld [vmem:[#allocation3 + $0x190] sm:$0xff] }
  0xf4   :  { %2729 = vmatprep.subr.bf16.mxu1 %v6092_v38  ;;  %v529_v38 = vld [vmem:[#allocation3 + $0xb08] sm:$0xff]  ;;  %v6012_v48 = vcombine.high %v393_v43, %v397_v44  ;;  %v5854_v19 = vcombine.high %v234_v10, %v238_v11  ;;  %v230_v21 = vld [vmem:[#allocation3 + $0x1b0] sm:$0xff] }
  0xf5   :  { %v385_v22 = vld [vmem:[#allocation3 + $0x688] sm:$0xff] }
  0xf6   :  { %2687 = vmatpush1.bf16.msra.mxu0 %v5963_v40  ;;  %v533_v40 = vld [vmem:[#allocation3 + $0xb28] sm:$0xff]  ;;  %v6004_v55 = vcombine.high %v385_v22, %v389_v49 }
  0xf7   :  { %2730 = vmatpush1.bf16.msra.mxu1 %v6091_v12  ;;  %2688 = vmatprep.subr.bf16.mxu0 %v5956_v41  ;;  %v6027_v12 = vcombine.low %v409_v28, %v413_v29  ;;  %v6155_v41 = vcombine.low %v537_v30, %v541_v32  ;;  %v6148_v45 = vcombine.high %v529_v38, %v533_v40  ;;  %v373_v3 = vld [vmem:[#allocation3 + $0x628] sm:$0xff]  ;;  %v218_v29 = vld [vmem:[#allocation3 + $0x150] sm:$0xff] }
  0xf8   :  { %2731 = vmatprep.subr.bf16.mxu1 %v6084_v56  ;;  %v521_v56 = vld [vmem:[#allocation3 + $0xac8] sm:$0xff]  ;;  %v5988_v9 = vcombine.high %v369_v2, %v373_v3  ;;  %v5846_v28 = vcombine.high %v226_v20, %v230_v21  ;;  %v222_v30 = vld [vmem:[#allocation3 + $0x170] sm:$0xff] }
  0xfa   :  { %2689 = vmatpush1.bf16.msra.mxu0 %v5955_v46  ;;  %v525_v46 = vld [vmem:[#allocation3 + $0xae8] sm:$0xff] }
  0xfb   :  { %2732 = vmatpush1.bf16.msra.mxu1 %v6083_v47  ;;  %2690 = vmatprep.subr.bf16.mxu0 %v5948_v59  ;;  %v6019_v47 = vcombine.low %v401_v36, %v405_v37  ;;  %v6147_v59 = vcombine.low %v529_v38, %v533_v40  ;;  %v6140_v51 = vcombine.high %v521_v56, %v525_v46  ;;  %v210_v38 = vld [vmem:[#allocation3 + $0x110] sm:$0xff] }
  0xfc   :  { %2733 = vmatprep.subr.bf16.mxu1 %v6076_v50  ;;  %v513_v50 = vld [vmem:[#allocation3 + $0xa88] sm:$0xff]  ;;  %v5838_v37 = vcombine.high %v218_v29, %v222_v30  ;;  %v338_v40 = vld [vmem:[#allocation3 + $0x510] sm:$0xff] }
  0xfe   :  { %2691 = vmatpush1.bf16.msra.mxu0 %v5947_v52  ;;  %v517_v52 = vld [vmem:[#allocation3 + $0xaa8] sm:$0xff] }
  0xff   :  { %2734 = vmatpush1.bf16.msra.mxu1 %v6075_v53  ;;  %2692 = vmatprep.subr.bf16.mxu0 %v5940_v54  ;;  %v6011_v53 = vcombine.low %v393_v43, %v397_v44  ;;  %v6139_v54 = vcombine.low %v521_v56, %v525_v46  ;;  %v6132_v61 = vcombine.high %v513_v50, %v517_v52  ;;  %v206_v46 = vld [vmem:[#allocation3 + $0xf0] sm:$0xff] }
 0x100   :  { %2735 = vmatprep.subr.bf16.mxu1 %v6068_v60  ;;  %v505_v60 = vld [vmem:[#allocation3 + $0xa48] sm:$0xff]  ;;  %v5837_v43 = vcombine.low %v218_v29, %v222_v30 }
 0x102   :  { %2693 = vmatpush1.bf16.msra.mxu0 %v5939_v62  ;;  %v509_v62 = vld [vmem:[#allocation3 + $0xa68] sm:$0xff] }
 0x103   :  { %2736 = vmatpush1.bf16.msra.mxu1 %v6067_v63  ;;  %2694 = vmatprep.subr.bf16.mxu0 %v5932_v0  ;;  %v6003_v63 = vcombine.low %v385_v22, %v389_v49  ;;  %v6131_v0 = vcombine.low %v513_v50, %v517_v52  ;;  %v6124_v5 = vcombine.high %v505_v60, %v509_v62  ;;  %v198_v52 = vld [vmem:[#allocation3 + $0xb0] sm:$0xff] }
 0x104   :  { %2737 = vmatprep.subr.bf16.mxu1 %v6060_v4  ;;  %v497_v4 = vld [vmem:[#allocation3 + $0xa08] sm:$0xff] }
 0x106   :  { %2695 = vmatpush1.bf16.msra.mxu0 %v5931_v6  ;;  %v501_v6 = vld [vmem:[#allocation3 + $0xa28] sm:$0xff] }
 0x107   :  { %2738 = vmatpush1.bf16.msra.mxu1 %v6059_v7  ;;  %2696 = vmatprep.subr.bf16.mxu0 %v5924_v8  ;;  %v5995_v7 = vcombine.low %v377_v57, %v381_v58  ;;  %v6123_v8 = vcombine.low %v505_v60, %v509_v62  ;;  %v6116_v14 = vcombine.high %v497_v4, %v501_v6  ;;  %v190_v62 = vld [vmem:[#allocation3 + $0x70] sm:$0xff] }
 0x108   :  { %2739 = vmatprep.subr.bf16.mxu1 %v6052_v13  ;;  %v362_v13 = vld [vmem:[#allocation3 + $0x5d0] sm:$0xff] }
 0x10a   :  { %2697 = vmatpush1.bf16.msra.mxu0 %v5923_v15  ;;  %v366_v15 = vld [vmem:[#allocation3 + $0x5f0] sm:$0xff] }
 0x10b   :  { %2740 = vmatpush1.bf16.msra.mxu1 %v6051_v17  ;;  %2698 = vmatprep.subr.bf16.mxu0 %v6044_v18  ;;  %v5987_v17 = vcombine.low %v369_v2, %v373_v3  ;;  %v6115_v18 = vcombine.low %v497_v4, %v501_v6  ;;  %v5982_v24 = vcombine.high %v362_v13, %v366_v15  ;;  %v182_v6 = vld [vmem:[#allocation3 + $0x30] sm:$0xff] }
 0x10c   :  { %2741 = vmatprep.subr.bf16.mxu1 %v6172_v23  ;;  %v354_v23 = vld [vmem:[#allocation3 + $0x590] sm:$0xff] }
 0x10e   :  { %2699 = vmatpush2.bf16.msra.mxu0 %v6043_v25  ;;  %v358_v25 = vld [vmem:[#allocation3 + $0x5b0] sm:$0xff] }
 0x10f   :  { %2742 = vmatpush2.bf16.msra.mxu1 %v6171_v26  ;;  %2700 = vmatprep.subr.bf16.mxu0 %v6036_v27  ;;  %v5853_v26 = vcombine.low %v234_v10, %v238_v11  ;;  %v5981_v27 = vcombine.low %v362_v13, %v366_v15  ;;  %v5974_v32 = vcombine.high %v354_v23, %v358_v25  ;;  %v302_v15 = vld [vmem:[#allocation3 + $0x3f0] sm:$0xff] }
 0x110   :  { %2743 = vmatprep.subr.bf16.mxu1 %v6164_v31  ;;  %v346_v31 = vld [vmem:[#allocation3 + $0x550] sm:$0xff]  ;;  %v5973_v36 = vcombine.low %v354_v23, %v358_v25 }
 0x111   :  { %v294_v25 = vld [vmem:[#allocation3 + $0x3b0] sm:$0xff] }
 0x112   :  { %2701 = vmatpush2.bf16.msra.mxu0 %v6035_v33  ;;  %v350_v33 = vld [vmem:[#allocation3 + $0x570] sm:$0xff] }
 0x113   :  { %2744 = vmatpush2.bf16.msra.mxu1 %v6163_v34  ;;  %2702 = vmatprep.subr.bf16.mxu0 %v6028_v35  ;;  %v7373_v34 = vld [vmem:[%s7536_s0 + $0x8] ss:$24 sps:$4 sm:$0xff]   ;;  %v5845_v35 = vcombine.low %v226_v20, %v230_v21  ;;  %v5965_v44 = vcombine.low %v346_v31, %v350_v33 }
 0x114   :  { %2745 = vmatprep.subr.bf16.mxu1 %v6156_v39  ;;  %v214_v39 = vld [vmem:[#allocation3 + $0x130] sm:$0xff] }
 0x115   :  { %v5830_v56 = vcombine.high %v210_v38, %v214_v39  ;;  %v5829_v22 = vcombine.low %v210_v38, %v214_v39 }
 0x116   :  { %2703 = vmatpush2.bf16.msra.mxu0 %v6027_v12  ;;  %v5966_v12 = vcombine.high %v346_v31, %v350_v33  ;;  %v286_v33 = vld [vmem:[#allocation3 + $0x370] sm:$0xff] }
 0x117   :  { %2746 = vmatpush2.bf16.msra.mxu1 %v6155_v41  ;;  %2704 = vmatprep.subr.bf16.mxu0 %v6020_v42  ;;  %v342_v41 = vld [vmem:[#allocation3 + $0x530] sm:$0xff]  ;;  %v7380_v42 = vld [vmem:[%s7536_s0 + $0x4] ss:$24 sps:$4 sm:$0xff]  }
 0x118   :  { %2747 = vmatprep.subr.bf16.mxu1 %v6148_v45  ;;  %v202_v45 = vld [vmem:[#allocation3 + $0xd0] sm:$0xff]  ;;  %v5957_v49 = vcombine.low %v338_v40, %v342_v41 }
 0x119   :  { %v5822_v50 = vcombine.high %v202_v45, %v206_v46  ;;  %v5821_v57 = vcombine.low %v202_v45, %v206_v46 }
 0x11a   :  { %2705 = vmatpush2.bf16.msra.mxu0 %v6019_v47  ;;  %v330_v47 = vld [vmem:[#allocation3 + $0x4d0] sm:$0xff] }
 0x11b   :  { %2748 = vmatpush2.bf16.msra.mxu1 %v6147_v59  ;;  %2706 = vmatprep.subr.bf16.mxu0 %v6012_v48  ;;  %v5958_v59 = vcombine.high %v338_v40, %v342_v41  ;;  %v334_v48 = vld [vmem:[#allocation3 + $0x4f0] sm:$0xff] }
 0x11c   :  { %2749 = vmatprep.subr.bf16.mxu1 %v6140_v51  ;;  %v194_v51 = vld [vmem:[#allocation3 + $0x90] sm:$0xff]  ;;  %v5949_v58 = vcombine.low %v330_v47, %v334_v48 }
 0x11d   :  { %v5814_v60 = vcombine.high %v194_v51, %v198_v52  ;;  %v5813_v2 = vcombine.low %v194_v51, %v198_v52  ;;  %v278_v41 = vld [vmem:[#allocation3 + $0x330] sm:$0xff] }
 0x11e   :  { %2707 = vmatpush2.bf16.msra.mxu0 %v6011_v53  ;;  %v322_v53 = vld [vmem:[#allocation3 + $0x490] sm:$0xff] }
 0x11f   :  { %2750 = vmatpush2.bf16.msra.mxu1 %v6139_v54  ;;  %2708 = vmatprep.subr.bf16.mxu0 %v6004_v55  ;;  %v5950_v54 = vcombine.high %v330_v47, %v334_v48  ;;  %v326_v55 = vld [vmem:[#allocation3 + $0x4b0] sm:$0xff] }
 0x120   :  { %2751 = vmatprep.subr.bf16.mxu1 %v6132_v61  ;;  %v186_v61 = vld [vmem:[#allocation3 + $0x50] sm:$0xff]  ;;  %v5941_v3 = vcombine.low %v322_v53, %v326_v55 }
 0x121   :  { %v5806_v4 = vcombine.high %v186_v61, %v190_v62  ;;  %v5805_v10 = vcombine.low %v186_v61, %v190_v62  ;;  %v270_v48 = vld [vmem:[#allocation3 + $0x2f0] sm:$0xff] }
 0x122   :  { %2709 = vmatpush2.bf16.msra.mxu0 %v6003_v63  ;;  %v314_v63 = vld [vmem:[#allocation3 + $0x450] sm:$0xff] }
 0x123   :  { %2752 = vmatpush2.bf16.msra.mxu1 %v6131_v0  ;;  %2710 = vmatprep.subr.bf16.mxu0 %v5996_v1  ;;  %v5942_v0 = vcombine.high %v322_v53, %v326_v55  ;;  %v318_v1 = vld [vmem:[#allocation3 + $0x470] sm:$0xff] }
 0x124   :  { %2753 = vmatprep.subr.bf16.mxu1 %v6124_v5  ;;  %v178_v5 = vld [vmem:[#allocation3 + $0x10] sm:$0xff]  ;;  %v5933_v11 = vcombine.low %v314_v63, %v318_v1 }
 0x125   :  { %v5798_v13 = vcombine.high %v178_v5, %v182_v6  ;;  %v5797_v20 = vcombine.low %v178_v5, %v182_v6  ;;  %v262_v55 = vld [vmem:[#allocation3 + $0x2b0] sm:$0xff] }
 0x126   :  { %2711 = vmatpush2.bf16.msra.mxu0 %v5995_v7  ;;  %v306_v7 = vld [vmem:[#allocation3 + $0x410] sm:$0xff] }
 0x127   :  { %2754 = vmatpush2.bf16.msra.mxu1 %v6123_v8  ;;  %2712 = vmatprep.subr.bf16.mxu0 %v5988_v9  ;;  %v5934_v8 = vcombine.high %v314_v63, %v318_v1  ;;  %v310_v9 = vld [vmem:[#allocation3 + $0x430] sm:$0xff] }
 0x128   :  { %2755 = vmatprep.subr.bf16.mxu1 %v6116_v14  ;;  %v298_v14 = vld [vmem:[#allocation3 + $0x3d0] sm:$0xff]  ;;  %v5925_v21 = vcombine.low %v306_v7, %v310_v9 }
 0x129   :  { %v5918_v23 = vcombine.high %v298_v14, %v302_v15  ;;  %v5917_v29 = vcombine.low %v298_v14, %v302_v15  ;;  %v254_v1 = vld [vmem:[#allocation3 + $0x270] sm:$0xff] }
 0x12a   :  { %2713 = vmatpush2.bf16.msra.mxu0 %v5987_v17  ;;  %v426_v17 = vld [vmem:[#allocation3 + $0x7d0] sm:$0xff] }
 0x12b   :  { %2756 = vmatpush2.bf16.msra.mxu1 %v6115_v18  ;;  %2768 = vmatprep.subr.bf16.mxu0 %v5854_v19  ;;  %v5926_v18 = vcombine.high %v306_v7, %v310_v9  ;;  %v430_v19 = vld [vmem:[#allocation3 + $0x7f0] sm:$0xff] }
 0x12c   :  { %2811 = vmatprep.subr.bf16.mxu1 %v5982_v24  ;;  %v290_v24 = vld [vmem:[#allocation3 + $0x390] sm:$0xff]  ;;  %v6045_v30 = vcombine.low %v426_v17, %v430_v19 }
 0x12d   :  { %2715 = vmatmul.mubr.bf16.vlgmr.msra.gmra.mxu0 %v7373_v34  ;;  %v5910_v31 = vcombine.high %v290_v24, %v294_v25  ;;  %v5909_v38 = vcombine.low %v290_v24, %v294_v25 }
 0x12e   :  { %2758 = vmatmul.mubr.bf16.vlgmr.msra.gmra.mxu1 %v7364_v16  ;;  %2769 = vmatpush1.bf16.msra.mxu0 %v5853_v26  ;;  %v7386_v16 = vld [vmem:[%s7536_s0 + $0xc] ss:$24 sps:$4 sm:$0xff]   ;;  %v418_v26 = vld [vmem:[#allocation3 + $0x790] sm:$0xff] }
 0x12f   :  { %2812 = vmatpush1.bf16.msra.mxu1 %v5981_v27  ;;  %2770 = vmatprep.subr.bf16.mxu0 %v5846_v28  ;;  %v6046_v27 = vcombine.high %v426_v17, %v430_v19  ;;  %v422_v28 = vld [vmem:[#allocation3 + $0x7b0] sm:$0xff] }
 0x130   :  { %2813 = vmatprep.subr.bf16.mxu1 %v5974_v32  ;;  %2800 = vmatprep.mubr.bf16.mxu0 %v7380_v42  ;;  %v282_v32 = vld [vmem:[#allocation3 + $0x350] sm:$0xff]  ;;  %v6037_v39 = vcombine.low %v418_v26, %v422_v28 }
 0x131   :  { %2843 = vmatprep.mubr.bf16.mxu1 %v7386_v16  ;;  %v5902_v40 = vcombine.high %v282_v32, %v286_v33  ;;  %v5901_v45 = vcombine.low %v282_v32, %v286_v33  ;;  %v490_v19 = vld [vmem:[#allocation3 + $0x9d0] sm:$0xff] }
 0x132   :  { %2771 = vmatpush1.bf16.msra.mxu0 %v5845_v35  ;;  %v410_v35 = vld [vmem:[#allocation3 + $0x750] sm:$0xff] }
 0x133   :  { %2814 = vmatpush1.bf16.msra.mxu1 %v5973_v36  ;;  %2772 = vmatprep.subr.bf16.mxu0 %v5838_v37  ;;  %v6038_v36 = vcombine.high %v418_v26, %v422_v28  ;;  %v414_v37 = vld [vmem:[#allocation3 + $0x770] sm:$0xff] }
 0x134   :  { %2815 = vmatprep.subr.bf16.mxu1 %v5966_v12  ;;  %v274_v12 = vld [vmem:[#allocation3 + $0x310] sm:$0xff]  ;;  %v6029_v46 = vcombine.low %v410_v35, %v414_v37 }
 0x135   :  { %v5894_v47 = vcombine.high %v274_v12, %v278_v41  ;;  %v5893_v51 = vcombine.low %v274_v12, %v278_v41  ;;  %v482_v28 = vld [vmem:[#allocation3 + $0x990] sm:$0xff]  ;;  %v219_v12 = vld [vmem:[#allocation3 + $0x158] sm:$0xff] }
 0x136   :  { %2773 = vmatpush1.bf16.msra.mxu0 %v5837_v43  ;;  %v402_v43 = vld [vmem:[#allocation3 + $0x710] sm:$0xff]  ;;  %v223_v41 = vld [vmem:[#allocation3 + $0x178] sm:$0xff] }
 0x137   :  { %2816 = vmatpush1.bf16.msra.mxu1 %v5965_v44  ;;  %2774 = vmatprep.subr.bf16.mxu0 %v5830_v56  ;;  %v6030_v44 = vcombine.high %v410_v35, %v414_v37  ;;  %v406_v56 = vld [vmem:[#allocation3 + $0x730] sm:$0xff] }
 0x138   :  { %2817 = vmatprep.subr.bf16.mxu1 %v5958_v59  ;;  %v266_v59 = vld [vmem:[#allocation3 + $0x2d0] sm:$0xff]  ;;  %v6021_v52 = vcombine.low %v402_v43, %v406_v56 }
 0x139   :  { %v5886_v53 = vcombine.high %v266_v59, %v270_v48  ;;  %v5885_v61 = vcombine.low %v266_v59, %v270_v48  ;;  %v474_v37 = vld [vmem:[#allocation3 + $0x950] sm:$0xff]  ;;  %v5840_v48 = vcombine.high %v219_v12, %v223_v41 }
 0x13a   :  { %2775 = vmatpush1.bf16.msra.mxu0 %v5829_v22  ;;  %v394_v22 = vld [vmem:[#allocation3 + $0x6d0] sm:$0xff] }
 0x13b   :  { %2818 = vmatpush1.bf16.msra.mxu1 %v5957_v49  ;;  %2776 = vmatprep.subr.bf16.mxu0 %v5822_v50  ;;  %v6022_v49 = vcombine.high %v402_v43, %v406_v56  ;;  %v398_v50 = vld [vmem:[#allocation3 + $0x6f0] sm:$0xff] }
 0x13c   :  { %2819 = vmatprep.subr.bf16.mxu1 %v5950_v54  ;;  %v258_v54 = vld [vmem:[#allocation3 + $0x290] sm:$0xff]  ;;  %v6013_v62 = vcombine.low %v394_v22, %v398_v50 }
 0x13d   :  { %v5878_v63 = vcombine.high %v258_v54, %v262_v55  ;;  %v5877_v5 = vcombine.low %v258_v54, %v262_v55 }
 0x13e   :  { %2777 = vmatpush1.bf16.msra.mxu0 %v5821_v57  ;;  %v386_v57 = vld [vmem:[#allocation3 + $0x690] sm:$0xff] }
 0x13f   :  { %2820 = vmatpush1.bf16.msra.mxu1 %v5949_v58  ;;  %2778 = vmatprep.subr.bf16.mxu0 %v5814_v60  ;;  %v6014_v58 = vcombine.high %v394_v22, %v398_v50  ;;  %v390_v60 = vld [vmem:[#allocation3 + $0x6b0] sm:$0xff] }
 0x140   :  { %2821 = vmatprep.subr.bf16.mxu1 %v5942_v0  ;;  %v250_v0 = vld [vmem:[#allocation3 + $0x250] sm:$0xff]  ;;  %v6005_v6 = vcombine.low %v386_v57, %v390_v60 }
 0x141   :  { %v5870_v7 = vcombine.high %v250_v0, %v254_v1  ;;  %v5869_v14 = vcombine.low %v250_v0, %v254_v1  ;;  %v466_v22 = vld [vmem:[#allocation3 + $0x910] sm:$0xff]  ;;  %v207_v0 = vld [vmem:[#allocation3 + $0xf8] sm:$0xff] }
 0x142   :  { %2779 = vmatpush1.bf16.msra.mxu0 %v5813_v2  ;;  %v378_v2 = vld [vmem:[#allocation3 + $0x650] sm:$0xff] }
 0x143   :  { %2822 = vmatpush1.bf16.msra.mxu1 %v5941_v3  ;;  %2780 = vmatprep.subr.bf16.mxu0 %v5806_v4  ;;  %v6006_v3 = vcombine.high %v386_v57, %v390_v60  ;;  %v382_v4 = vld [vmem:[#allocation3 + $0x670] sm:$0xff]  ;;  %v5839_v57 = vcombine.low %v219_v12, %v223_v41 }
 0x144   :  { %2823 = vmatprep.subr.bf16.mxu1 %v5934_v8  ;;  %v242_v8 = vld [vmem:[#allocation3 + $0x210] sm:$0xff]  ;;  %v5998_v9 = vcombine.high %v378_v2, %v382_v4  ;;  %v5997_v15 = vcombine.low %v378_v2, %v382_v4 }
 0x145   :  { %v450_v4 = vld [vmem:[#allocation3 + $0x890] sm:$0xff] }
 0x146   :  { %2781 = vmatpush1.bf16.msra.mxu0 %v5805_v10  ;;  %v246_v10 = vld [vmem:[#allocation3 + $0x230] sm:$0xff] }
 0x147   :  { %2824 = vmatpush1.bf16.msra.mxu1 %v5933_v11  ;;  %2782 = vmatprep.subr.bf16.mxu0 %v5798_v13  ;;  %v370_v11 = vld [vmem:[#allocation3 + $0x610] sm:$0xff]  ;;  %v5862_v17 = vcombine.high %v242_v8, %v246_v10  ;;  %v5861_v24 = vcombine.low %v242_v8, %v246_v10 }
 0x148   :  { %2825 = vmatprep.subr.bf16.mxu1 %v5926_v18  ;;  %v374_v13 = vld [vmem:[#allocation3 + $0x630] sm:$0xff] }
 0x149   :  { %v5990_v18 = vcombine.high %v370_v11, %v374_v13  ;;  %v5989_v25 = vcombine.low %v370_v11, %v374_v13  ;;  %v442_v13 = vld [vmem:[#allocation3 + $0x850] sm:$0xff] }
 0x14a   :  { %2783 = vmatpush1.bf16.msra.mxu0 %v5797_v20  ;;  %v494_v20 = vld [vmem:[#allocation3 + $0x9f0] sm:$0xff] }
 0x14b   :  { %2826 = vmatpush1.bf16.msra.mxu1 %v5925_v21  ;;  %2784 = vmatprep.subr.bf16.mxu0 %v5918_v23  ;;  %v235_v21 = vld [vmem:[#allocation3 + $0x1d8] sm:$0xff]  ;;  %v6110_v26 = vcombine.high %v490_v19, %v494_v20  ;;  %v6109_v32 = vcombine.low %v490_v19, %v494_v20  ;;  %v546_v12 = vld [vmem:[#allocation3 + $0xb90] sm:$0xff] }
 0x14c   :  { %2827 = vmatprep.subr.bf16.mxu1 %v6046_v27  ;;  %v239_v23 = vld [vmem:[#allocation3 + $0x1f8] sm:$0xff]  ;;  %v550_v41 = vld [vmem:[#allocation3 + $0xbb0] sm:$0xff] }
 0x14d   :  { %v5856_v27 = vcombine.high %v235_v21, %v239_v23  ;;  %v5855_v33 = vcombine.low %v235_v21, %v239_v23  ;;  %v434_v23 = vld [vmem:[#allocation3 + $0x810] sm:$0xff] }
 0x14e   :  { %2785 = vmatpush2.bf16.msra.mxu0 %v5917_v29  ;;  %v486_v29 = vld [vmem:[#allocation3 + $0x9b0] sm:$0xff] }
 0x14f   :  { %2828 = vmatpush2.bf16.msra.mxu1 %v6045_v30  ;;  %2786 = vmatprep.subr.bf16.mxu0 %v5910_v31  ;;  %v227_v30 = vld [vmem:[#allocation3 + $0x198] sm:$0xff]  ;;  %v6102_v35 = vcombine.high %v482_v28, %v486_v29 }
 0x150   :  { %2829 = vmatprep.subr.bf16.mxu1 %v6038_v36  ;;  %v231_v31 = vld [vmem:[#allocation3 + $0x1b8] sm:$0xff] }
 0x151   :  { %v5848_v36 = vcombine.high %v227_v30, %v231_v31 }
 0x152   :  { %2787 = vmatpush2.bf16.msra.mxu0 %v5909_v38  ;;  %v478_v38 = vld [vmem:[#allocation3 + $0x970] sm:$0xff] }
 0x153   :  { %2830 = vmatpush2.bf16.msra.mxu1 %v6037_v39  ;;  %2788 = vmatprep.subr.bf16.mxu0 %v5902_v40  ;;  %v7392_v40 = vld [vmem:[%s7536_s0] ss:$24 sps:$4 sm:$0xff]   ;;  %v6093_v54 = vcombine.low %v474_v37, %v478_v38 }
 0x154   :  { %2831 = vmatprep.subr.bf16.mxu1 %v6030_v44  ;;  %v6101_v44 = vcombine.low %v482_v28, %v486_v29 }
 0x156   :  { %2789 = vmatpush2.bf16.msra.mxu0 %v5901_v45 }
 0x157   :  { %2832 = vmatpush2.bf16.msra.mxu1 %v6029_v46  ;;  %2790 = vmatprep.subr.bf16.mxu0 %v5894_v47  ;;  %v5847_v46 = vcombine.low %v227_v30, %v231_v31  ;;  %v6094_v47 = vcombine.high %v474_v37, %v478_v38  ;;  %v554_v31 = vld [vmem:[#allocation3 + $0xbd0] sm:$0xff] }
 0x158   :  { %2833 = vmatprep.subr.bf16.mxu1 %v6022_v49  ;;  %v470_v49 = vld [vmem:[#allocation3 + $0x930] sm:$0xff] }
 0x159   :  { %v6085_v1 = vcombine.low %v466_v22, %v470_v49 }
 0x15a   :  { %2791 = vmatpush2.bf16.msra.mxu0 %v5893_v51  ;;  %v211_v51 = vld [vmem:[#allocation3 + $0x118] sm:$0xff] }
 0x15b   :  { %2834 = vmatpush2.bf16.msra.mxu1 %v6021_v52  ;;  %2792 = vmatprep.subr.bf16.mxu0 %v5886_v53  ;;  %v215_v52 = vld [vmem:[#allocation3 + $0x138] sm:$0xff] }
 0x15c   :  { %2835 = vmatprep.subr.bf16.mxu1 %v6014_v58  ;;  %v6086_v58 = vcombine.high %v466_v22, %v470_v49  ;;  %v5832_v60 = vcombine.high %v211_v51, %v215_v52  ;;  %v538_v49 = vld [vmem:[#allocation3 + $0xb50] sm:$0xff] }
 0x15e   :  { %2793 = vmatpush2.bf16.msra.mxu0 %v5885_v61  ;;  %v458_v61 = vld [vmem:[#allocation3 + $0x8d0] sm:$0xff] }
 0x15f   :  { %2836 = vmatpush2.bf16.msra.mxu1 %v6013_v62  ;;  %2794 = vmatprep.subr.bf16.mxu0 %v5878_v63  ;;  %v462_v62 = vld [vmem:[#allocation3 + $0x8f0] sm:$0xff]  ;;  %v203_v63 = vld [vmem:[#allocation3 + $0xd8] sm:$0xff] }
 0x160   :  { %2837 = vmatprep.subr.bf16.mxu1 %v6006_v3  ;;  %v6078_v2 = vcombine.high %v458_v61, %v462_v62  ;;  %v5824_v3 = vcombine.high %v203_v63, %v207_v0  ;;  %v6077_v8 = vcombine.low %v458_v61, %v462_v62  ;;  %v534_v61 = vld [vmem:[#allocation3 + $0xb30] sm:$0xff]  ;;  %v275_v62 = vld [vmem:[#allocation3 + $0x318] sm:$0xff] }
 0x162   :  { %2795 = vmatpush2.bf16.msra.mxu0 %v5877_v5  ;;  %v454_v5 = vld [vmem:[#allocation3 + $0x8b0] sm:$0xff] }
 0x163   :  { %2838 = vmatpush2.bf16.msra.mxu1 %v6005_v6  ;;  %2796 = vmatprep.subr.bf16.mxu0 %v5870_v7  ;;  %v195_v6 = vld [vmem:[#allocation3 + $0x98] sm:$0xff]  ;;  %v6070_v10 = vcombine.high %v450_v4, %v454_v5 }
 0x164   :  { %2839 = vmatprep.subr.bf16.mxu1 %v5998_v9  ;;  %v199_v7 = vld [vmem:[#allocation3 + $0xb8] sm:$0xff]  ;;  %v5823_v9 = vcombine.low %v203_v63, %v207_v0 }
 0x165   :  { %v5816_v11 = vcombine.high %v195_v6, %v199_v7  ;;  %v5815_v19 = vcombine.low %v195_v6, %v199_v7  ;;  %v279_v63 = vld [vmem:[#allocation3 + $0x338] sm:$0xff] }
 0x166   :  { %2797 = vmatpush2.bf16.msra.mxu0 %v5869_v14  ;;  %v446_v14 = vld [vmem:[#allocation3 + $0x870] sm:$0xff]  ;;  %v271_v6 = vld [vmem:[#allocation3 + $0x2f8] sm:$0xff] }
 0x167   :  { %2840 = vmatpush2.bf16.msra.mxu1 %v5997_v15  ;;  %2798 = vmatprep.subr.bf16.mxu0 %v5862_v17  ;;  %v187_v15 = vld [vmem:[#allocation3 + $0x58] sm:$0xff]  ;;  %v6062_v20 = vcombine.high %v442_v13, %v446_v14 }
 0x168   :  { %2841 = vmatprep.subr.bf16.mxu1 %v5990_v18  ;;  %v191_v17 = vld [vmem:[#allocation3 + $0x78] sm:$0xff]  ;;  %v6069_v18 = vcombine.low %v450_v4, %v454_v5  ;;  %v526_v4 = vld [vmem:[#allocation3 + $0xaf0] sm:$0xff] }
 0x169   :  { %v5808_v21 = vcombine.high %v187_v15, %v191_v17  ;;  %v5807_v28 = vcombine.low %v187_v15, %v191_v17  ;;  %v267_v5 = vld [vmem:[#allocation3 + $0x2d8] sm:$0xff] }
 0x16a   :  { %2799 = vmatpush2.bf16.msra.mxu0 %v5861_v24  ;;  %v438_v24 = vld [vmem:[#allocation3 + $0x830] sm:$0xff]  ;;  %v263_v15 = vld [vmem:[#allocation3 + $0x2b8] sm:$0xff] }
 0x16b   :  { %2842 = vmatpush2.bf16.msra.mxu1 %v5989_v25  ;;  %2854 = vmatprep.subr.bf16.mxu0 %v6110_v26  ;;  %v179_v25 = vld [vmem:[#allocation3 + $0x18] sm:$0xff]  ;;  %v6054_v29 = vcombine.high %v434_v23, %v438_v24 }
 0x16c   :  { %2897 = vmatprep.subr.bf16.mxu1 %v5856_v27  ;;  %v183_v26 = vld [vmem:[#allocation3 + $0x38] sm:$0xff]  ;;  %v6061_v27 = vcombine.low %v442_v13, %v446_v14  ;;  %v518_v13 = vld [vmem:[#allocation3 + $0xab0] sm:$0xff] }
 0x16d   :  { %v2544_v39 = vpop.f32.mrf.mxu0  ;;  %2801 = vmatmul.mubr.bf16.vlgmr.msra.gmra.mxu0 %v7392_v40  ;;  %v5800_v30 = vcombine.high %v179_v25, %v183_v26  ;;  %v5799_v37 = vcombine.low %v179_v25, %v183_v26  ;;  %v259_v14 = vld [vmem:[#allocation3 + $0x298] sm:$0xff] }
 0x16e   :  { %v2587_v43 = vpop.f32.mrf.mxu1  ;;  %2844 = vmatmul.mubr.bf16.vlgmr.msra.gmra.mxu1 %v7373_v34  ;;  %2855 = vmatpush1.bf16.msra.mxu0 %v6109_v32  ;;  %v7405_v34 = vld [vmem:[%s7536_s0 + $0x14] ss:$24 sps:$4 sm:$0xff]   ;;  %v255_v25 = vld [vmem:[#allocation3 + $0x278] sm:$0xff] }
 0x16f   :  { %v7396_v56 = vadd.f32 %v2587_v43, %v2544_v39  ;;  %2898 = vmatpush1.bf16.msra.mxu1 %v5855_v33  ;;  %v7398_v45 = vpop.f32.mrf.mxu0  ;;  %2856 = vmatprep.subr.bf16.mxu0 %v6102_v35  ;;  %v558_v32 = vld [vmem:[#allocation3 + $0xbf0] sm:$0xff]  ;;  %v299_v33 = vld [vmem:[#allocation3 + $0x3d8] sm:$0xff] }
 0x170   :  { %v7400_v59 = vpop.f32.mrf.mxu1  ;;  %2899 = vmatprep.subr.bf16.mxu1 %v5848_v36  ;;  %2886 = vmatprep.mubr.bf16.mxu0 %v7405_v34  ;;  %v303_v35 = vld [vmem:[#allocation3 + $0x3f8] sm:$0xff]  ;;  %v6053_v36 = vcombine.low %v434_v23, %v438_v24  ;;  %v6174_v38 = vcombine.high %v554_v31, %v558_v32  ;;  %v510_v23 = vld [vmem:[#allocation3 + $0xa70] sm:$0xff] }
 0x171   :  { %v2548_v50 = vpop.f32.mrf.mxu0  ;;  %2929 = vmatprep.mubr.bf16.mxu1 %v7380_v42  ;;  %v5831_v42 = vcombine.low %v211_v51, %v215_v52  ;;  %v5920_v39 = vcombine.high %v299_v33, %v303_v35  ;;  %v291_v43 = vld [vmem:[#allocation3 + $0x398] sm:$0xff] }
 0x172   :  { %v2591_v53 = vpop.f32.mrf.mxu1  ;;  %2857 = vmatpush1.bf16.msra.mxu0 %v6101_v44  ;;  %v295_v44 = vld [vmem:[#allocation3 + $0x3b8] sm:$0xff] }
 0x173   :  { %v7409_v55 = vadd.f32 %v2591_v53, %v2548_v50  ;;  %2900 = vmatpush1.bf16.msra.mxu1 %v5847_v46  ;;  %2858 = vmatprep.subr.bf16.mxu0 %v6094_v47  ;;  %v6173_v46 = vcombine.low %v554_v31, %v558_v32  ;;  %v5919_v47 = vcombine.low %v299_v33, %v303_v35  ;;  %v542_v50 = vld [vmem:[#allocation3 + $0xb70] sm:$0xff]  ;;  %v283_v51 = vld [vmem:[#allocation3 + $0x358] sm:$0xff]  ;;  %v3079_v32 = vlaneseq }
 0x174   :  { %2901 = vmatprep.subr.bf16.mxu1 %v5840_v48  ;;  %v6166_v48 = vcombine.high %v546_v12, %v550_v41  ;;  %v5912_v22 = vcombine.high %v291_v43, %v295_v44  ;;  %v287_v52 = vld [vmem:[#allocation3 + $0x378] sm:$0xff]  ;;  %v6165_v53 = vcombine.low %v546_v12, %v550_v41  ;;  %v6157_v0 = vcombine.low %v538_v49, %v542_v50  ;;  %v502_v31 = vld [vmem:[#allocation3 + $0xa30] sm:$0xff] }
 0x175   :  { %v251_v24 = vld [vmem:[#allocation3 + $0x258] sm:$0xff]  ;;  %v7411_v12 = vshrl.u32 %v3079_v32, 7 }
 0x176   :  { %2859 = vmatpush1.bf16.msra.mxu0 %v6093_v54  ;;  %v5911_v54 = vcombine.low %v291_v43, %v295_v44  ;;  %v243_v33 = vld [vmem:[#allocation3 + $0x218] sm:$0xff] }
 0x177   :  { %2902 = vmatpush1.bf16.msra.mxu1 %v5839_v57  ;;  %2860 = vmatprep.subr.bf16.mxu0 %v6086_v58  ;;  %v6158_v57 = vcombine.high %v538_v49, %v542_v50  ;;  %v5904_v58 = vcombine.high %v283_v51, %v287_v52  ;;  %v247_v35 = vld [vmem:[#allocation3 + $0x238] sm:$0xff]  ;;  %v7414_v49 = vsub.s32 0, %v7411_v12 }
 0x178   :  { %2903 = vmatprep.subr.bf16.mxu1 %v5832_v60  ;;  %v530_v60 = vld [vmem:[#allocation3 + $0xb10] sm:$0xff]  ;;  %v363_v41 = vld [vmem:[#allocation3 + $0x5d8] sm:$0xff] }
 0x179   :  { %v6149_v7 = vcombine.low %v530_v60, %v534_v61  ;;  %v367_v43 = vld [vmem:[#allocation3 + $0x5f8] sm:$0xff] }
 0x17a   :  { %2861 = vmatpush1.bf16.msra.mxu0 %v6085_v1  ;;  %v5903_v1 = vcombine.low %v283_v51, %v287_v52  ;;  %v491_v44 = vld [vmem:[#allocation3 + $0x9d8] sm:$0xff] }
 0x17b   :  { %2904 = vmatpush1.bf16.msra.mxu1 %v5831_v42  ;;  %2862 = vmatprep.subr.bf16.mxu0 %v6078_v2  ;;  %v6150_v42 = vcombine.high %v530_v60, %v534_v61  ;;  %v5896_v2 = vcombine.high %v275_v62, %v279_v63  ;;  %v355_v51 = vld [vmem:[#allocation3 + $0x598] sm:$0xff]  ;;  %v7418_v60 = vpop.f32.mrf.mxu0 }
 0x17c   :  { %2905 = vmatprep.subr.bf16.mxu1 %v5824_v3  ;;  %v522_v3 = vld [vmem:[#allocation3 + $0xad0] sm:$0xff]  ;;  %v359_v52 = vld [vmem:[#allocation3 + $0x5b8] sm:$0xff] }
 0x17d   :  { %v6141_v17 = vcombine.low %v522_v3, %v526_v4 }
 0x17e   :  { %2863 = vmatpush1.bf16.msra.mxu0 %v6077_v8  ;;  %v5895_v8 = vcombine.low %v275_v62, %v279_v63  ;;  %v5976_v62 = vcombine.high %v355_v51, %v359_v52 }
 0x17f   :  { %2906 = vmatpush1.bf16.msra.mxu1 %v5823_v9  ;;  %2864 = vmatprep.subr.bf16.mxu0 %v6070_v10  ;;  %v6142_v9 = vcombine.high %v522_v3, %v526_v4  ;;  %v5888_v10 = vcombine.high %v267_v5, %v271_v6  ;;  %v7425_v3 = vld [vmem:[%s7536_s0 + $0x10] ss:$24 sps:$4 sm:$0xff]   ;;  %v475_v4 = vld [vmem:[#allocation3 + $0x958] sm:$0xff] }
 0x180   :  { %2907 = vmatprep.subr.bf16.mxu1 %v5816_v11  ;;  %v514_v11 = vld [vmem:[#allocation3 + $0xa90] sm:$0xff] }
 0x181   :  { %v6133_v26 = vcombine.low %v514_v11, %v518_v13 }
 0x182   :  { %2865 = vmatpush1.bf16.msra.mxu0 %v6069_v18  ;;  %v5887_v18 = vcombine.low %v267_v5, %v271_v6  ;;  %v479_v5 = vld [vmem:[#allocation3 + $0x978] sm:$0xff] }
 0x183   :  { %2908 = vmatpush1.bf16.msra.mxu1 %v5815_v19  ;;  %2866 = vmatprep.subr.bf16.mxu0 %v6062_v20  ;;  %v6134_v19 = vcombine.high %v514_v11, %v518_v13  ;;  %v5880_v20 = vcombine.high %v259_v14, %v263_v15  ;;  %v6096_v13 = vcombine.high %v475_v4, %v479_v5 }
 0x184   :  { %2909 = vmatprep.subr.bf16.mxu1 %v5808_v21  ;;  %v506_v21 = vld [vmem:[#allocation3 + $0xa50] sm:$0xff] }
 0x186   :  { %2867 = vmatpush1.bf16.msra.mxu0 %v6061_v27  ;;  %v5879_v27 = vcombine.low %v259_v14, %v263_v15  ;;  %v339_v14 = vld [vmem:[#allocation3 + $0x518] sm:$0xff] }
 0x187   :  { %2910 = vmatpush1.bf16.msra.mxu1 %v5807_v28  ;;  %2868 = vmatprep.subr.bf16.mxu0 %v6054_v29  ;;  %v6126_v28 = vcombine.high %v506_v21, %v510_v23  ;;  %v5872_v29 = vcombine.high %v251_v24, %v255_v25  ;;  %v343_v15 = vld [vmem:[#allocation3 + $0x538] sm:$0xff] }
 0x188   :  { %2911 = vmatprep.subr.bf16.mxu1 %v5800_v30  ;;  %v498_v30 = vld [vmem:[#allocation3 + $0xa10] sm:$0xff] }
 0x18a   :  { %2869 = vmatpush1.bf16.msra.mxu0 %v6053_v36  ;;  %v6125_v36 = vcombine.low %v506_v21, %v510_v23  ;;  %v5960_v21 = vcombine.high %v339_v14, %v343_v15 }
 0x18b   :  { %2912 = vmatpush1.bf16.msra.mxu1 %v5799_v37  ;;  %2870 = vmatprep.subr.bf16.mxu0 %v6174_v38  ;;  %v5871_v37 = vcombine.low %v251_v24, %v255_v25  ;;  %v6118_v38 = vcombine.high %v498_v30, %v502_v31 }
 0x18c   :  { %2913 = vmatprep.subr.bf16.mxu1 %v5920_v39  ;;  %v5864_v39 = vcombine.high %v243_v33, %v247_v35 }
 0x18e   :  { %2871 = vmatpush2.bf16.msra.mxu0 %v6173_v46  ;;  %v495_v46 = vld [vmem:[#allocation3 + $0x9f8] sm:$0xff] }
 0x18f   :  { %2914 = vmatpush2.bf16.msra.mxu1 %v5919_v47  ;;  %2872 = vmatprep.subr.bf16.mxu0 %v6166_v48  ;;  %v6117_v47 = vcombine.low %v498_v30, %v502_v31  ;;  %v5863_v48 = vcombine.low %v243_v33, %v247_v35  ;;  %v6112_v50 = vcombine.high %v491_v44, %v495_v46  ;;  %v323_v35 = vld [vmem:[#allocation3 + $0x498] sm:$0xff] }
 0x190   :  { %2915 = vmatprep.subr.bf16.mxu1 %v5912_v22  ;;  %v5984_v22 = vcombine.high %v363_v41, %v367_v43  ;;  %v6111_v61 = vcombine.low %v491_v44, %v495_v46  ;;  %v5959_v30 = vcombine.low %v339_v14, %v343_v15  ;;  %v419_v14 = vld [vmem:[#allocation3 + $0x798] sm:$0xff] }
 0x191   :  { %v423_v15 = vld [vmem:[#allocation3 + $0x7b8] sm:$0xff] }
 0x192   :  { %2873 = vmatpush2.bf16.msra.mxu0 %v6165_v53  ;;  %v7416_v53 = vld [vmem:[#allocation5] sm:$0xff] }
 0x193   :  { %2916 = vmatpush2.bf16.msra.mxu1 %v5911_v54  ;;  %2874 = vmatprep.subr.bf16.mxu0 %v6158_v57  ;;  %v483_v54 = vld [vmem:[#allocation3 + $0x998] sm:$0xff]  ;;  %v3082_v63 = vrot.slane %v7416_v53, %v7414_v49 }
 0x194   :  { %2917 = vmatprep.subr.bf16.mxu1 %v5904_v58  ;;  %v487_v57 = vld [vmem:[#allocation3 + $0x9b8] sm:$0xff]  ;;  %v5983_v58 = vcombine.low %v363_v41, %v367_v43 }
 0x196   :  { %2875 = vmatpush2.bf16.msra.mxu0 %v6157_v0  ;;  %v6104_v0 = vcombine.high %v483_v54, %v487_v57 }
 0x197   :  { %2918 = vmatpush2.bf16.msra.mxu1 %v5903_v1  ;;  %2876 = vmatprep.subr.bf16.mxu0 %v6150_v42  ;;  %v347_v1 = vld [vmem:[#allocation3 + $0x558] sm:$0xff] }
 0x198   :  { %2919 = vmatprep.subr.bf16.mxu1 %v5896_v2  ;;  %v351_v42 = vld [vmem:[#allocation3 + $0x578] sm:$0xff] }
 0x19a   :  { %2877 = vmatpush2.bf16.msra.mxu0 %v6149_v7  ;;  %v5975_v7 = vcombine.low %v355_v51, %v359_v52 }
 0x19b   :  { %2920 = vmatpush2.bf16.msra.mxu1 %v5895_v8  ;;  %2878 = vmatprep.subr.bf16.mxu0 %v6142_v9  ;;  %v6103_v9 = vcombine.low %v483_v54, %v487_v57 }
 0x19c   :  { %2921 = vmatprep.subr.bf16.mxu1 %v5888_v10  ;;  %v5968_v10 = vcombine.high %v347_v1, %v351_v42 }
 0x19e   :  { %2879 = vmatpush2.bf16.msra.mxu0 %v6141_v17 }
 0x19f   :  { %2922 = vmatpush2.bf16.msra.mxu1 %v5887_v18  ;;  %2880 = vmatprep.subr.bf16.mxu0 %v6134_v19  ;;  %v467_v18 = vld [vmem:[#allocation3 + $0x918] sm:$0xff]  ;;  %v5967_v19 = vcombine.low %v347_v1, %v351_v42 }
 0x1a0   :  { %2923 = vmatprep.subr.bf16.mxu1 %v5880_v20  ;;  %v6095_v20 = vcombine.low %v475_v4, %v479_v5  ;;  %v427_v4 = vld [vmem:[#allocation3 + $0x7d8] sm:$0xff] }
 0x1a1   :  { %v431_v5 = vld [vmem:[#allocation3 + $0x7f8] sm:$0xff] }
 0x1a2   :  { %2881 = vmatpush2.bf16.msra.mxu0 %v6133_v26  ;;  %v331_v26 = vld [vmem:[#allocation3 + $0x4d8] sm:$0xff] }
 0x1a3   :  { %2924 = vmatpush2.bf16.msra.mxu1 %v5879_v27  ;;  %2882 = vmatprep.subr.bf16.mxu0 %v6126_v28  ;;  %v335_v27 = vld [vmem:[#allocation3 + $0x4f8] sm:$0xff] }
 0x1a4   :  { %2925 = vmatprep.subr.bf16.mxu1 %v5872_v29  ;;  %v463_v28 = vld [vmem:[#allocation3 + $0x8f8] sm:$0xff]  ;;  %v5951_v41 = vcombine.low %v331_v26, %v335_v27 }
 0x1a6   :  { %2883 = vmatpush2.bf16.msra.mxu0 %v6125_v36  ;;  %v327_v36 = vld [vmem:[#allocation3 + $0x4b8] sm:$0xff] }
 0x1a7   :  { %2926 = vmatpush2.bf16.msra.mxu1 %v5871_v37  ;;  %2884 = vmatprep.subr.bf16.mxu0 %v6118_v38  ;;  %v451_v37 = vld [vmem:[#allocation3 + $0x898] sm:$0xff]  ;;  %v5944_v44 = vcombine.high %v323_v35, %v327_v36  ;;  %v5943_v51 = vcombine.low %v323_v35, %v327_v36 }
 0x1a8   :  { %2927 = vmatprep.subr.bf16.mxu1 %v5864_v39  ;;  %v455_v38 = vld [vmem:[#allocation3 + $0x8b8] sm:$0xff] }
 0x1a9   :  { %v6072_v46 = vcombine.high %v451_v37, %v455_v38  ;;  %v6071_v52 = vcombine.low %v451_v37, %v455_v38  ;;  %v395_v36 = vld [vmem:[#allocation3 + $0x6d8] sm:$0xff] }
 0x1aa   :  { %2885 = vmatpush2.bf16.msra.mxu0 %v6117_v47  ;;  %v315_v47 = vld [vmem:[#allocation3 + $0x458] sm:$0xff] }
 0x1ab   :  { %2928 = vmatpush2.bf16.msra.mxu1 %v5863_v48  ;;  %2940 = vmatprep.subr.bf16.mxu0 %v5984_v22  ;;  %v319_v48 = vld [vmem:[#allocation3 + $0x478] sm:$0xff] }
 0x1ac   :  { %2983 = vmatprep.subr.bf16.mxu1 %v6112_v50  ;;  %v443_v22 = vld [vmem:[#allocation3 + $0x858] sm:$0xff]  ;;  %v5936_v54 = vcombine.high %v315_v47, %v319_v48 }
 0x1ad   :  { %v2630_v2 = vpop.f32.mrf.mxu0  ;;  %2887 = vmatmul.mubr.bf16.vlgmr.msra.gmra.mxu0 %v7425_v3  ;;  %v447_v50 = vld [vmem:[#allocation3 + $0x878] sm:$0xff] }
 0x1ae   :  { %v2631_v6 = vadd.f32 %v2630_v2, %v7396_v56  ;;  %2930 = vmatmul.mubr.bf16.vlgmr.msra.gmra.mxu1 %v7392_v40  ;;  %2941 = vmatpush1.bf16.msra.mxu0 %v5983_v58  ;;  %v471_v56 = vld [vmem:[#allocation3 + $0x938] sm:$0xff]  ;;  %v6064_v57 = vcombine.high %v443_v22, %v447_v50  ;;  %v6063_v1 = vcombine.low %v443_v22, %v447_v50 }
 0x1af   :  { %2984 = vmatpush1.bf16.msra.mxu1 %v6111_v61  ;;  %v7430_v8 = vpop.f32.mrf.mxu0  ;;  %2942 = vmatprep.subr.bf16.mxu0 %v5976_v62  ;;  %v6088_v25 = vcombine.high %v467_v18, %v471_v56  ;;  %v307_v58 = vld [vmem:[#allocation3 + $0x418] sm:$0xff] }
 0x1b0   :  { %v3119_v11 = vadd.f32 %v3082_v63, %v2631_v6  ;;  %2985 = vmatprep.subr.bf16.mxu1 %v6104_v0  ;;  %2972 = vmatprep.mubr.bf16.mxu0 %v7386_v16  ;;  %v459_v16 = vld [vmem:[#allocation3 + $0x8d8] sm:$0xff]  ;;  %v5935_v0 = vcombine.low %v315_v47, %v319_v48  ;;  %v2593_v47 = vpop.f32.mrf.mxu1 }
 0x1b1   :  { %v2634_v17 = vpop.f32.mrf.mxu0  ;;  %3015 = vmatprep.mubr.bf16.mxu1 %v7405_v34  ;;  %v6087_v34 = vcombine.low %v467_v18, %v471_v56  ;;  %v6080_v33 = vcombine.high %v459_v16, %v463_v28  ;;  %v6079_v43 = vcombine.low %v459_v16, %v463_v28  ;;  %v311_v61 = vld [vmem:[#allocation3 + $0x438] sm:$0xff]  ;;  %v6047_v56 = vcombine.low %v427_v4, %v431_v5 }
 0x1b2   :  { %v2635_v40 = vadd.f32 %v2634_v17, %v7409_v55  ;;  %2943 = vmatpush1.bf16.msra.mxu0 %v5975_v7  ;;  %v3135_v23 = vmul.f32 0.2, %v3119_v11  ;;  %v5952_v55 = vcombine.high %v331_v26, %v335_v27  ;;  %v435_v62 = vld [vmem:[#allocation3 + $0x818] sm:$0xff]  ;;  %v5928_v42 = vcombine.high %v307_v58, %v311_v61 }
 0x1b3   :  { %2986 = vmatpush1.bf16.msra.mxu1 %v6103_v9  ;;  %2944 = vmatprep.subr.bf16.mxu0 %v5968_v10  ;;  %v555_v6 = vld [vmem:[#allocation3 + $0xbd8] sm:$0xff]  ;;  %v5927_v9 = vcombine.low %v307_v58, %v311_v61  ;;  %v6039_v26 = vcombine.low %v419_v14, %v423_v15  ;;  %v2594_v61 = vadd.f32 %v2593_v47, %v7418_v60 }
 0x1b4   :  { %v3127_v24 = vadd.f32 %v3082_v63, %v2635_v40  ;;  %2987 = vmatprep.subr.bf16.mxu1 %v6096_v13  ;;  %v3151_v31 = vmax.f32 %v3119_v11, %v3135_v23  ;;  %v439_v63 = vld [vmem:[#allocation3 + $0x838] sm:$0xff]  ;;  %v6048_v11 = vcombine.high %v427_v4, %v431_v5 }
 0x1b5   :  { %v6056_v2 = vcombine.high %v435_v62, %v439_v63  ;;  %v559_v7 = vld [vmem:[#allocation3 + $0xbf8] sm:$0xff]  ;;  %v6055_v10 = vcombine.low %v435_v62, %v439_v63 }
 0x1b6   :  { %v3143_v29 = vmul.f32 0.2, %v3127_v24  ;;  %2945 = vmatpush1.bf16.msra.mxu0 %v5967_v19  ;;  %v6176_v13 = vcombine.high %v555_v6, %v559_v7  ;;  %v547_v17 = vld [vmem:[#allocation3 + $0xb98] sm:$0xff]  ;;  %v6175_v40 = vcombine.low %v555_v6, %v559_v7  ;;  %v6040_v19 = vcombine.high %v419_v14, %v423_v15 }
 0x1b7   :  { %2988 = vmatpush1.bf16.msra.mxu1 %v6095_v20  ;;  %2946 = vmatprep.subr.bf16.mxu0 %v5960_v21  ;;  %v551_v18 = vld [vmem:[#allocation3 + $0xbb8] sm:$0xff] }
 0x1b8   :  { %v3159_v32 = vmax.f32 %v3127_v24, %v3143_v29  ;;  %2989 = vmatprep.subr.bf16.mxu1 %v6088_v25  ;;  %v6168_v20 = vcombine.high %v547_v17, %v551_v18  ;;  %v411_v21 = vld [vmem:[#allocation3 + $0x758] sm:$0xff]  ;;  %v6167_v27 = vcombine.low %v547_v17, %v551_v18 }
 0x1b9   :  { %v415_v23 = vld [vmem:[#allocation3 + $0x778] sm:$0xff] }
 0x1ba   :  { %v7435_v39 = vpack.c.bf16 %v3159_v32, %v3151_v31  ;;  %2947 = vmatpush1.bf16.msra.mxu0 %v5959_v30  ;;  %v539_v24 = vld [vmem:[#allocation3 + $0xb58] sm:$0xff]  ;;  %v6032_v16 = vcombine.high %v411_v21, %v415_v23  ;;  %v6031_v31 = vcombine.low %v411_v21, %v415_v23 }
 0x1bb   :  { %2990 = vmatpush1.bf16.msra.mxu1 %v6087_v34  ;;  %2948 = vmatprep.subr.bf16.mxu0 %v5952_v55  ;;  %v543_v25 = vld [vmem:[#allocation3 + $0xb78] sm:$0xff] }
 0x1bc   :  { %2991 = vmatprep.subr.bf16.mxu1 %v6080_v33  ;;  %v6160_v28 = vcombine.high %v539_v24, %v543_v25  ;;  %v403_v29 = vld [vmem:[#allocation3 + $0x718] sm:$0xff]  ;;  %v6159_v32 = vcombine.low %v539_v24, %v543_v25 }
 0x1bd   :  { %v407_v30 = vld [vmem:[#allocation3 + $0x738] sm:$0xff] }
 0x1be   :  { %2949 = vmatpush1.bf16.msra.mxu0 %v5951_v41  ;;  %v531_v34 = vld [vmem:[#allocation3 + $0xb18] sm:$0xff]  ;;  %v6024_v33 = vcombine.high %v403_v29, %v407_v30 }
 0x1bf   :  { %2992 = vmatpush1.bf16.msra.mxu1 %v6079_v43  ;;  %2950 = vmatprep.subr.bf16.mxu0 %v5944_v44  ;;  %v535_v55 = vld [vmem:[#allocation3 + $0xb38] sm:$0xff]  ;;  %v6023_v43 = vcombine.low %v403_v29, %v407_v30 }
 0x1c0   :  { %2993 = vmatprep.subr.bf16.mxu1 %v6072_v46  ;;  %v6152_v35 = vcombine.high %v531_v34, %v535_v55  ;;  %v399_v37 = vld [vmem:[#allocation3 + $0x6f8] sm:$0xff]  ;;  %v6151_v44 = vcombine.low %v531_v34, %v535_v55 }
 0x1c1   :  { %v523_v38 = vld [vmem:[#allocation3 + $0xad8] sm:$0xff]  ;;  %v6016_v46 = vcombine.high %v395_v36, %v399_v37  ;;  %v6015_v58 = vcombine.low %v395_v36, %v399_v37  ;;  %v7071_v37 = vld [vmem:[%s7536_s0 + $0x8] ss:$24 sps:$4 sm:$0xff]  }
 0x1c2   :  { %2951 = vmatpush1.bf16.msra.mxu0 %v5943_v51  ;;  %v527_v41 = vld [vmem:[#allocation3 + $0xaf8] sm:$0xff] }
 0x1c3   :  { %2994 = vmatpush1.bf16.msra.mxu1 %v6071_v52  ;;  %2952 = vmatprep.subr.bf16.mxu0 %v5936_v54  ;;  %v6144_v48 = vcombine.high %v523_v38, %v527_v41  ;;  %v387_v22 = vld [vmem:[#allocation3 + $0x698] sm:$0xff]  ;;  %v7438_v54 = vsub.s32 1, %v7411_v12  ;;  %v6143_v62 = vcombine.low %v523_v38, %v527_v41 }
 0x1c4   :  { %2995 = vmatprep.subr.bf16.mxu1 %v6064_v57  ;;  %v391_v50 = vld [vmem:[#allocation3 + $0x6b8] sm:$0xff]  ;;  %v2636_v57 = vpop.f32.mrf.mxu0 }
 0x1c5   :  { %v515_v51 = vld [vmem:[#allocation3 + $0xa98] sm:$0xff]  ;;  %v6008_v63 = vcombine.high %v387_v22, %v391_v50  ;;  %v2637_v4 = vadd.f32 %v2636_v57, %v2594_v61  ;;  %v3086_v7 = vrot.slane %v7416_v53, %v7438_v54 }
 0x1c6   :  { %2953 = vmatpush1.bf16.msra.mxu0 %v5935_v0  ;;  %v519_v52 = vld [vmem:[#allocation3 + $0xab8] sm:$0xff] }
 0x1c7   :  { %2996 = vmatpush1.bf16.msra.mxu1 %v6063_v1  ;;  %2954 = vmatprep.subr.bf16.mxu0 %v5928_v42  ;;  %v6136_v0 = vcombine.high %v515_v51, %v519_v52  ;;  %v379_v1 = vld [vmem:[#allocation3 + $0x658] sm:$0xff] }
 0x1c8   :  { %2997 = vmatprep.subr.bf16.mxu1 %v6056_v2  ;;  %v383_v42 = vld [vmem:[#allocation3 + $0x678] sm:$0xff]  ;;  %v2590_v2 = vadd.f32 %v7400_v59, %v7398_v45  ;;  %v3128_v59 = vadd.f32 %v3086_v7, %v2637_v4 }
 0x1c9   :  { %v507_v5 = vld [vmem:[#allocation3 + $0xa58] sm:$0xff] }
 0x1ca   :  { %2955 = vmatpush1.bf16.msra.mxu0 %v5927_v9  ;;  %v511_v6 = vld [vmem:[#allocation3 + $0xa78] sm:$0xff]  ;;  %v6007_v9 = vcombine.low %v387_v22, %v391_v50  ;;  %v2633_v60 = vadd.f32 %v7430_v8, %v2590_v2  ;;  %v3144_v23 = vmul.f32 0.2, %v3128_v59 }
 0x1cb   :  { %2998 = vmatpush1.bf16.msra.mxu1 %v6055_v10  ;;  %2956 = vmatprep.subr.bf16.mxu0 %v6048_v11  ;;  %v6135_v10 = vcombine.low %v515_v51, %v519_v52  ;;  %v6000_v11 = vcombine.high %v379_v1, %v383_v42  ;;  %v6128_v14 = vcombine.high %v507_v5, %v511_v6  ;;  %v371_v15 = vld [vmem:[#allocation3 + $0x618] sm:$0xff] }
 0x1cc   :  { %2999 = vmatprep.subr.bf16.mxu1 %v6176_v13  ;;  %v7446_v13 = vpop.f32.mrf.mxu1  ;;  %v375_v45 = vld [vmem:[#allocation3 + $0x638] sm:$0xff]  ;;  %v3160_v29 = vmax.f32 %v3128_v59, %v3144_v23 }
 0x1cd   :  { %v499_v17 = vld [vmem:[#allocation3 + $0xa18] sm:$0xff]  ;;  %v5992_v8 = vcombine.high %v371_v15, %v375_v45  ;;  %v5991_v24 = vcombine.low %v371_v15, %v375_v45 }
 0x1ce   :  { %2957 = vmatpush2.bf16.msra.mxu0 %v6047_v56  ;;  %v503_v18 = vld [vmem:[#allocation3 + $0xa38] sm:$0xff]  ;;  %v5999_v56 = vcombine.low %v379_v1, %v383_v42 }
 0x1cf   :  { %3000 = vmatpush2.bf16.msra.mxu1 %v6175_v40  ;;  %2958 = vmatprep.subr.bf16.mxu0 %v6040_v19  ;;  %v3120_v40 = vadd.f32 %v3086_v7, %v2633_v60  ;;  %v6127_v19 = vcombine.low %v507_v5, %v511_v6  ;;  %v6120_v21 = vcombine.high %v499_v17, %v503_v18  ;;  %v6561_v30 = vld [vmem:[#allocation7 + $0xe0] ss:$16 sps:$4 sm:$0xff]   ;;  %v6575_v47 = vld [vmem:[#allocation7 + $0xa4] ss:$16 sps:$4 sm:$0xff]  }
 0x1d0   :  { %3001 = vmatprep.subr.bf16.mxu1 %v6168_v20  ;;  %v2675_v20 = vpop.f32.mrf.mxu1  ;;  %v6564_v55 = vld [vmem:[#allocation7 + $0x2e0] ss:$16 sps:$4 sm:$0xff]   ;;  %v6578_v51 = vld [vmem:[#allocation7 + $0x2a4] ss:$16 sps:$4 sm:$0xff]  }
 0x1d1   :  { %v3136_v25 = vmul.f32 0.2, %v3120_v40  ;;  %v6584_v42 = vld [vmem:[#allocation7 + $0x284] ss:$16 sps:$4 sm:$0xff]   ;;  %v6579_v5 = vld [vmem:[#allocation7 + $0x80] ss:$16 sps:$4 sm:$0xff]  }
 0x1d2   :  { %2959 = vmatpush2.bf16.msra.mxu0 %v6039_v26  ;;  %v6119_v26 = vcombine.low %v499_v17, %v503_v18  ;;  %v6582_v6 = vld [vmem:[#allocation7 + $0x280] ss:$16 sps:$4 sm:$0xff]   ;;  %v6587_v7 = vld [vmem:[#allocation7 + $0x64] ss:$16 sps:$4 sm:$0xff]  }
 0x1d3   :  { %3002 = vmatpush2.bf16.msra.mxu1 %v6167_v27  ;;  %2960 = vmatprep.subr.bf16.mxu0 %v6032_v16  ;;  %v6563_v27 = vld [vmem:[#allocation7 + $0xe4] ss:$16 sps:$4 sm:$0xff]   ;;  %v7448_v16 = vpop.f32.mrf.mxu1  ;;  %v3152_v34 = vmax.f32 %v3120_v40, %v3136_v25  ;;  %v6588_v15 = vld [vmem:[#allocation7 + $0x260] ss:$16 sps:$4 sm:$0xff]  }
 0x1d4   :  { %3003 = vmatprep.subr.bf16.mxu1 %v6160_v28  ;;  %v6566_v28 = vld [vmem:[#allocation7 + $0x2e4] ss:$16 sps:$4 sm:$0xff]   ;;  %v6591_v40 = vld [vmem:[#allocation7 + $0x40] ss:$16 sps:$4 sm:$0xff]  }
 0x1d5   :  { %v7456_v38 = vpack.c.bf16 %v3160_v29, %v3152_v34  ;;  %v6593_v45 = vld [vmem:[#allocation7 + $0x44] ss:$16 sps:$4 sm:$0xff]   ;;  %v6600_v23 = vld [vmem:[#allocation7 + $0x220] ss:$16 sps:$4 sm:$0xff]  }
 0x1d6   :  { %2961 = vmatpush2.bf16.msra.mxu0 %v6031_v31  ;;  %v2679_v31 = vpop.f32.mrf.mxu1  ;;  %v6596_v18 = vld [vmem:[#allocation7 + $0x244] ss:$16 sps:$4 sm:$0xff]   ;;  %v6612_v34 = vld [vmem:[#allocation7 + $0x3e0] ss:$16 sps:$4 sm:$0xff]  }
 0x1d7   :  { %3004 = vmatpush2.bf16.msra.mxu1 %v6159_v32  ;;  %2962 = vmatprep.subr.bf16.mxu0 %v6024_v33  ;;  %v3093_v32 = vsub.s32 3, %v7411_v12  ;;  %v6569_v33 = vld [vmem:[#allocation7 + $0xc4] ss:$16 sps:$4 sm:$0xff]  }
 0x1d8   :  { %3005 = vmatprep.subr.bf16.mxu1 %v6152_v35  ;;  %v6572_v35 = vld [vmem:[#allocation7 + $0x2c4] ss:$16 sps:$4 sm:$0xff]  }
 0x1d9   :  { %v3094_v50 = vrot.slane %v7416_v53, %v3093_v32  ;;  %v6608_v25 = vld [vmem:[#allocation7 + $0x204] ss:$16 sps:$4 sm:$0xff]  }
 0x1da   :  { %2963 = vmatpush2.bf16.msra.mxu0 %v6023_v43  ;;  %v6567_v43 = vld [vmem:[#allocation7 + $0xc0] ss:$16 sps:$4 sm:$0xff]   ;;  %v6614_v29 = vld [vmem:[#allocation7 + $0x3e4] ss:$16 sps:$4 sm:$0xff]  }
 0x1db   :  { %3006 = vmatpush2.bf16.msra.mxu1 %v6151_v44  ;;  %2964 = vmatprep.subr.bf16.mxu0 %v6016_v46  ;;  %v6570_v46 = vld [vmem:[#allocation7 + $0x2c0] ss:$16 sps:$4 sm:$0xff]  }
 0x1dc   :  { %3007 = vmatprep.subr.bf16.mxu1 %v6144_v48 }
 0x1de   :  { %2965 = vmatpush2.bf16.msra.mxu0 %v6015_v58  ;;  %v6573_v58 = vld [vmem:[#allocation7 + $0xa0] ss:$16 sps:$4 sm:$0xff]  }
 0x1df   :  { %3008 = vmatpush2.bf16.msra.mxu1 %v6143_v62  ;;  %2966 = vmatprep.subr.bf16.mxu0 %v6008_v63  ;;  %v6576_v62 = vld [vmem:[#allocation7 + $0x2a0] ss:$16 sps:$4 sm:$0xff]   ;;  %v6581_v63 = vld [vmem:[#allocation7 + $0x84] ss:$16 sps:$4 sm:$0xff]  }
 0x1e0   :  { %3009 = vmatprep.subr.bf16.mxu1 %v6136_v0 }
 0x1e2   :  { %2967 = vmatpush2.bf16.msra.mxu0 %v6007_v9 }
 0x1e3   :  { %3010 = vmatpush2.bf16.msra.mxu1 %v6135_v10  ;;  %2968 = vmatprep.subr.bf16.mxu0 %v6000_v11  ;;  %v6590_v10 = vld [vmem:[#allocation7 + $0x264] ss:$16 sps:$4 sm:$0xff]  }
 0x1e4   :  { %3011 = vmatprep.subr.bf16.mxu1 %v6128_v14  ;;  %v6585_v14 = vld [vmem:[#allocation7 + $0x60] ss:$16 sps:$4 sm:$0xff]  }
 0x1e6   :  { %2969 = vmatpush2.bf16.msra.mxu0 %v5999_v56 }
 0x1e7   :  { %3012 = vmatpush2.bf16.msra.mxu1 %v6127_v19  ;;  %2970 = vmatprep.subr.bf16.mxu0 %v5992_v8  ;;  %v6594_v19 = vld [vmem:[#allocation7 + $0x240] ss:$16 sps:$4 sm:$0xff]   ;;  %v6599_v8 = vld [vmem:[#allocation7 + $0x24] ss:$16 sps:$4 sm:$0xff]  }
 0x1e8   :  { %3013 = vmatprep.subr.bf16.mxu1 %v6120_v21  ;;  %v6597_v21 = vld [vmem:[#allocation7 + $0x20] ss:$16 sps:$4 sm:$0xff]  }
 0x1ea   :  { %2971 = vmatpush2.bf16.msra.mxu0 %v5991_v24  ;;  %v6605_v24 = vld [vmem:[#allocation7 + $0x4] ss:$16 sps:$4 sm:$0xff]  }
 0x1eb   :  { %3014 = vmatpush2.bf16.msra.mxu1 %v6119_v26  ;;  %4733 = vmatprep.subr.bf16.mxu0 %v6563_v27  ;;  %v6603_v26 = vld [vmem:[#allocation7] ss:$16 sps:$4 sm:$0xff]  }
 0x1ec   :  { %4776 = vmatprep.subr.bf16.mxu1 %v6566_v28  ;;  %v6606_v27 = vld [vmem:[#allocation7 + $0x200] ss:$16 sps:$4 sm:$0xff]   ;;  %v6611_v28 = vld [vmem:[#allocation7 + $0x1e4] ss:$16 sps:$4 sm:$0xff]  }
 0x1ed   :  { %v7451_v36 = vpop.f32.mrf.mxu0  ;;  %2973 = vmatmul.mubr.bf16.vlgmr.msra.gmra.mxu0 %v7071_v37  ;;  %v6623_v37 = vld [vmem:[#allocation7 + $0x1a4] ss:$16 sps:$4 sm:$0xff]  }
 0x1ee   :  { %v7458_v41 = vpop.f32.mrf.mxu1  ;;  %3016 = vmatmul.mubr.bf16.vlgmr.msra.gmra.mxu1 %v7425_v3  ;;  %4734 = vmatpush1.bf16.msra.mxu0 %v6561_v30  ;;  %v6609_v30 = vld [vmem:[#allocation7 + $0x1e0] ss:$16 sps:$4 sm:$0xff]  }
 0x1ef   :  { %4765 = vmatprep.mubr.bf16.mxu0 %v7456_v38  ;;  %4777 = vmatpush1.bf16.msra.mxu1 %v6564_v55  ;;  %v2718_v44 = vpop.f32.mrf.mxu0  ;;  %v6617_v55 = vld [vmem:[#allocation7 + $0x1c4] ss:$16 sps:$4 sm:$0xff]  }
 0x1f0   :  { %v2719_v48 = vadd.f32 %v2718_v44, %v2675_v20  ;;  %v2761_v22 = vpop.f32.mrf.mxu1  ;;  %4735 = vmatprep.subr.bf16.mxu0 %v6569_v33  ;;  %4778 = vmatprep.subr.bf16.mxu1 %v6572_v35  ;;  %v6602_v20 = vld [vmem:[#allocation7 + $0x224] ss:$16 sps:$4 sm:$0xff]   ;;  %v6615_v33 = vld [vmem:[#allocation7 + $0x1c0] ss:$16 sps:$4 sm:$0xff]  }
 0x1f1   :  { %v7465_v52 = vpop.f32.mrf.mxu0  ;;  %v6618_v35 = vld [vmem:[#allocation7 + $0x3c0] ss:$16 sps:$4 sm:$0xff]  }
 0x1f2   :  { %v2762_v3 = vadd.f32 %v2761_v22, %v2719_v48  ;;  %v7467_v57 = vpop.f32.mrf.mxu1  ;;  %4736 = vmatpush1.bf16.msra.mxu0 %v6567_v43  ;;  %v6626_v43 = vld [vmem:[#allocation7 + $0x3a4] ss:$16 sps:$4 sm:$0xff]   ;;  %v6621_v44 = vld [vmem:[#allocation7 + $0x1a0] ss:$16 sps:$4 sm:$0xff]  }
 0x1f3   :  { %4779 = vmatpush1.bf16.msra.mxu1 %v6570_v46  ;;  %v2722_v61 = vpop.f32.mrf.mxu0  ;;  %4737 = vmatprep.subr.bf16.mxu0 %v6575_v47  ;;  %v6624_v46 = vld [vmem:[#allocation7 + $0x3a0] ss:$16 sps:$4 sm:$0xff]   ;;  %v6629_v47 = vld [vmem:[#allocation7 + $0x184] ss:$16 sps:$4 sm:$0xff]  }
 0x1f4   :  { %v3122_v0 = vadd.f32 %v3094_v50, %v2762_v3  ;;  %v2723_v1 = vadd.f32 %v2722_v61, %v2679_v31  ;;  %4780 = vmatprep.subr.bf16.mxu1 %v6578_v51  ;;  %v2765_v2 = vpop.f32.mrf.mxu1  ;;  %v6620_v31 = vld [vmem:[#allocation7 + $0x3c4] ss:$16 sps:$4 sm:$0xff]   ;;  %v6627_v22 = vld [vmem:[#allocation7 + $0x180] ss:$16 sps:$4 sm:$0xff]   ;;  %v2721_v3 = vadd.f32 %v7465_v52, %v7448_v16  ;;  %v2717_v61 = vadd.f32 %v7451_v36, %v7446_v13 }
 0x1f5   :  { %v6632_v48 = vld [vmem:[#allocation7 + $0x384] ss:$16 sps:$4 sm:$0xff]   ;;  %v6639_v13 = vld [vmem:[#allocation7 + $0x140] ss:$16 sps:$4 sm:$0xff]  }
 0x1f6   :  { %v2766_v4 = vadd.f32 %v2765_v2, %v2723_v1  ;;  %4738 = vmatpush1.bf16.msra.mxu0 %v6573_v58  ;;  %v3138_v9 = vmul.f32 0.2, %v3122_v0  ;;  %v6635_v51 = vld [vmem:[#allocation7 + $0x164] ss:$16 sps:$4 sm:$0xff]   ;;  %v6642_v36 = vld [vmem:[#allocation7 + $0x340] ss:$16 sps:$4 sm:$0xff]  }
 0x1f7   :  { %4781 = vmatpush1.bf16.msra.mxu1 %v6576_v62  ;;  %4739 = vmatprep.subr.bf16.mxu0 %v6581_v63  ;;  %v6638_v58 = vld [vmem:[#allocation7 + $0x364] ss:$16 sps:$4 sm:$0xff]   ;;  %v3089_v62 = vsub.s32 2, %v7411_v12  ;;  %v6633_v63 = vld [vmem:[#allocation7 + $0x160] ss:$16 sps:$4 sm:$0xff]  }
 0x1f8   :  { %v3130_v60 = vadd.f32 %v3094_v50, %v2766_v4  ;;  %4782 = vmatprep.subr.bf16.mxu1 %v6584_v42  ;;  %v3154_v59 = vmax.f32 %v3122_v0, %v3138_v9  ;;  %v6630_v50 = vld [vmem:[#allocation7 + $0x380] ss:$16 sps:$4 sm:$0xff]   ;;  %v6641_v1 = vld [vmem:[#allocation7 + $0x144] ss:$16 sps:$4 sm:$0xff]   ;;  %v2764_v42 = vadd.f32 %v7467_v57, %v2721_v3  ;;  %v2760_v4 = vadd.f32 %v7458_v41, %v2717_v61 }
 0x1f9   :  { %v6636_v0 = vld [vmem:[#allocation7 + $0x360] ss:$16 sps:$4 sm:$0xff]   ;;  %v6644_v2 = vld [vmem:[#allocation7 + $0x344] ss:$16 sps:$4 sm:$0xff]   ;;  %v3090_v16 = vrot.slane %v7416_v53, %v3089_v62 }
 0x1fa   :  { %v3146_v11 = vmul.f32 0.2, %v3130_v60  ;;  %4740 = vmatpush1.bf16.msra.mxu0 %v6579_v5  ;;  %v6647_v52 = vld [vmem:[#allocation7 + $0x124] ss:$16 sps:$4 sm:$0xff]   ;;  %v6645_v57 = vld [vmem:[#allocation7 + $0x120] ss:$16 sps:$4 sm:$0xff]  }
 0x1fb   :  { %4783 = vmatpush1.bf16.msra.mxu1 %v6582_v6  ;;  %4741 = vmatprep.subr.bf16.mxu0 %v6587_v7  ;;  %v3129_v5 = vadd.f32 %v3090_v16, %v2764_v42  ;;  %v6650_v6 = vld [vmem:[#allocation7 + $0x324] ss:$16 sps:$4 sm:$0xff]   ;;  %v3121_v7 = vadd.f32 %v3090_v16, %v2760_v4  ;;  %v6648_v9 = vld [vmem:[#allocation7 + $0x320] ss:$16 sps:$4 sm:$0xff]  }
 0x1fc   :  { %v3162_v17 = vmax.f32 %v3130_v60, %v3146_v11  ;;  %4784 = vmatprep.subr.bf16.mxu1 %v6590_v10  ;;  %v6653_v41 = vld [vmem:[#allocation7 + $0x104] ss:$16 sps:$4 sm:$0xff]   ;;  %v6651_v11 = vld [vmem:[#allocation7 + $0x100] ss:$16 sps:$4 sm:$0xff]  }
 0x1fd   :  { %v3145_v60 = vmul.f32 0.2, %v3129_v5  ;;  %v6656_v10 = vld [vmem:[#allocation7 + $0x304] ss:$16 sps:$4 sm:$0xff]   ;;  %v3137_v53 = vmul.f32 0.2, %v3121_v7 }
 0x1fe   :  { %4742 = vmatpush1.bf16.msra.mxu0 %v6585_v14  ;;  %v7469_v56 = vpack.c.bf16 %v3162_v17, %v3154_v59  ;;  %v6654_v14 = vld [vmem:[#allocation7 + $0x300] ss:$16 sps:$4 sm:$0xff]   ;;  %v6710_v59 = vld [vmem:[#allocation7 + $0x6e4] ss:$16 sps:$4 sm:$0xff]  }
 0x1ff   :  { %4785 = vmatpush1.bf16.msra.mxu1 %v6588_v15  ;;  %4743 = vmatprep.subr.bf16.mxu0 %v6593_v45  ;;  %v6659_v15 = vld [vmem:[#allocation7 + $0x4e4] ss:$16 sps:$4 sm:$0xff]   ;;  %v3161_v45 = vmax.f32 %v3129_v5, %v3145_v60  ;;  %v3153_v17 = vmax.f32 %v3121_v7, %v3137_v53  ;;  %v6684_v16 = vld [vmem:[#allocation7 + $0x5c0] ss:$16 sps:$4 sm:$0xff]  }
 0x200   :  { %4808 = vmatprep.mubr.bf16.mxu1 %v7469_v56  ;;  %4786 = vmatprep.subr.bf16.mxu1 %v6596_v18  ;;  %v6657_v18 = vld [vmem:[#allocation7 + $0x4e0] ss:$16 sps:$4 sm:$0xff]   ;;  %v6752_v3 = vld [vmem:[#allocation7 + $0x604] ss:$16 sps:$4 sm:$0xff]  }
 0x201   :  { %v6683_v61 = vld [vmem:[#allocation7 + $0x5e4] ss:$16 sps:$4 sm:$0xff]   ;;  %v6687_v5 = vld [vmem:[#allocation7 + $0x5a0] ss:$16 sps:$4 sm:$0xff]  }
 0x202   :  { %4744 = vmatpush1.bf16.msra.mxu0 %v6591_v40  ;;  %v6662_v40 = vld [vmem:[#allocation7 + $0x4c4] ss:$16 sps:$4 sm:$0xff]   ;;  %v6768_v7 = vld [vmem:[#allocation7 + $0x7a0] ss:$16 sps:$4 sm:$0xff]  }
 0x203   :  { %4787 = vmatpush1.bf16.msra.mxu1 %v6594_v19  ;;  %4745 = vmatprep.subr.bf16.mxu0 %v6599_v8  ;;  %v6708_v19 = vld [vmem:[#allocation7 + $0x6e0] ss:$16 sps:$4 sm:$0xff]   ;;  %v7482_v8 = vpack.c.bf16 %v3161_v45, %v3153_v17  ;;  %v6686_v42 = vld [vmem:[#allocation7 + $0x5c4] ss:$16 sps:$4 sm:$0xff]  }
 0x204   :  { %4788 = vmatprep.subr.bf16.mxu1 %v6602_v20  ;;  %v6716_v20 = vld [vmem:[#allocation7 + $0x6c4] ss:$16 sps:$4 sm:$0xff]   ;;  %v6774_v60 = vld [vmem:[#allocation7 + $0x780] ss:$16 sps:$4 sm:$0xff]  }
 0x205   :  { %v6764_v4 = vld [vmem:[#allocation7 + $0x7c4] ss:$16 sps:$4 sm:$0xff]   ;;  %v6693_v53 = vld [vmem:[#allocation7 + $0x560] ss:$16 sps:$4 sm:$0xff]  }
 0x206   :  { %4746 = vmatpush1.bf16.msra.mxu0 %v6597_v21  ;;  %v6660_v21 = vld [vmem:[#allocation7 + $0x4c0] ss:$16 sps:$4 sm:$0xff]   ;;  %v6701_v17 = vld [vmem:[#allocation7 + $0x524] ss:$16 sps:$4 sm:$0xff]  }
 0x207   :  { %4789 = vmatpush1.bf16.msra.mxu1 %v6600_v23  ;;  %4747 = vmatprep.subr.bf16.mxu0 %v6605_v24  ;;  %v6665_v23 = vld [vmem:[#allocation7 + $0x4a4] ss:$16 sps:$4 sm:$0xff]   ;;  %v6714_v24 = vld [vmem:[#allocation7 + $0x6c0] ss:$16 sps:$4 sm:$0xff]  }
 0x208   :  { %4790 = vmatprep.subr.bf16.mxu1 %v6608_v25  ;;  %v6722_v25 = vld [vmem:[#allocation7 + $0x6a4] ss:$16 sps:$4 sm:$0xff]   ;;  %v6696_v45 = vld [vmem:[#allocation7 + $0x540] ss:$16 sps:$4 sm:$0xff]  }
 0x20a   :  { %4748 = vmatpush1.bf16.msra.mxu0 %v6603_v26  ;;  %v6663_v26 = vld [vmem:[#allocation7 + $0x4a0] ss:$16 sps:$4 sm:$0xff]  }
 0x20b   :  { %4791 = vmatpush1.bf16.msra.mxu1 %v6606_v27  ;;  %4749 = vmatprep.subr.bf16.mxu0 %v6611_v28  ;;  %v6668_v27 = vld [vmem:[#allocation7 + $0x484] ss:$16 sps:$4 sm:$0xff]   ;;  %v6720_v28 = vld [vmem:[#allocation7 + $0x6a0] ss:$16 sps:$4 sm:$0xff]  }
 0x20c   :  { %4792 = vmatprep.subr.bf16.mxu1 %v6614_v29  ;;  %v6728_v29 = vld [vmem:[#allocation7 + $0x684] ss:$16 sps:$4 sm:$0xff]  }
 0x20e   :  { %4750 = vmatpush2.bf16.msra.mxu0 %v6609_v30  ;;  %v6666_v30 = vld [vmem:[#allocation7 + $0x480] ss:$16 sps:$4 sm:$0xff]  }
 0x20f   :  { %4793 = vmatpush2.bf16.msra.mxu1 %v6612_v34  ;;  %4751 = vmatprep.subr.bf16.mxu0 %v6617_v55  ;;  %v6671_v34 = vld [vmem:[#allocation7 + $0x464] ss:$16 sps:$4 sm:$0xff]   ;;  %v6726_v55 = vld [vmem:[#allocation7 + $0x680] ss:$16 sps:$4 sm:$0xff]  }
 0x210   :  { %4794 = vmatprep.subr.bf16.mxu1 %v6620_v31  ;;  %v6734_v31 = vld [vmem:[#allocation7 + $0x664] ss:$16 sps:$4 sm:$0xff]  }
 0x212   :  { %4752 = vmatpush2.bf16.msra.mxu0 %v6615_v33  ;;  %v6669_v33 = vld [vmem:[#allocation7 + $0x460] ss:$16 sps:$4 sm:$0xff]  }
 0x213   :  { %4795 = vmatpush2.bf16.msra.mxu1 %v6618_v35  ;;  %4753 = vmatprep.subr.bf16.mxu0 %v6623_v37  ;;  %v6674_v35 = vld [vmem:[#allocation7 + $0x444] ss:$16 sps:$4 sm:$0xff]   ;;  %v6732_v37 = vld [vmem:[#allocation7 + $0x660] ss:$16 sps:$4 sm:$0xff]  }
 0x214   :  { %4796 = vmatprep.subr.bf16.mxu1 %v6626_v43  ;;  %v6740_v43 = vld [vmem:[#allocation7 + $0x644] ss:$16 sps:$4 sm:$0xff]  }
 0x216   :  { %4754 = vmatpush2.bf16.msra.mxu0 %v6621_v44  ;;  %v6672_v44 = vld [vmem:[#allocation7 + $0x440] ss:$16 sps:$4 sm:$0xff]  }
 0x217   :  { %4797 = vmatpush2.bf16.msra.mxu1 %v6624_v46  ;;  %4755 = vmatprep.subr.bf16.mxu0 %v6629_v47  ;;  %v6677_v46 = vld [vmem:[#allocation7 + $0x424] ss:$16 sps:$4 sm:$0xff]   ;;  %v6738_v47 = vld [vmem:[#allocation7 + $0x640] ss:$16 sps:$4 sm:$0xff]  }
 0x218   :  { %4798 = vmatprep.subr.bf16.mxu1 %v6632_v48  ;;  %v6746_v48 = vld [vmem:[#allocation7 + $0x624] ss:$16 sps:$4 sm:$0xff]  }
 0x21a   :  { %4756 = vmatpush2.bf16.msra.mxu0 %v6627_v22  ;;  %v6675_v22 = vld [vmem:[#allocation7 + $0x420] ss:$16 sps:$4 sm:$0xff]  }
 0x21b   :  { %4799 = vmatpush2.bf16.msra.mxu1 %v6630_v50  ;;  %4757 = vmatprep.subr.bf16.mxu0 %v6635_v51  ;;  %v6680_v50 = vld [vmem:[#allocation7 + $0x404] ss:$16 sps:$4 sm:$0xff]   ;;  %v6744_v51 = vld [vmem:[#allocation7 + $0x620] ss:$16 sps:$4 sm:$0xff]  }
 0x21c   :  { %4800 = vmatprep.subr.bf16.mxu1 %v6638_v58  ;;  %v6678_v58 = vld [vmem:[#allocation7 + $0x400] ss:$16 sps:$4 sm:$0xff]  }
 0x21e   :  { %4758 = vmatpush2.bf16.msra.mxu0 %v6633_v63  ;;  %v6750_v63 = vld [vmem:[#allocation7 + $0x600] ss:$16 sps:$4 sm:$0xff]  }
 0x21f   :  { %4801 = vmatpush2.bf16.msra.mxu1 %v6636_v0  ;;  %4759 = vmatprep.subr.bf16.mxu0 %v6641_v1  ;;  %v6758_v0 = vld [vmem:[#allocation7 + $0x7e4] ss:$16 sps:$4 sm:$0xff]   ;;  %v6681_v1 = vld [vmem:[#allocation7 + $0x5e0] ss:$16 sps:$4 sm:$0xff]  }
 0x220   :  { %4802 = vmatprep.subr.bf16.mxu1 %v6644_v2  ;;  %v6756_v2 = vld [vmem:[#allocation7 + $0x7e0] ss:$16 sps:$4 sm:$0xff]  }
 0x222   :  { %4760 = vmatpush2.bf16.msra.mxu0 %v6639_v13  ;;  %v6689_v13 = vld [vmem:[#allocation7 + $0x5a4] ss:$16 sps:$4 sm:$0xff]  }
 0x223   :  { %4803 = vmatpush2.bf16.msra.mxu1 %v6642_v36  ;;  %4761 = vmatprep.subr.bf16.mxu0 %v6647_v52  ;;  %v6762_v36 = vld [vmem:[#allocation7 + $0x7c0] ss:$16 sps:$4 sm:$0xff]   ;;  %v6770_v52 = vld [vmem:[#allocation7 + $0x7a4] ss:$16 sps:$4 sm:$0xff]  }
 0x224   :  { %4804 = vmatprep.subr.bf16.mxu1 %v6650_v6  ;;  %v6692_v6 = vld [vmem:[#allocation7 + $0x584] ss:$16 sps:$4 sm:$0xff]  }
 0x226   :  { %4762 = vmatpush2.bf16.msra.mxu0 %v6645_v57  ;;  %v6776_v57 = vld [vmem:[#allocation7 + $0x784] ss:$16 sps:$4 sm:$0xff]  }
 0x227   :  { %4805 = vmatpush2.bf16.msra.mxu1 %v6648_v9  ;;  %4763 = vmatprep.subr.bf16.mxu0 %v6653_v41  ;;  %v6690_v9 = vld [vmem:[#allocation7 + $0x580] ss:$16 sps:$4 sm:$0xff]   ;;  %v6695_v41 = vld [vmem:[#allocation7 + $0x564] ss:$16 sps:$4 sm:$0xff]  }
 0x228   :  { %4806 = vmatprep.subr.bf16.mxu1 %v6656_v10  ;;  %v6782_v10 = vld [vmem:[#allocation7 + $0x764] ss:$16 sps:$4 sm:$0xff]  }
 0x22a   :  { %4764 = vmatpush2.bf16.msra.mxu0 %v6651_v11  ;;  %v6698_v11 = vld [vmem:[#allocation7 + $0x544] ss:$16 sps:$4 sm:$0xff]  }
 0x22b   :  { %4807 = vmatpush2.bf16.msra.mxu1 %v6654_v14  ;;  %4819 = vmatprep.subr.bf16.mxu0 %v6659_v15  ;;  %v6780_v14 = vld [vmem:[#allocation7 + $0x760] ss:$16 sps:$4 sm:$0xff]   ;;  %v6788_v15 = vld [vmem:[#allocation7 + $0x744] ss:$16 sps:$4 sm:$0xff]  }
 0x22c   :  { %4862 = vmatprep.subr.bf16.mxu1 %v6710_v59 }
 0x22d   :  { %4766 = vmatmul.mubr.bf16.vlgmr.msra.gmra.mxu0 %v7435_v39  ;;  %v2802_v59 = vpop.f32.mrf.mxu0 }
 0x22e   :  { %4809 = vmatmul.mubr.bf16.vlgmr.msra.gmra.mxu1 %v7482_v8  ;;  %4820 = vmatpush1.bf16.msra.mxu0 %v6657_v18  ;;  %v6786_v18 = vld [vmem:[#allocation7 + $0x740] ss:$16 sps:$4 sm:$0xff]  }
 0x22f   :  { %4821 = vmatprep.subr.bf16.mxu0 %v6662_v40  ;;  %4863 = vmatpush1.bf16.msra.mxu1 %v6708_v19  ;;  %v6794_v40 = vld [vmem:[#allocation7 + $0x724] ss:$16 sps:$4 sm:$0xff]   ;;  %v6699_v19 = vld [vmem:[#allocation7 + $0x520] ss:$16 sps:$4 sm:$0xff]  }
 0x230   :  { %4864 = vmatprep.subr.bf16.mxu1 %v6716_v20  ;;  %v2845_v20 = vpop.f32.mrf.mxu1 }
 0x232   :  { %4822 = vmatpush1.bf16.msra.mxu0 %v6660_v21  ;;  %v2804_v21 = vpop.f32.mrf.mxu0 }
 0x233   :  { %4823 = vmatprep.subr.bf16.mxu0 %v6665_v23  ;;  %4865 = vmatpush1.bf16.msra.mxu1 %v6714_v24  ;;  %v6704_v23 = vld [vmem:[#allocation7 + $0x504] ss:$16 sps:$4 sm:$0xff]   ;;  %v6792_v24 = vld [vmem:[#allocation7 + $0x720] ss:$16 sps:$4 sm:$0xff]  }
 0x234   :  { %4866 = vmatprep.subr.bf16.mxu1 %v6722_v25  ;;  %v6800_v25 = vld [vmem:[#allocation7 + $0x704] ss:$16 sps:$4 sm:$0xff]  }
 0x236   :  { %4824 = vmatpush1.bf16.msra.mxu0 %v6663_v26  ;;  %v6702_v26 = vld [vmem:[#allocation7 + $0x500] ss:$16 sps:$4 sm:$0xff]  }
 0x237   :  { %4825 = vmatprep.subr.bf16.mxu0 %v6668_v27  ;;  %4867 = vmatpush1.bf16.msra.mxu1 %v6720_v28  ;;  %v2847_v27 = vpop.f32.mrf.mxu1  ;;  %v2806_v28 = vpop.f32.mrf.mxu0 }
 0x238   :  { %4868 = vmatprep.subr.bf16.mxu1 %v6728_v29  ;;  %v6707_v29 = vld [vmem:[#allocation7 + $0xec] ss:$16 sps:$4 sm:$0xff]  }
 0x23a   :  { %4826 = vmatpush1.bf16.msra.mxu0 %v6666_v30  ;;  %v6798_v30 = vld [vmem:[#allocation7 + $0x700] ss:$16 sps:$4 sm:$0xff]  }
 0x23b   :  { %4827 = vmatprep.subr.bf16.mxu0 %v6671_v34  ;;  %4869 = vmatpush1.bf16.msra.mxu1 %v6726_v55  ;;  %v6806_v34 = vld [vmem:[#allocation7 + $0x2ec] ss:$16 sps:$4 sm:$0xff]   ;;  %v3101_v55 = vsub.s32 5, %v7411_v12 }
 0x23c   :  { %4870 = vmatprep.subr.bf16.mxu1 %v6734_v31  ;;  %v2849_v31 = vpop.f32.mrf.mxu1 }
 0x23e   :  { %4828 = vmatpush1.bf16.msra.mxu0 %v6669_v33  ;;  %v2808_v33 = vpop.f32.mrf.mxu0 }
 0x23f   :  { %4829 = vmatprep.subr.bf16.mxu0 %v6674_v35  ;;  %4871 = vmatpush1.bf16.msra.mxu1 %v6732_v37  ;;  %v3097_v35 = vsub.s32 4, %v7411_v12  ;;  %v2846_v37 = vadd.f32 %v2845_v20, %v2802_v59  ;;  %v6725_v59 = vld [vmem:[#allocation7 + $0x8c] ss:$16 sps:$4 sm:$0xff]   ;;  %v6735_v20 = vld [vmem:[#allocation7 + $0x48] ss:$16 sps:$4 sm:$0xff]  }
 0x240   :  { %4872 = vmatprep.subr.bf16.mxu1 %v6740_v43 }
 0x242   :  { %4830 = vmatpush1.bf16.msra.mxu0 %v6672_v44  ;;  %v2848_v44 = vadd.f32 %v2847_v27, %v2804_v21  ;;  %v6743_v21 = vld [vmem:[#allocation7 + $0x2c] ss:$16 sps:$4 sm:$0xff]  }
 0x243   :  { %4831 = vmatprep.subr.bf16.mxu0 %v6677_v46  ;;  %4873 = vmatpush1.bf16.msra.mxu1 %v6738_v47  ;;  %v7488_v46 = vld [vmem:[#allocation5] sm:$0xff] }
 0x244   :  { %4874 = vmatprep.subr.bf16.mxu1 %v6746_v48  ;;  %v3102_v47 = vrot.slane %v7488_v46, %v3101_v55  ;;  %v2851_v48 = vpop.f32.mrf.mxu1  ;;  %v6761_v27 = vld [vmem:[#allocation7 + $0x1cc] ss:$16 sps:$4 sm:$0xff]   ;;  %v6765_v55 = vld [vmem:[#allocation7 + $0x1a8] ss:$16 sps:$4 sm:$0xff]  }
 0x246   :  { %4832 = vmatpush1.bf16.msra.mxu0 %v6675_v22 }
 0x247   :  { %4833 = vmatprep.subr.bf16.mxu0 %v6680_v50  ;;  %4875 = vmatpush1.bf16.msra.mxu1 %v6744_v51  ;;  %v3098_v50 = vrot.slane %v7488_v46, %v3097_v35  ;;  %v6771_v35 = vld [vmem:[#allocation7 + $0x188] ss:$16 sps:$4 sm:$0xff]  }
 0x248   :  { %4876 = vmatprep.subr.bf16.mxu1 %v6752_v3  ;;  %v2850_v3 = vadd.f32 %v2849_v31, %v2806_v28  ;;  %v6773_v31 = vld [vmem:[#allocation7 + $0x18c] ss:$16 sps:$4 sm:$0xff]  }
 0x24a   :  { %4834 = vmatpush1.bf16.msra.mxu0 %v6678_v58 }
 0x24b   :  { %4835 = vmatprep.subr.bf16.mxu0 %v6683_v61  ;;  %4877 = vmatpush1.bf16.msra.mxu1 %v6750_v63  ;;  %v2852_v63 = vadd.f32 %v2851_v48, %v2808_v33 }
 0x24c   :  { %4878 = vmatprep.subr.bf16.mxu1 %v6758_v0 }
 0x24e   :  { %4836 = vmatpush2.bf16.msra.mxu0 %v6681_v1 }
 0x24f   :  { %4837 = vmatprep.subr.bf16.mxu0 %v6686_v42  ;;  %4879 = vmatpush2.bf16.msra.mxu1 %v6756_v2 }
 0x250   :  { %4880 = vmatprep.subr.bf16.mxu1 %v6764_v4 }
 0x252   :  { %4838 = vmatpush2.bf16.msra.mxu0 %v6684_v16 }
 0x253   :  { %4839 = vmatprep.subr.bf16.mxu0 %v6689_v13  ;;  %4881 = vmatpush2.bf16.msra.mxu1 %v6762_v36 }
 0x254   :  { %4882 = vmatprep.subr.bf16.mxu1 %v6770_v52 }
 0x256   :  { %4840 = vmatpush2.bf16.msra.mxu0 %v6687_v5 }
 0x257   :  { %4841 = vmatprep.subr.bf16.mxu0 %v6692_v6  ;;  %4883 = vmatpush2.bf16.msra.mxu1 %v6768_v7 }
 0x258   :  { %4884 = vmatprep.subr.bf16.mxu1 %v6776_v57 }
 0x25a   :  { %4842 = vmatpush2.bf16.msra.mxu0 %v6690_v9 }
 0x25b   :  { %4843 = vmatprep.subr.bf16.mxu0 %v6695_v41  ;;  %4885 = vmatpush2.bf16.msra.mxu1 %v6774_v60 }
 0x25c   :  { %4886 = vmatprep.subr.bf16.mxu1 %v6782_v10  ;;  %v6705_v10 = vld [vmem:[#allocation7 + $0xe8] ss:$16 sps:$4 sm:$0xff]  }
 0x25e   :  { %4844 = vmatpush2.bf16.msra.mxu0 %v6693_v53 }
 0x25f   :  { %4845 = vmatprep.subr.bf16.mxu0 %v6698_v11  ;;  %4887 = vmatpush2.bf16.msra.mxu1 %v6780_v14  ;;  %v6713_v11 = vld [vmem:[#allocation7 + $0xcc] ss:$16 sps:$4 sm:$0xff]   ;;  %v6711_v14 = vld [vmem:[#allocation7 + $0xc8] ss:$16 sps:$4 sm:$0xff]  }
 0x260   :  { %4888 = vmatprep.subr.bf16.mxu1 %v6788_v15  ;;  %v6719_v15 = vld [vmem:[#allocation7 + $0xac] ss:$16 sps:$4 sm:$0xff]  }
 0x262   :  { %4846 = vmatpush2.bf16.msra.mxu0 %v6696_v45  ;;  %v6717_v45 = vld [vmem:[#allocation7 + $0xa8] ss:$16 sps:$4 sm:$0xff]  }
 0x263   :  { %4847 = vmatprep.subr.bf16.mxu0 %v6701_v17  ;;  %4889 = vmatpush2.bf16.msra.mxu1 %v6786_v18  ;;  %v6723_v17 = vld [vmem:[#allocation7 + $0x88] ss:$16 sps:$4 sm:$0xff]   ;;  %v6731_v18 = vld [vmem:[#allocation7 + $0x6c] ss:$16 sps:$4 sm:$0xff]  }
 0x264   :  { %4890 = vmatprep.subr.bf16.mxu1 %v6794_v40  ;;  %v6729_v40 = vld [vmem:[#allocation7 + $0x68] ss:$16 sps:$4 sm:$0xff]  }
 0x266   :  { %4848 = vmatpush2.bf16.msra.mxu0 %v6699_v19  ;;  %v6737_v19 = vld [vmem:[#allocation7 + $0x4c] ss:$16 sps:$4 sm:$0xff]  }
 0x267   :  { %4849 = vmatprep.subr.bf16.mxu0 %v6704_v23  ;;  %4891 = vmatpush2.bf16.msra.mxu1 %v6792_v24  ;;  %v6749_v23 = vld [vmem:[#allocation7 + $0xc] ss:$16 sps:$4 sm:$0xff]   ;;  %v6747_v24 = vld [vmem:[#allocation7 + $0x8] ss:$16 sps:$4 sm:$0xff]  }
 0x268   :  { %4892 = vmatprep.subr.bf16.mxu1 %v6800_v25  ;;  %v6755_v25 = vld [vmem:[#allocation7 + $0x1ec] ss:$16 sps:$4 sm:$0xff]  }
 0x26a   :  { %4850 = vmatpush2.bf16.msra.mxu0 %v6702_v26  ;;  %v6753_v26 = vld [vmem:[#allocation7 + $0x1e8] ss:$16 sps:$4 sm:$0xff]  }
 0x26b   :  { %4905 = vmatprep.subr.bf16.mxu0 %v6707_v29  ;;  %4893 = vmatpush2.bf16.msra.mxu1 %v6798_v30  ;;  %v6759_v29 = vld [vmem:[#allocation7 + $0x1c8] ss:$16 sps:$4 sm:$0xff]   ;;  %v6767_v30 = vld [vmem:[#allocation7 + $0x1ac] ss:$16 sps:$4 sm:$0xff]  }
 0x26c   :  { %4948 = vmatprep.subr.bf16.mxu1 %v6806_v34 }
 0x26d   :  { %v2888_v43 = vpop.f32.mrf.mxu0 }
 0x26e   :  { %v2889_v22 = vadd.f32 %v2888_v43, %v2846_v37  ;;  %v2931_v28 = vpop.f32.mrf.mxu1  ;;  %v6779_v37 = vld [vmem:[#allocation7 + $0x16c] ss:$16 sps:$4 sm:$0xff]  }
 0x26f   :  { %v2890_v51 = vpop.f32.mrf.mxu0 }
 0x270   :  { %v2891_v58 = vadd.f32 %v2890_v51, %v2848_v44  ;;  %v3123_v42 = vadd.f32 %v3098_v50, %v2889_v22  ;;  %v2933_v34 = vpop.f32.mrf.mxu1  ;;  %v6777_v44 = vld [vmem:[#allocation7 + $0x168] ss:$16 sps:$4 sm:$0xff]   ;;  %v6785_v22 = vld [vmem:[#allocation7 + $0x14c] ss:$16 sps:$4 sm:$0xff]  }
 0x271   :  { %v2892_v61 = vpop.f32.mrf.mxu0 }
 0x272   :  { %v3124_v0 = vadd.f32 %v3102_v47, %v2891_v58  ;;  %v2893_v1 = vadd.f32 %v2892_v61, %v2850_v3  ;;  %v3139_v5 = vmul.f32 0.2, %v3123_v42  ;;  %v2935_v33 = vpop.f32.mrf.mxu1  ;;  %v3105_v3 = vsub.s32 6, %v7411_v12 }
 0x273   :  { %v2894_v2 = vpop.f32.mrf.mxu0 }
 0x274   :  { %v3131_v4 = vadd.f32 %v3098_v50, %v2893_v1  ;;  %v2895_v16 = vadd.f32 %v2894_v2, %v2852_v63  ;;  %v3140_v13 = vmul.f32 0.2, %v3124_v0  ;;  %v3155_v41 = vmax.f32 %v3123_v42, %v3139_v5  ;;  %v2937_v43 = vpop.f32.mrf.mxu1  ;;  %v6783_v1 = vld [vmem:[#allocation7 + $0x148] ss:$16 sps:$4 sm:$0xff]   ;;  %v6791_v2 = vld [vmem:[#allocation7 + $0x12c] ss:$16 sps:$4 sm:$0xff]  }
 0x276   :  { %v3147_v36 = vmul.f32 0.2, %v3131_v4  ;;  %v3132_v52 = vadd.f32 %v3102_v47, %v2895_v16  ;;  %v3156_v57 = vmax.f32 %v3124_v0, %v3140_v13  ;;  %v3109_v47 = vsub.s32 7, %v7411_v12 }
 0x277   :  { %v3106_v16 = vrot.slane %v7488_v46, %v3105_v3  ;;  %v6839_v3 = vld [vmem:[#allocation7 + $0x42c] ss:$16 sps:$4 sm:$0xff]  }
 0x278   :  { %v3148_v6 = vmul.f32 0.2, %v3132_v52  ;;  %v3163_v7 = vmax.f32 %v3131_v4, %v3147_v36  ;;  %v3110_v0 = vrot.slane %v7488_v46, %v3109_v47  ;;  %v6795_v46 = vld [vmem:[#allocation7 + $0x108] ss:$16 sps:$4 sm:$0xff]   ;;  %v6830_v47 = vld [vmem:[#allocation7 + $0x26c] ss:$16 sps:$4 sm:$0xff]  }
 0x27a   :  { %v3164_v9 = vmax.f32 %v3132_v52, %v3148_v6  ;;  %v7494_v53 = vpack.c.bf16 %v3163_v7, %v3155_v41 }
 0x27c   :  { %v7492_v60 = vpack.c.bf16 %v3164_v9, %v3156_v57  ;;  %v6789_v9 = vld [vmem:[#allocation7 + $0x128] ss:$16 sps:$4 sm:$0xff]  }
 0x27e   :  { %4851 = vmatprep.mubr.bf16.mxu0 %v7492_v60 }
 0x27f   :  { %4852 = vmatmul.mubr.bf16.vlgmr.msra.gmra.mxu0 %v7494_v53 }
 0x280   :  { %4906 = vmatpush1.bf16.msra.mxu0 %v6705_v10  ;;  %4937 = vmatprep.mubr.bf16.mxu0 %v7456_v38  ;;  %v6741_v38 = vld [vmem:[#allocation7 + $0x28] ss:$16 sps:$4 sm:$0xff]   ;;  %v6797_v10 = vld [vmem:[#allocation7 + $0x10c] ss:$16 sps:$4 sm:$0xff]  }
 0x281   :  { %4907 = vmatprep.subr.bf16.mxu0 %v6713_v11 }
 0x284   :  { %4908 = vmatpush1.bf16.msra.mxu0 %v6711_v14 }
 0x285   :  { %4909 = vmatprep.subr.bf16.mxu0 %v6719_v15 }
 0x288   :  { %4910 = vmatpush1.bf16.msra.mxu0 %v6717_v45 }
 0x289   :  { %4911 = vmatprep.subr.bf16.mxu0 %v6725_v59 }
 0x28c   :  { %4912 = vmatpush1.bf16.msra.mxu0 %v6723_v17 }
 0x28d   :  { %4913 = vmatprep.subr.bf16.mxu0 %v6731_v18  ;;  %v6803_v18 = vld [vmem:[#allocation7 + $0x4ec] ss:$16 sps:$4 sm:$0xff]  }
 0x290   :  { %4914 = vmatpush1.bf16.msra.mxu0 %v6729_v40 }
 0x291   :  { %4915 = vmatprep.subr.bf16.mxu0 %v6737_v19 }
 0x294   :  { %4916 = vmatpush1.bf16.msra.mxu0 %v6735_v20 }
 0x295   :  { %4917 = vmatprep.subr.bf16.mxu0 %v6743_v21 }
 0x298   :  { %4918 = vmatpush1.bf16.msra.mxu0 %v6741_v38 }
 0x299   :  { %4919 = vmatprep.subr.bf16.mxu0 %v6749_v23  ;;  %v6801_v23 = vld [vmem:[#allocation7 + $0x4e8] ss:$16 sps:$4 sm:$0xff]  }
 0x29c   :  { %4920 = vmatpush1.bf16.msra.mxu0 %v6747_v24  ;;  %v6809_v24 = vld [vmem:[#allocation7 + $0x4cc] ss:$16 sps:$4 sm:$0xff]  }
 0x29d   :  { %4921 = vmatprep.subr.bf16.mxu0 %v6755_v25 }
 0x2a0   :  { %4922 = vmatpush2.bf16.msra.mxu0 %v6753_v26 }
 0x2a1   :  { %4923 = vmatprep.subr.bf16.mxu0 %v6761_v27  ;;  %v6804_v27 = vld [vmem:[#allocation7 + $0x2e8] ss:$16 sps:$4 sm:$0xff]  }
 0x2a4   :  { %4924 = vmatpush2.bf16.msra.mxu0 %v6759_v29  ;;  %v6807_v29 = vld [vmem:[#allocation7 + $0x4c8] ss:$16 sps:$4 sm:$0xff]  }
 0x2a5   :  { %4925 = vmatprep.subr.bf16.mxu0 %v6767_v30  ;;  %v6812_v30 = vld [vmem:[#allocation7 + $0x2cc] ss:$16 sps:$4 sm:$0xff]  }
 0x2a8   :  { %4926 = vmatpush2.bf16.msra.mxu0 %v6765_v55  ;;  %v6810_v55 = vld [vmem:[#allocation7 + $0x2c8] ss:$16 sps:$4 sm:$0xff]  }
 0x2a9   :  { %4927 = vmatprep.subr.bf16.mxu0 %v6773_v31  ;;  %v6818_v31 = vld [vmem:[#allocation7 + $0x2ac] ss:$16 sps:$4 sm:$0xff]  }
 0x2ac   :  { %4928 = vmatpush2.bf16.msra.mxu0 %v6771_v35  ;;  %v6819_v35 = vld [vmem:[#allocation7 + $0x488] ss:$16 sps:$4 sm:$0xff]  }
 0x2ad   :  { %v2974_v48 = vpop.f32.mrf.mxu0  ;;  %4929 = vmatprep.subr.bf16.mxu0 %v6779_v37  ;;  %v6824_v37 = vld [vmem:[#allocation7 + $0x28c] ss:$16 sps:$4 sm:$0xff]  }
 0x2ae   :  { %v2975_v50 = vadd.f32 %v2974_v48, %v2931_v28  ;;  %v3017_v51 = vpop.f32.mrf.mxu1  ;;  %v6833_v48 = vld [vmem:[#allocation7 + $0x44c] ss:$16 sps:$4 sm:$0xff]  }
 0x2af   :  { %v2976_v58 = vpop.f32.mrf.mxu0 }
 0x2b0   :  { %v2977_v61 = vadd.f32 %v2976_v58, %v2933_v34  ;;  %v3019_v63 = vpop.f32.mrf.mxu1  ;;  %4930 = vmatpush2.bf16.msra.mxu0 %v6777_v44  ;;  %v3018_v4 = vadd.f32 %v3017_v51, %v2975_v50  ;;  %v6815_v34 = vld [vmem:[#allocation7 + $0x4ac] ss:$16 sps:$4 sm:$0xff]   ;;  %v6822_v44 = vld [vmem:[#allocation7 + $0x288] ss:$16 sps:$4 sm:$0xff]  }
 0x2b1   :  { %v2978_v42 = vpop.f32.mrf.mxu0  ;;  %4931 = vmatprep.subr.bf16.mxu0 %v6785_v22  ;;  %v6828_v22 = vld [vmem:[#allocation7 + $0x268] ss:$16 sps:$4 sm:$0xff]   ;;  %v6836_v51 = vld [vmem:[#allocation7 + $0x24c] ss:$16 sps:$4 sm:$0xff]  }
 0x2b2   :  { %v3020_v13 = vadd.f32 %v3019_v63, %v2977_v61  ;;  %v2979_v36 = vadd.f32 %v2978_v42, %v2935_v33  ;;  %v3021_v52 = vpop.f32.mrf.mxu1  ;;  %v3125_v11 = vadd.f32 %v3106_v16, %v3018_v4  ;;  %v6821_v33 = vld [vmem:[#allocation7 + $0x48c] ss:$16 sps:$4 sm:$0xff]   ;;  %v6831_v50 = vld [vmem:[#allocation7 + $0x448] ss:$16 sps:$4 sm:$0xff]  }
 0x2b3   :  { %v2980_v5 = vpop.f32.mrf.mxu0  ;;  %v6834_v58 = vld [vmem:[#allocation7 + $0x248] ss:$16 sps:$4 sm:$0xff]   ;;  %v6842_v63 = vld [vmem:[#allocation7 + $0x22c] ss:$16 sps:$4 sm:$0xff]  }
 0x2b4   :  { %v3126_v6 = vadd.f32 %v3110_v0, %v3020_v13  ;;  %v3022_v7 = vadd.f32 %v3021_v52, %v2979_v36  ;;  %v2981_v57 = vadd.f32 %v2980_v5, %v2937_v43  ;;  %4932 = vmatpush2.bf16.msra.mxu0 %v6783_v1  ;;  %v3023_v41 = vpop.f32.mrf.mxu1  ;;  %v3141_v40 = vmul.f32 0.2, %v3125_v11  ;;  %v6827_v43 = vld [vmem:[#allocation7 + $0x46c] ss:$16 sps:$4 sm:$0xff]   ;;  %v6837_v61 = vld [vmem:[#allocation7 + $0x428] ss:$16 sps:$4 sm:$0xff]  }
 0x2b5   :  { %4933 = vmatprep.subr.bf16.mxu0 %v6791_v2  ;;  %v6840_v1 = vld [vmem:[#allocation7 + $0x228] ss:$16 sps:$4 sm:$0xff]   ;;  %v6848_v2 = vld [vmem:[#allocation7 + $0x20c] ss:$16 sps:$4 sm:$0xff]  }
 0x2b6   :  { %v3133_v14 = vadd.f32 %v3106_v16, %v3022_v7  ;;  %v3024_v15 = vadd.f32 %v3023_v41, %v2981_v57  ;;  %v3142_v45 = vmul.f32 0.2, %v3126_v6  ;;  %v3157_v25 = vmax.f32 %v3125_v11, %v3141_v40  ;;  %v6843_v42 = vld [vmem:[#allocation7 + $0x408] ss:$16 sps:$4 sm:$0xff]   ;;  %v6851_v4 = vld [vmem:[#allocation7 + $0x5ec] ss:$16 sps:$4 sm:$0xff]  }
 0x2b7   :  { %v6846_v16 = vld [vmem:[#allocation7 + $0x208] ss:$16 sps:$4 sm:$0xff]   ;;  %v6854_v36 = vld [vmem:[#allocation7 + $0x3ec] ss:$16 sps:$4 sm:$0xff]  }
 0x2b8   :  { %v3149_v59 = vmul.f32 0.2, %v3133_v14  ;;  %v3134_v17 = vadd.f32 %v3110_v0, %v3024_v15  ;;  %4934 = vmatpush2.bf16.msra.mxu0 %v6789_v9  ;;  %v3158_v20 = vmax.f32 %v3126_v6, %v3142_v45  ;;  %v6845_v0 = vld [vmem:[#allocation7 + $0x40c] ss:$16 sps:$4 sm:$0xff]   ;;  %v6849_v13 = vld [vmem:[#allocation7 + $0x5e8] ss:$16 sps:$4 sm:$0xff]  }
 0x2b9   :  { %4935 = vmatprep.subr.bf16.mxu0 %v6797_v10  ;;  %v6857_v52 = vld [vmem:[#allocation7 + $0x5cc] ss:$16 sps:$4 sm:$0xff]   ;;  %v6852_v5 = vld [vmem:[#allocation7 + $0x3e8] ss:$16 sps:$4 sm:$0xff]  }
 0x2ba   :  { %v3150_v19 = vmul.f32 0.2, %v3134_v17  ;;  %v3165_v21 = vmax.f32 %v3133_v14, %v3149_v59  ;;  %v6855_v6 = vld [vmem:[#allocation7 + $0x5c8] ss:$16 sps:$4 sm:$0xff]   ;;  %v6860_v7 = vld [vmem:[#allocation7 + $0x3cc] ss:$16 sps:$4 sm:$0xff]  }
 0x2bb   :  { %v6863_v57 = vld [vmem:[#allocation7 + $0x5ac] ss:$16 sps:$4 sm:$0xff]   ;;  %v6858_v9 = vld [vmem:[#allocation7 + $0x3c8] ss:$16 sps:$4 sm:$0xff]  }
 0x2bc   :  { %v3166_v38 = vmax.f32 %v3134_v17, %v3150_v19  ;;  %4936 = vmatpush2.bf16.msra.mxu0 %v6795_v46  ;;  %v7506_v28 = vpack.c.bf16 %v3165_v21, %v3157_v25  ;;  %v6861_v41 = vld [vmem:[#allocation7 + $0x5a8] ss:$16 sps:$4 sm:$0xff]   ;;  %v6866_v10 = vld [vmem:[#allocation7 + $0x3ac] ss:$16 sps:$4 sm:$0xff]  }
 0x2bd   :  { %4991 = vmatprep.subr.bf16.mxu0 %v6803_v18  ;;  %v6869_v11 = vld [vmem:[#allocation7 + $0x58c] ss:$16 sps:$4 sm:$0xff]   ;;  %v6864_v14 = vld [vmem:[#allocation7 + $0x3a8] ss:$16 sps:$4 sm:$0xff]  }
 0x2be   :  { %v7503_v26 = vpack.c.bf16 %v3166_v38, %v3158_v20  ;;  %v6867_v15 = vld [vmem:[#allocation7 + $0x588] ss:$16 sps:$4 sm:$0xff]   ;;  %v6872_v45 = vld [vmem:[#allocation7 + $0x38c] ss:$16 sps:$4 sm:$0xff]  }
 0x2bf   :  { %4938 = vmatmul.mubr.bf16.vlgmr.msra.gmra.mxu0 %v7435_v39  ;;  %v6813_v39 = vld [vmem:[#allocation7 + $0x4a8] ss:$16 sps:$4 sm:$0xff]   ;;  %v6875_v59 = vld [vmem:[#allocation7 + $0x56c] ss:$16 sps:$4 sm:$0xff]  }
 0x2c0   :  { %4992 = vmatpush1.bf16.msra.mxu0 %v6801_v23  ;;  %5023 = vmatprep.mubr.bf16.mxu0 %v7492_v60  ;;  %v6816_v60 = vld [vmem:[#allocation7 + $0x2a8] ss:$16 sps:$4 sm:$0xff]   ;;  %v6878_v18 = vld [vmem:[#allocation7 + $0x36c] ss:$16 sps:$4 sm:$0xff]  }
 0x2c1   :  { %4894 = vmatprep.mubr.bf16.mxu1 %v7503_v26  ;;  %4993 = vmatprep.subr.bf16.mxu0 %v6809_v24  ;;  %v6870_v17 = vld [vmem:[#allocation7 + $0x388] ss:$16 sps:$4 sm:$0xff]   ;;  %v6881_v40 = vld [vmem:[#allocation7 + $0x54c] ss:$16 sps:$4 sm:$0xff]  }
 0x2c2   :  { %4895 = vmatmul.mubr.bf16.vlgmr.msra.gmra.mxu1 %v7506_v28  ;;  %v6873_v46 = vld [vmem:[#allocation7 + $0x568] ss:$16 sps:$4 sm:$0xff]   ;;  %v6884_v21 = vld [vmem:[#allocation7 + $0x34c] ss:$16 sps:$4 sm:$0xff]  }
 0x2c3   :  { %4949 = vmatpush1.bf16.msra.mxu1 %v6804_v27  ;;  %4980 = vmatprep.mubr.bf16.mxu1 %v7469_v56  ;;  %v6825_v56 = vld [vmem:[#allocation7 + $0x468] ss:$16 sps:$4 sm:$0xff]   ;;  %v6887_v38 = vld [vmem:[#allocation7 + $0x52c] ss:$16 sps:$4 sm:$0xff]  }
 0x2c4   :  { %4994 = vmatpush1.bf16.msra.mxu0 %v6807_v29  ;;  %4950 = vmatprep.subr.bf16.mxu1 %v6812_v30  ;;  %v6876_v19 = vld [vmem:[#allocation7 + $0x368] ss:$16 sps:$4 sm:$0xff]   ;;  %v6890_v25 = vld [vmem:[#allocation7 + $0x32c] ss:$16 sps:$4 sm:$0xff]  }
 0x2c5   :  { %4995 = vmatprep.subr.bf16.mxu0 %v6815_v34  ;;  %v6879_v20 = vld [vmem:[#allocation7 + $0x548] ss:$16 sps:$4 sm:$0xff]   ;;  %v6893_v27 = vld [vmem:[#allocation7 + $0x50c] ss:$16 sps:$4 sm:$0xff]  }
 0x2c6   :  { %v6882_v23 = vld [vmem:[#allocation7 + $0x348] ss:$16 sps:$4 sm:$0xff]   ;;  %v6896_v34 = vld [vmem:[#allocation7 + $0x30c] ss:$16 sps:$4 sm:$0xff]  }
 0x2c7   :  { %4951 = vmatpush1.bf16.msra.mxu1 %v6810_v55  ;;  %v6885_v24 = vld [vmem:[#allocation7 + $0x528] ss:$16 sps:$4 sm:$0xff]  }
 0x2c8   :  { %4996 = vmatpush1.bf16.msra.mxu0 %v6813_v39  ;;  %4952 = vmatprep.subr.bf16.mxu1 %v6818_v31  ;;  %v6888_v29 = vld [vmem:[#allocation7 + $0x328] ss:$16 sps:$4 sm:$0xff]   ;;  %v6899_v31 = vld [vmem:[#allocation7 + $0x6ec] ss:$16 sps:$4 sm:$0xff]  }
 0x2c9   :  { %4997 = vmatprep.subr.bf16.mxu0 %v6821_v33  ;;  %v6891_v30 = vld [vmem:[#allocation7 + $0x508] ss:$16 sps:$4 sm:$0xff]   ;;  %v6945_v33 = vld [vmem:[#allocation10 + $0x70] ss:$8 sps:$4 sm:$0xff]  }
 0x2ca   :  { %v6947_v55 = vld [vmem:[#allocation10 + $0x74] ss:$8 sps:$4 sm:$0xff]  }
 0x2cb   :  { %4953 = vmatpush1.bf16.msra.mxu1 %v6816_v60  ;;  %v6894_v39 = vld [vmem:[#allocation7 + $0x308] ss:$16 sps:$4 sm:$0xff]  }
 0x2cc   :  { %4998 = vmatpush1.bf16.msra.mxu0 %v6819_v35  ;;  %4954 = vmatprep.subr.bf16.mxu1 %v6824_v37  ;;  %v6950_v60 = vld [vmem:[#allocation10 + $0x64] ss:$8 sps:$4 sm:$0xff]   ;;  %v6902_v37 = vld [vmem:[#allocation7 + $0x6cc] ss:$16 sps:$4 sm:$0xff]  }
 0x2cd   :  { %4999 = vmatprep.subr.bf16.mxu0 %v6827_v43  ;;  %v6897_v35 = vld [vmem:[#allocation7 + $0x6e8] ss:$16 sps:$4 sm:$0xff]   ;;  %v6948_v43 = vld [vmem:[#allocation10 + $0x60] ss:$8 sps:$4 sm:$0xff]  }
 0x2cf   :  { %4955 = vmatpush1.bf16.msra.mxu1 %v6822_v44  ;;  %v6953_v44 = vld [vmem:[#allocation10 + $0x54] ss:$8 sps:$4 sm:$0xff]  }
 0x2d0   :  { %5000 = vmatpush1.bf16.msra.mxu0 %v6825_v56  ;;  %4956 = vmatprep.subr.bf16.mxu1 %v6830_v47  ;;  %v6900_v56 = vld [vmem:[#allocation7 + $0x6c8] ss:$16 sps:$4 sm:$0xff]   ;;  %v6905_v47 = vld [vmem:[#allocation7 + $0x6ac] ss:$16 sps:$4 sm:$0xff]  }
 0x2d1   :  { %5001 = vmatprep.subr.bf16.mxu0 %v6833_v48  ;;  %v6951_v48 = vld [vmem:[#allocation10 + $0x50] ss:$8 sps:$4 sm:$0xff]  }
 0x2d3   :  { %4957 = vmatpush1.bf16.msra.mxu1 %v6828_v22  ;;  %v6956_v22 = vld [vmem:[#allocation10 + $0x44] ss:$8 sps:$4 sm:$0xff]  }
 0x2d4   :  { %5002 = vmatpush1.bf16.msra.mxu0 %v6831_v50  ;;  %4958 = vmatprep.subr.bf16.mxu1 %v6836_v51  ;;  %v6908_v50 = vld [vmem:[#allocation7 + $0x68c] ss:$16 sps:$4 sm:$0xff]  }
 0x2d5   :  { %5003 = vmatprep.subr.bf16.mxu0 %v6839_v3  ;;  %v6954_v51 = vld [vmem:[#allocation10 + $0x40] ss:$8 sps:$4 sm:$0xff]   ;;  %v6959_v3 = vld [vmem:[#allocation10 + $0x34] ss:$8 sps:$4 sm:$0xff]  }
 0x2d7   :  { %4959 = vmatpush1.bf16.msra.mxu1 %v6834_v58  ;;  %v6911_v58 = vld [vmem:[#allocation7 + $0x66c] ss:$16 sps:$4 sm:$0xff]  }
 0x2d8   :  { %5004 = vmatpush1.bf16.msra.mxu0 %v6837_v61  ;;  %4960 = vmatprep.subr.bf16.mxu1 %v6842_v63  ;;  %v6962_v61 = vld [vmem:[#allocation10 + $0x24] ss:$8 sps:$4 sm:$0xff]  }
 0x2d9   :  { %5005 = vmatprep.subr.bf16.mxu0 %v6845_v0  ;;  %v6909_v63 = vld [vmem:[#allocation7 + $0x668] ss:$16 sps:$4 sm:$0xff]   ;;  %v6914_v0 = vld [vmem:[#allocation7 + $0x64c] ss:$16 sps:$4 sm:$0xff]  }
 0x2db   :  { %4961 = vmatpush1.bf16.msra.mxu1 %v6840_v1  ;;  %v6960_v1 = vld [vmem:[#allocation10 + $0x20] ss:$8 sps:$4 sm:$0xff]  }
 0x2dc   :  { %5006 = vmatpush1.bf16.msra.mxu0 %v6843_v42  ;;  %4962 = vmatprep.subr.bf16.mxu1 %v6848_v2  ;;  %v6965_v42 = vld [vmem:[#allocation10 + $0x14] ss:$8 sps:$4 sm:$0xff]  }
 0x2dd   :  { %5007 = vmatprep.subr.bf16.mxu0 %v6851_v4  ;;  %v6912_v2 = vld [vmem:[#allocation7 + $0x648] ss:$16 sps:$4 sm:$0xff]   ;;  %v6917_v4 = vld [vmem:[#allocation7 + $0x62c] ss:$16 sps:$4 sm:$0xff]  }
 0x2df   :  { %4963 = vmatpush1.bf16.msra.mxu1 %v6846_v16  ;;  %v6963_v16 = vld [vmem:[#allocation10 + $0x10] ss:$8 sps:$4 sm:$0xff]  }
 0x2e0   :  { %5008 = vmatpush2.bf16.msra.mxu0 %v6849_v13  ;;  %4964 = vmatprep.subr.bf16.mxu1 %v6854_v36  ;;  %v6968_v13 = vld [vmem:[#allocation10 + $0x4] ss:$8 sps:$4 sm:$0xff]  }
 0x2e1   :  { %5009 = vmatprep.subr.bf16.mxu0 %v6857_v52  ;;  %v6915_v36 = vld [vmem:[#allocation7 + $0x628] ss:$16 sps:$4 sm:$0xff]   ;;  %v6920_v52 = vld [vmem:[#allocation7 + $0x60c] ss:$16 sps:$4 sm:$0xff]  }
 0x2e3   :  { %4965 = vmatpush2.bf16.msra.mxu1 %v6852_v5  ;;  %v6966_v5 = vld [vmem:[#allocation10] ss:$8 sps:$4 sm:$0xff]  }
 0x2e4   :  { %5010 = vmatpush2.bf16.msra.mxu0 %v6855_v6  ;;  %4966 = vmatprep.subr.bf16.mxu1 %v6860_v7  ;;  %v6971_v6 = vld [vmem:[#allocation10 + $0xf4] ss:$8 sps:$4 sm:$0xff]  }
 0x2e5   :  { %5011 = vmatprep.subr.bf16.mxu0 %v6863_v57  ;;  %v6918_v7 = vld [vmem:[#allocation7 + $0x608] ss:$16 sps:$4 sm:$0xff]   ;;  %v6923_v57 = vld [vmem:[#allocation7 + $0x7ec] ss:$16 sps:$4 sm:$0xff]  }
 0x2e7   :  { %4967 = vmatpush2.bf16.msra.mxu1 %v6858_v9  ;;  %v6969_v9 = vld [vmem:[#allocation10 + $0xf0] ss:$8 sps:$4 sm:$0xff]  }
 0x2e8   :  { %5012 = vmatpush2.bf16.msra.mxu0 %v6861_v41  ;;  %4968 = vmatprep.subr.bf16.mxu1 %v6866_v10  ;;  %v6974_v41 = vld [vmem:[#allocation10 + $0xe4] ss:$8 sps:$4 sm:$0xff]  }
 0x2e9   :  { %5013 = vmatprep.subr.bf16.mxu0 %v6869_v11  ;;  %v6921_v10 = vld [vmem:[#allocation7 + $0x7e8] ss:$16 sps:$4 sm:$0xff]   ;;  %v6926_v11 = vld [vmem:[#allocation7 + $0x7cc] ss:$16 sps:$4 sm:$0xff]  }
 0x2eb   :  { %4969 = vmatpush2.bf16.msra.mxu1 %v6864_v14  ;;  %v6972_v14 = vld [vmem:[#allocation10 + $0xe0] ss:$8 sps:$4 sm:$0xff]  }
 0x2ec   :  { %5014 = vmatpush2.bf16.msra.mxu0 %v6867_v15  ;;  %4970 = vmatprep.subr.bf16.mxu1 %v6872_v45  ;;  %v6977_v15 = vld [vmem:[#allocation10 + $0xd4] ss:$8 sps:$4 sm:$0xff]  }
 0x2ed   :  { %5015 = vmatprep.subr.bf16.mxu0 %v6875_v59  ;;  %v6924_v45 = vld [vmem:[#allocation7 + $0x7c8] ss:$16 sps:$4 sm:$0xff]   ;;  %v6929_v59 = vld [vmem:[#allocation7 + $0x7ac] ss:$16 sps:$4 sm:$0xff]  }
 0x2ef   :  { %4971 = vmatpush2.bf16.msra.mxu1 %v6870_v17  ;;  %v6975_v17 = vld [vmem:[#allocation10 + $0xd0] ss:$8 sps:$4 sm:$0xff]  }
 0x2f0   :  { %5016 = vmatpush2.bf16.msra.mxu0 %v6873_v46  ;;  %4972 = vmatprep.subr.bf16.mxu1 %v6878_v18  ;;  %v6980_v46 = vld [vmem:[#allocation10 + $0xc4] ss:$8 sps:$4 sm:$0xff]  }
 0x2f1   :  { %5017 = vmatprep.subr.bf16.mxu0 %v6881_v40  ;;  %v6927_v18 = vld [vmem:[#allocation7 + $0x7a8] ss:$16 sps:$4 sm:$0xff]   ;;  %v6932_v40 = vld [vmem:[#allocation7 + $0x78c] ss:$16 sps:$4 sm:$0xff]  }
 0x2f3   :  { %4973 = vmatpush2.bf16.msra.mxu1 %v6876_v19  ;;  %v6978_v19 = vld [vmem:[#allocation10 + $0xc0] ss:$8 sps:$4 sm:$0xff]  }
 0x2f4   :  { %5018 = vmatpush2.bf16.msra.mxu0 %v6879_v20  ;;  %4974 = vmatprep.subr.bf16.mxu1 %v6884_v21  ;;  %v6983_v20 = vld [vmem:[#allocation10 + $0xb4] ss:$8 sps:$4 sm:$0xff]  }
 0x2f5   :  { %5019 = vmatprep.subr.bf16.mxu0 %v6887_v38  ;;  %v6930_v21 = vld [vmem:[#allocation7 + $0x788] ss:$16 sps:$4 sm:$0xff]   ;;  %v6935_v38 = vld [vmem:[#allocation7 + $0x76c] ss:$16 sps:$4 sm:$0xff]  }
 0x2f7   :  { %4975 = vmatpush2.bf16.msra.mxu1 %v6882_v23  ;;  %v6981_v23 = vld [vmem:[#allocation10 + $0xb0] ss:$8 sps:$4 sm:$0xff]  }
 0x2f8   :  { %5020 = vmatpush2.bf16.msra.mxu0 %v6885_v24  ;;  %4976 = vmatprep.subr.bf16.mxu1 %v6890_v25  ;;  %v6986_v24 = vld [vmem:[#allocation10 + $0xa4] ss:$8 sps:$4 sm:$0xff]  }
 0x2f9   :  { %5021 = vmatprep.subr.bf16.mxu0 %v6893_v27  ;;  %v6933_v25 = vld [vmem:[#allocation7 + $0x768] ss:$16 sps:$4 sm:$0xff]   ;;  %v6938_v27 = vld [vmem:[#allocation7 + $0x74c] ss:$16 sps:$4 sm:$0xff]  }
 0x2fb   :  { %4977 = vmatpush2.bf16.msra.mxu1 %v6888_v29  ;;  %v6984_v29 = vld [vmem:[#allocation10 + $0xa0] ss:$8 sps:$4 sm:$0xff]  }
 0x2fc   :  { %5022 = vmatpush2.bf16.msra.mxu0 %v6891_v30  ;;  %4978 = vmatprep.subr.bf16.mxu1 %v6896_v34  ;;  %v6989_v30 = vld [vmem:[#allocation10 + $0x94] ss:$8 sps:$4 sm:$0xff]  }
 0x2fd   :  { %5493 = vmatprep.subr.bf16.mxu0 %v6947_v55  ;;  %v6936_v34 = vld [vmem:[#allocation7 + $0x748] ss:$16 sps:$4 sm:$0xff]   ;;  %v6941_v55 = vld [vmem:[#allocation7 + $0x72c] ss:$16 sps:$4 sm:$0xff]  }
 0x2ff   :  { %4979 = vmatpush2.bf16.msra.mxu1 %v6894_v39  ;;  %5024 = vmatmul.mubr.bf16.vlgmr.msra.gmra.mxu0 %v7494_v53  ;;  %v6903_v53 = vld [vmem:[#allocation7 + $0x6a8] ss:$16 sps:$4 sm:$0xff]   ;;  %v6987_v39 = vld [vmem:[#allocation10 + $0x90] ss:$8 sps:$4 sm:$0xff]  }
 0x300   :  { %5034 = vmatprep.subr.bf16.mxu1 %v6899_v31  ;;  %5494 = vmatpush1.bf16.msra.mxu0 %v6945_v33  ;;  %v6992_v31 = vld [vmem:[#allocation10 + $0x84] ss:$8 sps:$4 sm:$0xff]  }
 0x301   :  { %5495 = vmatprep.subr.bf16.mxu0 %v6950_v60  ;;  %v6939_v33 = vld [vmem:[#allocation7 + $0x728] ss:$16 sps:$4 sm:$0xff]   ;;  %v6944_v60 = vld [vmem:[#allocation7 + $0x70c] ss:$16 sps:$4 sm:$0xff]  }
 0x302   :  { %4981 = vmatmul.mubr.bf16.vlgmr.msra.gmra.mxu1 %v7482_v8  ;;  %v6906_v8 = vld [vmem:[#allocation7 + $0x688] ss:$16 sps:$4 sm:$0xff]  }
 0x303   :  { %5035 = vmatpush1.bf16.msra.mxu1 %v6897_v35  ;;  %5066 = vmatprep.mubr.bf16.mxu1 %v7503_v26  ;;  %v6957_v26 = vld [vmem:[#allocation10 + $0x30] ss:$8 sps:$4 sm:$0xff]   ;;  %v6990_v35 = vld [vmem:[#allocation10 + $0x80] ss:$8 sps:$4 sm:$0xff]  }
 0x304   :  { %5036 = vmatprep.subr.bf16.mxu1 %v6902_v37  ;;  %5496 = vmatpush1.bf16.msra.mxu0 %v6948_v43  ;;  %v6942_v37 = vld [vmem:[#allocation7 + $0x708] ss:$16 sps:$4 sm:$0xff]   ;;  %v6993_v43 = vld [vmem:[#allocation10 + $0x170] ss:$8 sps:$4 sm:$0xff]  }
 0x305   :  { %5497 = vmatprep.subr.bf16.mxu0 %v6953_v44  ;;  %v6995_v44 = vld [vmem:[#allocation10 + $0x174] ss:$8 sps:$4 sm:$0xff]  }
 0x307   :  { %5037 = vmatpush1.bf16.msra.mxu1 %v6900_v56  ;;  %v6998_v56 = vld [vmem:[#allocation10 + $0x164] ss:$8 sps:$4 sm:$0xff]  }
 0x308   :  { %5038 = vmatprep.subr.bf16.mxu1 %v6905_v47  ;;  %5498 = vmatpush1.bf16.msra.mxu0 %v6951_v48  ;;  %v6996_v47 = vld [vmem:[#allocation10 + $0x160] ss:$8 sps:$4 sm:$0xff]   ;;  %v7001_v48 = vld [vmem:[#allocation10 + $0x154] ss:$8 sps:$4 sm:$0xff]  }
 0x309   :  { %5499 = vmatprep.subr.bf16.mxu0 %v6956_v22  ;;  %v6999_v22 = vld [vmem:[#allocation10 + $0x150] ss:$8 sps:$4 sm:$0xff]  }
 0x30b   :  { %5039 = vmatpush1.bf16.msra.mxu1 %v6903_v53  ;;  %v7004_v53 = vld [vmem:[#allocation10 + $0x144] ss:$8 sps:$4 sm:$0xff]  }
 0x30c   :  { %5040 = vmatprep.subr.bf16.mxu1 %v6908_v50  ;;  %5500 = vmatpush1.bf16.msra.mxu0 %v6954_v51  ;;  %v7002_v50 = vld [vmem:[#allocation10 + $0x140] ss:$8 sps:$4 sm:$0xff]   ;;  %v7007_v51 = vld [vmem:[#allocation10 + $0x134] ss:$8 sps:$4 sm:$0xff]  }
 0x30d   :  { %5501 = vmatprep.subr.bf16.mxu0 %v6959_v3  ;;  %v7005_v3 = vld [vmem:[#allocation10 + $0x130] ss:$8 sps:$4 sm:$0xff]  }
 0x30f   :  { %5041 = vmatpush1.bf16.msra.mxu1 %v6906_v8  ;;  %v7008_v8 = vld [vmem:[#allocation10 + $0x120] ss:$8 sps:$4 sm:$0xff]  }
 0x310   :  { %5042 = vmatprep.subr.bf16.mxu1 %v6911_v58  ;;  %5502 = vmatpush1.bf16.msra.mxu0 %v6957_v26  ;;  %v7013_v58 = vld [vmem:[#allocation10 + $0x114] ss:$8 sps:$4 sm:$0xff]   ;;  %v7011_v26 = vld [vmem:[#allocation10 + $0x110] ss:$8 sps:$4 sm:$0xff]  }
 0x311   :  { %5503 = vmatprep.subr.bf16.mxu0 %v6962_v61  ;;  %v7016_v61 = vld [vmem:[#allocation10 + $0x104] ss:$8 sps:$4 sm:$0xff]  }
 0x313   :  { %5043 = vmatpush1.bf16.msra.mxu1 %v6909_v63  ;;  %v7014_v63 = vld [vmem:[#allocation10 + $0x100] ss:$8 sps:$4 sm:$0xff]  }
 0x314   :  { %5044 = vmatprep.subr.bf16.mxu1 %v6914_v0  ;;  %5504 = vmatpush1.bf16.msra.mxu0 %v6960_v1  ;;  %v7019_v0 = vld [vmem:[#allocation10 + $0x1f4] ss:$8 sps:$4 sm:$0xff]   ;;  %v7017_v1 = vld [vmem:[#allocation10 + $0x1f0] ss:$8 sps:$4 sm:$0xff]  }
 0x315   :  { %5505 = vmatprep.subr.bf16.mxu0 %v6965_v42  ;;  %v7022_v42 = vld [vmem:[#allocation10 + $0x1e4] ss:$8 sps:$4 sm:$0xff]  }
 0x317   :  { %5045 = vmatpush1.bf16.msra.mxu1 %v6912_v2  ;;  %v4767_v2 = vpop.f32.mrf.mxu0 }
 0x318   :  { %5046 = vmatprep.subr.bf16.mxu1 %v6917_v4  ;;  %5506 = vmatpush1.bf16.msra.mxu0 %v6963_v16  ;;  %v7020_v4 = vld [vmem:[#allocation10 + $0x1e0] ss:$8 sps:$4 sm:$0xff]   ;;  %v7025_v16 = vld [vmem:[#allocation10 + $0x1d4] ss:$8 sps:$4 sm:$0xff]  }
 0x319   :  { %5507 = vmatprep.subr.bf16.mxu0 %v6968_v13  ;;  %v4769_v13 = vpop.f32.mrf.mxu0 }
 0x31b   :  { %5047 = vmatpush1.bf16.msra.mxu1 %v6915_v36  ;;  %v7023_v36 = vld [vmem:[#allocation10 + $0x1d0] ss:$8 sps:$4 sm:$0xff]  }
 0x31c   :  { %5048 = vmatprep.subr.bf16.mxu1 %v6920_v52  ;;  %5508 = vmatpush1.bf16.msra.mxu0 %v6966_v5  ;;  %v7028_v52 = vld [vmem:[#allocation10 + $0x1c4] ss:$8 sps:$4 sm:$0xff]   ;;  %v4771_v5 = vpop.f32.mrf.mxu0 }
 0x31d   :  { %5509 = vmatprep.subr.bf16.mxu0 %v6971_v6  ;;  %v4810_v6 = vpop.f32.mrf.mxu1 }
 0x31f   :  { %5049 = vmatpush1.bf16.msra.mxu1 %v6918_v7  ;;  %v7026_v7 = vld [vmem:[#allocation10 + $0x1c0] ss:$8 sps:$4 sm:$0xff]  }
 0x320   :  { %5050 = vmatprep.subr.bf16.mxu1 %v6923_v57  ;;  %5510 = vmatpush2.bf16.msra.mxu0 %v6969_v9  ;;  %v4773_v57 = vpop.f32.mrf.mxu0  ;;  %v7516_v9 = vld [vmem:[#allocation8] sm:$0xf] }
 0x321   :  { %5511 = vmatprep.subr.bf16.mxu0 %v6974_v41  ;;  %v4812_v41 = vpop.f32.mrf.mxu1 }
 0x323   :  { %5051 = vmatpush2.bf16.msra.mxu1 %v6921_v10 }
 0x324   :  { %5052 = vmatprep.subr.bf16.mxu1 %v6926_v11  ;;  %5512 = vmatpush2.bf16.msra.mxu0 %v6972_v14  ;;  %v3440_v11 = vrot.slane %v7516_v9, %v7438_v54  ;;  %v3436_v14 = vrot.slane %v7516_v9, %v7414_v49 }
 0x325   :  { %5513 = vmatprep.subr.bf16.mxu0 %v6977_v15  ;;  %v4814_v15 = vpop.f32.mrf.mxu1 }
 0x327   :  { %5053 = vmatpush2.bf16.msra.mxu1 %v6924_v45 }
 0x328   :  { %5054 = vmatprep.subr.bf16.mxu1 %v6929_v59  ;;  %5514 = vmatpush2.bf16.msra.mxu0 %v6975_v17  ;;  %v4770_v59 = vadd.f32 %v4769_v13, %v3440_v11  ;;  %v4768_v17 = vadd.f32 %v4767_v2, %v3436_v14  ;;  %v7042_v2 = vld [vmem:[#allocation13 + $0x38] sm:$0xff]   ;;  %v7045_v13 = vld [vmem:[#allocation13 + $0x68] sm:$0xff]  }
 0x329   :  { %5515 = vmatprep.subr.bf16.mxu0 %v6980_v46  ;;  %v4772_v46 = vadd.f32 %v4771_v5, %v3436_v14  ;;  %v7048_v5 = vld [vmem:[#allocation13 + $0x20] sm:$0xff]   ;;  %v3448_v14 = vrot.slane %v7516_v9, %v3093_v32 }
 0x32b   :  { %5055 = vmatpush2.bf16.msra.mxu1 %v6927_v18  ;;  %v4816_v18 = vpop.f32.mrf.mxu1 }
 0x32c   :  { %5056 = vmatprep.subr.bf16.mxu1 %v6932_v40  ;;  %5516 = vmatpush2.bf16.msra.mxu0 %v6978_v19  ;;  %v7031_v19 = vld [vmem:[#allocation10 + $0x1b4] ss:$8 sps:$4 sm:$0xff]  }
 0x32d   :  { %5517 = vmatprep.subr.bf16.mxu0 %v6983_v20  ;;  %v4813_v20 = vadd.f32 %v4812_v41, %v4770_v59 }
 0x32f   :  { %5057 = vmatpush2.bf16.msra.mxu1 %v6930_v21  ;;  %v4774_v21 = vadd.f32 %v4773_v57, %v3440_v11 }
 0x330   :  { %5058 = vmatprep.subr.bf16.mxu1 %v6935_v38  ;;  %5518 = vmatpush2.bf16.msra.mxu0 %v6981_v23  ;;  %v7029_v38 = vld [vmem:[#allocation10 + $0x1b0] ss:$8 sps:$4 sm:$0xff]   ;;  %v4811_v23 = vadd.f32 %v4810_v6, %v4768_v17 }
 0x331   :  { %5519 = vmatprep.subr.bf16.mxu0 %v6986_v24 }
 0x333   :  { %5059 = vmatpush2.bf16.msra.mxu1 %v6933_v25  ;;  %v4815_v25 = vadd.f32 %v4814_v15, %v4772_v46  ;;  %v3444_v15 = vrot.slane %v7516_v9, %v3089_v62 }
 0x334   :  { %5060 = vmatprep.subr.bf16.mxu1 %v6938_v27  ;;  %5520 = vmatpush2.bf16.msra.mxu0 %v6984_v29 }
 0x335   :  { %5521 = vmatprep.subr.bf16.mxu0 %v6989_v30 }
 0x337   :  { %5061 = vmatpush2.bf16.msra.mxu1 %v6936_v34 }
 0x338   :  { %5062 = vmatprep.subr.bf16.mxu1 %v6941_v55  ;;  %5522 = vmatpush2.bf16.msra.mxu0 %v6987_v39  ;;  %v7034_v55 = vld [vmem:[#allocation10 + $0x1a4] ss:$8 sps:$4 sm:$0xff]   ;;  %v4817_v39 = vadd.f32 %v4816_v18, %v4774_v21 }
 0x339   :  { %5523 = vmatprep.subr.bf16.mxu0 %v6992_v31 }
 0x33b   :  { %5063 = vmatpush2.bf16.msra.mxu1 %v6939_v33 }
 0x33c   :  { %5064 = vmatprep.subr.bf16.mxu1 %v6944_v60  ;;  %5524 = vmatpush2.bf16.msra.mxu0 %v6990_v35  ;;  %v7032_v60 = vld [vmem:[#allocation10 + $0x1a0] ss:$8 sps:$4 sm:$0xff]  }
 0x33f   :  { %5065 = vmatpush2.bf16.msra.mxu1 %v6942_v37  ;;  %v4853_v10 = vpop.f32.mrf.mxu0 }
 0x340   :  { %5536 = vmatprep.subr.bf16.mxu1 %v6995_v44  ;;  %v4854_v29 = vadd.f32 %v4853_v10, %v4811_v23 }
 0x341   :  { %v4855_v45 = vpop.f32.mrf.mxu0 }
 0x342   :  { %5067 = vmatmul.mubr.bf16.vlgmr.msra.gmra.mxu1 %v7506_v28  ;;  %v7010_v28 = vld [vmem:[#allocation10 + $0x124] ss:$8 sps:$4 sm:$0xff]   ;;  %v4856_v27 = vadd.f32 %v4855_v45, %v4813_v20 }
 0x343   :  { %5537 = vmatpush1.bf16.msra.mxu1 %v6993_v43  ;;  %v4857_v40 = vpop.f32.mrf.mxu0 }
 0x344   :  { %5538 = vmatprep.subr.bf16.mxu1 %v6998_v56  ;;  %v4858_v31 = vadd.f32 %v4857_v40, %v4815_v25 }
 0x345   :  { %v4859_v30 = vpop.f32.mrf.mxu0 }
 0x346   :  { %v4860_v43 = vadd.f32 %v4859_v30, %v4817_v39 }
 0x347   :  { %5539 = vmatpush1.bf16.msra.mxu1 %v6996_v47  ;;  %v7037_v47 = vld [vmem:[#allocation10 + $0x194] ss:$8 sps:$4 sm:$0xff]  }
 0x348   :  { %5540 = vmatprep.subr.bf16.mxu1 %v7001_v48 }
 0x34b   :  { %5541 = vmatpush1.bf16.msra.mxu1 %v6999_v22 }
 0x34c   :  { %5542 = vmatprep.subr.bf16.mxu1 %v7004_v53 }
 0x34f   :  { %5543 = vmatpush1.bf16.msra.mxu1 %v7002_v50  ;;  %v7035_v50 = vld [vmem:[#allocation10 + $0x190] ss:$8 sps:$4 sm:$0xff]  }
 0x350   :  { %5544 = vmatprep.subr.bf16.mxu1 %v7007_v51 }
 0x353   :  { %5545 = vmatpush1.bf16.msra.mxu1 %v7005_v3 }
 0x354   :  { %5546 = vmatprep.subr.bf16.mxu1 %v7010_v28 }
 0x357   :  { %5547 = vmatpush1.bf16.msra.mxu1 %v7008_v8  ;;  %v7040_v8 = vld [vmem:[#allocation10 + $0x184] ss:$8 sps:$4 sm:$0xff]  }
 0x358   :  { %5548 = vmatprep.subr.bf16.mxu1 %v7013_v58 }
 0x35b   :  { %5549 = vmatpush1.bf16.msra.mxu1 %v7011_v26 }
 0x35c   :  { %5550 = vmatprep.subr.bf16.mxu1 %v7016_v61  ;;  %v7038_v61 = vld [vmem:[#allocation10 + $0x180] ss:$8 sps:$4 sm:$0xff]  }
 0x35f   :  { %5551 = vmatpush1.bf16.msra.mxu1 %v7014_v63 }
 0x360   :  { %5552 = vmatprep.subr.bf16.mxu1 %v7019_v0 }
 0x363   :  { %5553 = vmatpush2.bf16.msra.mxu1 %v7017_v1 }
 0x364   :  { %5554 = vmatprep.subr.bf16.mxu1 %v7022_v42  ;;  %v7041_v42 = vld [vmem:[#allocation13 + $0x78] sm:$0xff]  }
 0x365   :  { %6514 = vmatprep.subr.bf16.mxu0 %v7041_v42  ;;  %v5161_v42 = vld [vmem:[#allocation11] sm:$0x3] }
 0x367   :  { %5555 = vmatpush2.bf16.msra.mxu1 %v7020_v4  ;;  %v7043_v4 = vld [vmem:[#allocation13 + $0x70] sm:$0xff]  }
 0x368   :  { %5556 = vmatprep.subr.bf16.mxu1 %v7025_v16  ;;  %v7044_v16 = vld [vmem:[#allocation13 + $0x30] sm:$0xff]  }
 0x36b   :  { %5557 = vmatpush2.bf16.msra.mxu1 %v7023_v36  ;;  %v7046_v36 = vld [vmem:[#allocation13 + $0x28] sm:$0xff]  }
 0x36c   :  { %5558 = vmatprep.subr.bf16.mxu1 %v7028_v52  ;;  %v7047_v52 = vld [vmem:[#allocation13 + $0x60] sm:$0xff]  }
 0x36f   :  { %5559 = vmatpush2.bf16.msra.mxu1 %v7026_v7 }
 0x370   :  { %5560 = vmatprep.subr.bf16.mxu1 %v7031_v19 }
 0x373   :  { %5561 = vmatpush2.bf16.msra.mxu1 %v7029_v38 }
 0x374   :  { %5562 = vmatprep.subr.bf16.mxu1 %v7034_v55 }
 0x377   :  { %5563 = vmatpush2.bf16.msra.mxu1 %v7032_v60 }
 0x378   :  { %5564 = vmatprep.subr.bf16.mxu1 %v7037_v47 }
 0x37b   :  { %5565 = vmatpush2.bf16.msra.mxu1 %v7035_v50 }
 0x37c   :  { %5566 = vmatprep.subr.bf16.mxu1 %v7040_v8  ;;  %v7052_v8 = vld [vmem:[#allocation13 + $0x10] sm:$0xff]  }
 0x37f   :  { %5567 = vmatpush2.bf16.msra.mxu1 %v7038_v61  ;;  %v4939_v6 = vpop.f32.mrf.mxu0  ;;  %v7055_v61 = vld [vmem:[#allocation13 + $0x40] sm:$0xff]  }
 0x380   :  { %v4940_v46 = vadd.f32 %v4939_v6, %v3444_v15 }
 0x381   :  { %v4941_v7 = vpop.f32.mrf.mxu0 }
 0x382   :  { %v4896_v24 = vpop.f32.mrf.mxu1  ;;  %v4942_v17 = vadd.f32 %v4941_v7, %v3448_v14 }
 0x383   :  { %v4897_v35 = vadd.f32 %v4896_v24, %v4854_v29  ;;  %v4943_v57 = vpop.f32.mrf.mxu0 }
 0x384   :  { %v4898_v34 = vpop.f32.mrf.mxu1  ;;  %v4944_v40 = vadd.f32 %v4943_v57, %v3444_v15 }
 0x385   :  { %v4899_v33 = vadd.f32 %v4898_v34, %v4856_v27  ;;  %v5077_v51 = vmul.f32 0.2, %v4897_v35  ;;  %v4945_v10 = vpop.f32.mrf.mxu0 }
 0x386   :  { %v4900_v37 = vpop.f32.mrf.mxu1  ;;  %v4946_v38 = vadd.f32 %v4945_v10, %v3448_v14 }
 0x387   :  { %v4901_v44 = vadd.f32 %v4900_v37, %v4858_v31  ;;  %v5078_v48 = vmul.f32 0.2, %v4899_v33  ;;  %v5085_v63 = vmax.f32 %v4897_v35, %v5077_v51  ;;  %v7049_v51 = vld [vmem:[#allocation13 + $0x58] sm:$0xff]  }
 0x388   :  { %v4902_v56 = vpop.f32.mrf.mxu1 }
 0x389   :  { %v5081_v22 = vmul.f32 0.2, %v4901_v44  ;;  %v4903_v53 = vadd.f32 %v4902_v56, %v4860_v43  ;;  %v5086_v58 = vmax.f32 %v4899_v33, %v5078_v48 }
 0x38b   :  { %v5082_v3 = vmul.f32 0.2, %v4903_v53  ;;  %v5089_v28 = vmax.f32 %v4901_v44, %v5081_v22 }
 0x38d   :  { %v5090_v26 = vmax.f32 %v4903_v53, %v5082_v3  ;;  %v5093_v1 = vpack.c.bf16 %v5089_v28, %v5085_v63  ;;  %v7050_v3 = vld [vmem:[#allocation13 + $0x18] sm:$0xff]   ;;  %v7051_v28 = vld [vmem:[#allocation13 + $0x50] sm:$0xff]   ;;  %v7056_v63 = vld [vmem:[#allocation13] sm:$0xff]  }
 0x38f   :  { %v5094_v0 = vpack.c.bf16 %v5090_v26, %v5086_v58  ;;  %v7053_v58 = vld [vmem:[#allocation13 + $0x48] sm:$0xff]  }
 0x390   :  { %v7054_v26 = vld [vmem:[#allocation13 + $0x8] sm:$0xff]  }
 0x391   :  { %5525 = vmatprep.mubr.bf16.mxu0 %v5094_v0 }
 0x392   :  { %5526 = vmatmul.mubr.bf16.vlgmr.msra.gmra.mxu0 %v5093_v1 }
 0x393   :  { %6515 = vmatpush3.bf16.msra.mxu0 %v7042_v2  ;;  %v5170_v2 = vrot.slane %v5161_v42, %v7438_v54 }
 0x394   :  { %6516 = vmatprep.subr.bf16.mxu0 %v7043_v4  ;;  %v5166_v4 = vrot.slane %v5161_v42, %v7414_v49 }
 0x397   :  { %6517 = vmatpush3.bf16.msra.mxu0 %v7044_v16 }
 0x398   :  { %6518 = vmatprep.subr.bf16.mxu0 %v7045_v13 }
 0x39b   :  { %6519 = vmatpush3.bf16.msra.mxu0 %v7046_v36 }
 0x39c   :  { %6520 = vmatprep.subr.bf16.mxu0 %v7047_v52 }
 0x39f   :  { %6521 = vmatpush3.bf16.msra.mxu0 %v7048_v5 }
 0x3a0   :  { %6522 = vmatprep.subr.bf16.mxu0 %v7049_v51 }
 0x3a3   :  { %6523 = vmatpush3.bf16.msra.mxu0 %v7050_v3 }
 0x3a4   :  { %6524 = vmatprep.subr.bf16.mxu0 %v7051_v28 }
 0x3a7   :  { %6525 = vmatpush3.bf16.msra.mxu0 %v7052_v8 }
 0x3a8   :  { %6526 = vmatprep.subr.bf16.mxu0 %v7053_v58 }
 0x3ab   :  { %6527 = vmatpush3.bf16.msra.mxu0 %v7054_v26 }
 0x3ac   :  { %6528 = vmatprep.subr.bf16.mxu0 %v7055_v61 }
 0x3af   :  { %6529 = vmatpush3.bf16.msra.mxu0 %v7056_v63 }
 0x3bf   :  { %v5025_v45 = vpop.f32.mrf.mxu0 }
 0x3c1   :  { %v5027_v18 = vpop.f32.mrf.mxu0 }
 0x3c2   :  { %v4982_v41 = vpop.f32.mrf.mxu1 }
 0x3c3   :  { %v4983_v20 = vadd.f32 %v4982_v41, %v4940_v46  ;;  %v5029_v24 = vpop.f32.mrf.mxu0 }
 0x3c4   :  { %v4984_v11 = vpop.f32.mrf.mxu1 }
 0x3c5   :  { %v4985_v19 = vadd.f32 %v4984_v11, %v4942_v17  ;;  %v5026_v32 = vadd.f32 %v5025_v45, %v4983_v20  ;;  %v5031_v62 = vpop.f32.mrf.mxu0 }
 0x3c6   :  { %v4986_v59 = vpop.f32.mrf.mxu1 }
 0x3c7   :  { %v4987_v23 = vadd.f32 %v4986_v59, %v4944_v40  ;;  %v5028_v29 = vadd.f32 %v5027_v18, %v4985_v19 }
 0x3c8   :  { %v4988_v21 = vpop.f32.mrf.mxu1 }
 0x3c9   :  { %v4989_v27 = vadd.f32 %v4988_v21, %v4946_v38  ;;  %v5030_v34 = vadd.f32 %v5029_v24, %v4987_v23  ;;  %v6497_v23 = vld [vmem:[#allocation14] ss:$0 sm:$0xff] }
 0x3cb   :  { %v5032_v31 = vadd.f32 %v5031_v62, %v4989_v27 }
 0x402   :  { %v5068_v25 = vpop.f32.mrf.mxu1 }
 0x403   :  { %v5069_v9 = vadd.f32 %v5068_v25, %v5026_v32 }
 0x404   :  { %v5070_v30 = vpop.f32.mrf.mxu1 }
 0x405   :  { %v5071_v12 = vadd.f32 %v5070_v30, %v5028_v29  ;;  %v5079_v43 = vmul.f32 0.2, %v5069_v9 }
 0x406   :  { %v5072_v55 = vpop.f32.mrf.mxu1 }
 0x407   :  { %v5073_v39 = vadd.f32 %v5072_v55, %v5030_v34  ;;  %v5080_v60 = vmul.f32 0.2, %v5071_v12  ;;  %v5087_v22 = vmax.f32 %v5069_v9, %v5079_v43 }
 0x408   :  { %v5074_v33 = vpop.f32.mrf.mxu1 }
 0x409   :  { %v5083_v35 = vmul.f32 0.2, %v5073_v39  ;;  %v5075_v37 = vadd.f32 %v5074_v33, %v5032_v31  ;;  %v5088_v47 = vmax.f32 %v5071_v12, %v5080_v60 }
 0x40b   :  { %v5084_v44 = vmul.f32 0.2, %v5075_v37  ;;  %v5091_v56 = vmax.f32 %v5073_v39, %v5083_v35 }
 0x40d   :  { %v5092_v48 = vmax.f32 %v5075_v37, %v5084_v44  ;;  %v5095_v50 = vpack.c.bf16 %v5091_v56, %v5087_v22 }
 0x40f   :  { %v5096_v53 = vpack.c.bf16 %v5092_v48, %v5088_v47 }
 0x411   :  { %5568 = vmatprep.mubr.bf16.mxu1 %v5096_v53 }
 0x412   :  { %5569 = vmatmul.mubr.bf16.vlgmr.msra.gmra.mxu1 %v5095_v50 }
 0x452   :  { %v5527_v0 = vpop.f32.mrf.mxu0 }
 0x453   :  { %v5528_v52 = vadd.f32 %v5527_v0, %v5166_v4 }
 0x454   :  { %v5529_v1 = vpop.f32.mrf.mxu0 }
 0x455   :  { %v5530_v36 = vadd.f32 %v5529_v1, %v5170_v2 }
 0x456   :  { %v5531_v16 = vpop.f32.mrf.mxu0 }
 0x457   :  { %v5532_v7 = vadd.f32 %v5531_v16, %v5166_v4 }
 0x458   :  { %v5533_v5 = vpop.f32.mrf.mxu0 }
 0x459   :  { %v5534_v11 = vadd.f32 %v5533_v5, %v5170_v2 }
 0x4d2   :  { %v5570_v13 = vpop.f32.mrf.mxu1 }
 0x4d3   :  { %v5571_v41 = vadd.f32 %v5570_v13, %v5528_v52 }
 0x4d4   :  { %v5572_v6 = vpop.f32.mrf.mxu1 }
 0x4d5   :  { %v5573_v57 = vadd.f32 %v5572_v6, %v5530_v36  ;;  %v5579_v46 = vmul.f32 0.2, %v5571_v41 }
 0x4d6   :  { %v5574_v10 = vpop.f32.mrf.mxu1 }
 0x4d7   :  { %v5575_v14 = vadd.f32 %v5574_v10, %v5532_v7  ;;  %v5580_v45 = vmul.f32 0.2, %v5573_v57  ;;  %v5583_v19 = vmax.f32 %v5571_v41, %v5579_v46 }
 0x4d8   :  { %v5576_v15 = vpop.f32.mrf.mxu1 }
 0x4d9   :  { %v5581_v59 = vmul.f32 0.2, %v5575_v14  ;;  %v5577_v17 = vadd.f32 %v5576_v15, %v5534_v11  ;;  %v5584_v49 = vmax.f32 %v5573_v57, %v5580_v45 }
 0x4db   :  { %v5582_v54 = vmul.f32 0.2, %v5577_v17  ;;  %v5585_v18 = vmax.f32 %v5575_v14, %v5581_v59 }
 0x4dd   :  { %v5586_v40 = vmax.f32 %v5577_v17, %v5582_v54  ;;  %v5587_v21 = vpack.c.bf16 %v5585_v18, %v5583_v19 }
 0x4df   :  { %v5588_v20 = vpack.c.bf16 %v5586_v40, %v5584_v49 }
 0x4e1   :  { %5756 = vmatprep.mubr.bf16.mxu0 %v5588_v20 }
 0x4e2   :  { %5757 = vmatmul.mubr.bf16.vlgmr.msra.gmra.mxu0 %v5587_v21 }
 0x5a2   :  { %v6530_v38 = vpop.f32.mrf.mxu0 }
 0x5a4   :  { %v6531_v24 = vpop.f32.mrf.mxu0 }
 0x5a5   :  { %v6532_v25 = vadd.f32 %v6531_v24, %v6530_v38 }
 0x5a6   :  { %v6533_v27 = vpop.f32.mrf.mxu0 }
 0x5a7   :  { %v5759_v29 = vadd.f32 %v6532_v25, %v6497_v23 }
 0x5a8   :  { %v6534_v32 = vpop.f32.mrf.mxu0 }
 0x5a9   :  { %v5765_v30 = vsub.f32 0.0, %v5759_v29  ;;  %v6535_v12 = vadd.f32 %v6534_v32, %v6533_v27 }
 0x5ab   :  { %v5767_v34 = vmul.f32 1.442695, %v5765_v30  ;;  %v5762_v62 = vadd.f32 %v6535_v12, %v6497_v23 }
 0x5ad   :  { %7057 = vpow2.f32 %v5767_v34  ;;  %v5766_v9 = vsub.f32 0.0, %v5762_v62 }
 0x5af   :  { %v5769_v55 = vmul.f32 1.442695, %v5766_v9 }
 0x5b1   :  { %7059 = vpow2.f32 %v5769_v55 }
 0x5ba   :  { %v7058_v39 = vpop.eup %7057 }
 0x5bb   :  { %v5771_v31 = vadd.f32 1.0, %v7058_v39 }
 0x5bd   :  { %7061 = vrcp.f32 %v5771_v31 }
 0x5be   :  { %v7060_v33 = vpop.eup %7059 }
 0x5bf   :  { %v5772_v60 = vadd.f32 1.0, %v7060_v33 }
 0x5c1   :  { %7063 = vrcp.f32 %v5772_v60 }
 0x5ca   :  { %v7062_v35 = vpop.eup %7061 }
 0x5cb   :  { %5776 = vst.msk [vmem:[%s7545_s9] sm:$0xff] %vm5775_vm0, %v7062_v35 }
 0x5ce   :  { %v7064_v37 = vpop.eup %7063 }
 0x5cf   :  { %5777 = vst.msk [vmem:[%s7545_s9 + $0x8] sm:$0xff] %vm5775_vm0, %v7064_v37 }
 0x5d0   :  { %5782 = vsyncpa [#allocation4], 1 }
 0x5d1   :  { %5783 = vsyncpa [#allocation6], 1 }
 0x5d2   :  { %5784 = vsyncpa [#allocation9], 1 }
 0x5d3   :  { %5785 = vsyncpa [#allocation12], 1 }
 0x5d4   :  { %5786 = vsyncpa [#allocation15], 1 }

</bundles_post_ra>
